<compile_context>
chip_gen: v7x
topology: tpu7x:2x2x1
jax: 0.10.0
libtpu: 0.0.40
codegen_flags: <defaults>
</compile_context>

<pallas_src>
import functools
import math

import jax
import jax.numpy as jnp
from jax.experimental import pallas as pl
from jax.experimental.pallas import tpu as pltpu


def transformer_block_kernel(x_kv_ref, x_q_ref,
                             wq_ref, bq_ref, wk_ref, bk_ref, wv_ref, bv_ref,
                             wo_ref, bo_ref, g1_ref, be1_ref,
                             w1_ref, b1_ref, w2_ref, b2_ref, g2_ref, be2_ref,
                             out_ref,
                             k_cache, v_cache, q_buf, ctx_buf,
                             *, num_heads, d_k, kv_block, eps, mxu_dtype,
                             approx_recip):
    H, dk, TK = num_heads, d_k, kv_block
    _, S, D = x_kv_ref.shape
    TS = x_q_ref.shape[1]
    n_kv_chunks = S // TK

    # ---- K/V projection cache: computed once per batch element.  The sequence
    # grid axis is "arbitrary", so the s == 0 tile runs before all other tiles
    # of this batch and later tiles just reuse the bf16 caches. ----
    @pl.when(pl.program_id(1) == 0)
    def _fill_kv_cache():
        x_kv = x_kv_ref[0]                                            # (S, D) bf16
        k_full = jnp.dot(x_kv, wk_ref[...],
                         preferred_element_type=jnp.float32) + bk_ref[...]   # (S, D) f32
        v_full = jnp.dot(x_kv, wv_ref[...],
                         preferred_element_type=jnp.float32) + bv_ref[...]   # (S, D) f32
        # Head split = 128-aligned lane slices written straight to bf16 scratch;
        # the activation is never broadcast/replicated over heads.
        for h in range(H):
            k_cache[h] = k_full[:, h * dk:(h + 1) * dk].astype(mxu_dtype)
            v_cache[h] = v_full[:, h * dk:(h + 1) * dk].astype(mxu_dtype)

    # ---- Q projection for this sequence tile (1/sqrt(d_k) already folded into
    # wq/bq by the wrapper). ----
    x_q = x_q_ref[0]                                                  # (TS, D) f32 residual
    q_full = jnp.dot(x_q.astype(mxu_dtype), wq_ref[...],
                     preferred_element_type=jnp.float32) + bq_ref[...]        # (TS, D) f32
    for h in range(H):
        q_buf[h] = q_full[:, h * dk:(h + 1) * dk].astype(mxu_dtype)
    q = q_buf[...]                                                    # (H, TS, dk) bf16

    # ---- Flash-style online softmax over KV chunks: working set is
    # (H, TS, TK) scores + (H, TS, dk) f32 accumulator, independent of S. ----
    m_i = jnp.full((H, TS, 1), -jnp.inf, jnp.float32)
    l_i = jnp.zeros((H, TS, 1), jnp.float32)
    acc = jnp.zeros((H, TS, dk), jnp.float32)
    for c in range(n_kv_chunks):                  # static unroll; chunk count is small
        k_c = k_cache[:, c * TK:(c + 1) * TK, :]                      # (H, TK, dk) bf16
        v_c = v_cache[:, c * TK:(c + 1) * TK, :]                      # (H, TK, dk) bf16
        sc = jnp.einsum('hqd,hkd->hqk', q, k_c,
                        preferred_element_type=jnp.float32)           # (H, TS, TK) f32
        m_new = jnp.maximum(m_i, jnp.max(sc, axis=-1, keepdims=True))
        alpha = jnp.exp(m_i - m_new)
        p = jnp.exp(sc - m_new)
        l_i = alpha * l_i + jnp.sum(p, axis=-1, keepdims=True)
        acc = alpha * acc + jnp.einsum('hqk,hkd->hqd', p.astype(mxu_dtype), v_c,
                                       preferred_element_type=jnp.float32)
        m_i = m_new
    # EUP reciprocal (approx adds ~1e-3 rel error; flag off for tight-tolerance use).
    ctx = acc * pl.reciprocal(l_i, approx=approx_recip)               # (H, TS, dk) f32

    # ---- Output projection: heads re-merged along the lane dim into a bf16
    # scratch, then a single (TS, D) @ (D, D) dot.  No (H, TS, D) f32 partials
    # and no per-head VPU adds — the head reduction happens inside the MXU
    # contraction over the merged D axis. ----
    for h in range(H):
        ctx_buf[:, h * dk:(h + 1) * dk] = ctx[h].astype(mxu_dtype)
    attn_out = jnp.dot(ctx_buf[...], wo_ref[...],
                       preferred_element_type=jnp.float32) + bo_ref[...]      # (TS, D) f32

    def layernorm(val, g_ref, b_ref):
        mu = jnp.mean(val, axis=-1, keepdims=True)
        var = jnp.mean((val - mu) ** 2, axis=-1, keepdims=True)
        return (val - mu) * jax.lax.rsqrt(var + eps) * g_ref[...] + b_ref[...]

    # dropout == identity (eval mode)
    x1 = layernorm(x_q + attn_out, g1_ref, be1_ref)                   # (TS, D) f32

    # FeedForward: weights pre-transposed to (in, out) -> plain dots, no .T.
    h1 = jnp.maximum(
        jnp.dot(x1.astype(mxu_dtype), w1_ref[...],
                preferred_element_type=jnp.float32) + b1_ref[...], 0.0)       # (TS, d_ff)
    ff = jnp.dot(h1.astype(mxu_dtype), w2_ref[...],
                 preferred_element_type=jnp.float32) + b2_ref[...]            # (TS, D)

    out_ref[0] = layernorm(x1 + ff, g2_ref, be2_ref).astype(out_ref.dtype)


def _vmem_limit_bytes(default_capacity=128 * 1024 * 1024):
    """Per-generation VMEM limit: ~100 MiB on 128 MiB parts, ~56 MiB on v7x."""
    cap = default_capacity
    get_info = getattr(pltpu, "get_tpu_info", None)
    if get_info is not None:
        try:
            cap = int(getattr(get_info(), "vmem_capacity_bytes", cap))
        except Exception:   # hardware query unavailable (e.g. interpret mode)
            cap = default_capacity
    return int(min((cap * 7) // 8, 100 * 1024 * 1024))


def transformer_block(x, params, num_heads, *, seq_block=None, kv_block=512,
                      eps=1e-5, mxu_dtype=jnp.bfloat16, approx_recip=True):
    B, S, D = x.shape
    assert D % num_heads == 0
    d_k = D // num_heads

    if seq_block is None:
        # v5e has a 128-wide MXU -> TS=128 already fills it; v6e/v7x want 256.
        kind = jax.devices()[0].device_kind.lower()
        seq_block = 128 if "v5" in kind else 256
    TS = min(seq_block, S)
    assert S % TS == 0, "sequence length must be divisible by the sequence tile"
    TK = min(kv_block, S)
    assert S % TK == 0, "sequence length must be divisible by the KV chunk"

    scale = 1.0 / math.sqrt(d_k)     # folded into W_q / b_q (zero kernel cost)
    mx = lambda a: a.astype(mxu_dtype)

    wq = mx(params["wq"].T * scale)
    bq = (params["bq"] * scale).reshape(1, D)
    wk = mx(params["wk"].T)
    bk = params["bk"].reshape(1, D)
    wv = mx(params["wv"].T)
    bv = params["bv"].reshape(1, D)
    wo = mx(params["wo"].T)
    bo = params["bo"].reshape(1, D)
    w1 = mx(params["w1"].T)                       # (D, d_ff)
    b1 = params["b1"].reshape(1, -1)
    w2 = mx(params["w2"].T)                       # (d_ff, D)
    b2 = params["b2"].reshape(1, D)
    g1, be1 = params["g1"].reshape(1, D), params["be1"].reshape(1, D)
    g2, be2 = params["g2"].reshape(1, D), params["be2"].reshape(1, D)

    weights = [wq, bq, wk, bk, wv, bv, wo, bo, g1, be1, w1, b1, w2, b2, g2, be2]

    kernel = functools.partial(
        transformer_block_kernel, num_heads=num_heads, d_k=d_k, kv_block=TK,
        eps=eps, mxu_dtype=mxu_dtype, approx_recip=approx_recip)

    def w_spec(arr):
        zeros = (0,) * arr.ndim
        # Constant block index -> the pipeline only DMAs the weight once.
        return pl.BlockSpec(arr.shape, lambda b, s, _z=zeros: _z)

    grid_spec = pltpu.PrefetchScalarGridSpec(
        num_scalar_prefetch=0,
        grid=(B, S // TS),
        in_specs=[
            # Full-sequence bf16 copy of x: K/V source, block changes once per batch.
            pl.BlockSpec((1, S, D), lambda b, s: (b, 0, 0)),
            # Per-tile f32 x: query / residual / LayerNorm path.
            pl.BlockSpec((1, TS, D), lambda b, s: (b, s, 0)),
        ] + [w_spec(w) for w in weights],
        out_specs=pl.BlockSpec((1, TS, D), lambda b, s: (b, s, 0)),
        scratch_shapes=[
            pltpu.VMEM((num_heads, S, d_k), mxu_dtype),    # K cache (per batch)
            pltpu.VMEM((num_heads, S, d_k), mxu_dtype),    # V cache (per batch)
            pltpu.VMEM((num_heads, TS, d_k), mxu_dtype),   # head-major Q tile
            pltpu.VMEM((TS, D), mxu_dtype),                # merged-head attention ctx
        ])

    return pl.pallas_call(
        kernel,
        out_shape=jax.ShapeDtypeStruct((B, S, D), jnp.float32),
        grid_spec=grid_spec,
        compiler_params=pltpu.CompilerParams(
            # Sequence axis must be "arbitrary": the K/V caches are filled at
            # s == 0 and reused by every later tile of the same batch element.
            dimension_semantics=("parallel", "arbitrary"),
            vmem_limit_bytes=_vmem_limit_bytes()),
    )(x.astype(mxu_dtype), x, *weights)


def ref_forward(x, p, num_heads, eps=1e-5):
    """Pure-JAX reference mirroring the PyTorch forward (eval mode)."""
    B, S, D = x.shape
    d_k = D // num_heads

    def lin(v, w, b):
        return v @ w.T + b

    def mha(v):
        q = lin(v, p["wq"], p["bq"]).reshape(B, S, num_heads, d_k).transpose(0, 2, 1, 3)
        k = lin(v, p["wk"], p["bk"]).reshape(B, S, num_heads, d_k).transpose(0, 2, 1, 3)
        vv = lin(v, p["wv"], p["bv"]).reshape(B, S, num_heads, d_k).transpose(0, 2, 1, 3)
        scores = jnp.einsum("bhqd,bhkd->bhqk", q, k) / math.sqrt(d_k)
        attn = jax.nn.softmax(scores, axis=-1)
        out = jnp.einsum("bhqk,bhkd->bhqd", attn, vv)
        out = out.transpose(0, 2, 1, 3).reshape(B, S, D)
        return lin(out, p["wo"], p["bo"])

    def ln(v, g, b):
        mu = jnp.mean(v, axis=-1, keepdims=True)
        var = jnp.mean((v - mu) ** 2, axis=-1, keepdims=True)
        return (v - mu) / jnp.sqrt(var + eps) * g + b

    x1 = ln(x + mha(x), p["g1"], p["be1"])
    ff = lin(jnp.maximum(lin(x1, p["w1"], p["b1"]), 0.0), p["w2"], p["b2"])
    return ln(x1 + ff, p["g2"], p["be2"])


def init_params(key, d_model, num_heads, d_ff):
    ks = jax.random.split(key, 12)

    def w(k, shape, fan_in):
        bound = 1.0 / math.sqrt(fan_in)
        return jax.random.uniform(k, shape, jnp.float32, -bound, bound)

    return {
        "wq": w(ks[0], (d_model, d_model), d_model),
        "bq": w(ks[1], (d_model,), d_model),
        "wk": w(ks[2], (d_model, d_model), d_model),
        "bk": w(ks[3], (d_model,), d_model),
        "wv": w(ks[4], (d_model, d_model), d_model),
        "bv": w(ks[5], (d_model,), d_model),
        "wo": w(ks[6], (d_model, d_model), d_model),
        "bo": w(ks[7], (d_model,), d_model),
        "g1": jnp.ones((d_model,), jnp.float32),
        "be1": jnp.zeros((d_model,), jnp.float32),
        "w1": w(ks[8], (d_ff, d_model), d_model),
        "b1": w(ks[9], (d_ff,), d_model),
        "w2": w(ks[10], (d_model, d_ff), d_ff),
        "b2": w(ks[11], (d_model,), d_ff),
        "g2": jnp.ones((d_model,), jnp.float32),
        "be2": jnp.zeros((d_model,), jnp.float32),
    }


if __name__ == "__main__":
    # Small but lane-aligned demo shapes: D, d_ff, d_k are multiples of 128.
    # S=16 with TS=8 and TK=8 exercises the (B, S//TS) = (2, 2) grid, the
    # once-per-batch K/V cache fill, and the 2-chunk online softmax.
    B, S, d_model, num_heads, d_ff = 2, 16, 256, 2, 512

    key = jax.random.PRNGKey(0)
    kx, kp = jax.random.split(key)
    x = jax.random.normal(kx, (B, S, d_model), jnp.float32)
    params = init_params(kp, d_model, num_heads, d_ff)

    out = transformer_block(x, params, num_heads, seq_block=8, kv_block=8)
    out = jax.block_until_ready(out)

    ref = ref_forward(x, params, num_heads)
    assert out.shape == (B, S, d_model)
    max_diff = jnp.max(jnp.abs(out - ref))
    # bf16 MXU inputs (f32 accumulation) + approx softmax reciprocal.
    assert jnp.allclose(out, ref, atol=5e-2, rtol=5e-2), f"max abs diff {max_diff}"

    print("KERNEL_OK")
</pallas_src>

<mosaic_0001>
module attributes {stable_mosaic.version = 11 : i64} {
  func.func @transformer_block_kernel(%arg0: i32, %arg1: i32, %arg2: memref<1x16x256xbf16, #tpu.memory_space<vmem>>, %arg3: memref<1x8x256xf32, #tpu.memory_space<vmem>>, %arg4: memref<256x256xbf16, #tpu.memory_space<vmem>>, %arg5: memref<1x256xf32, #tpu.memory_space<vmem>>, %arg6: memref<256x256xbf16, #tpu.memory_space<vmem>>, %arg7: memref<1x256xf32, #tpu.memory_space<vmem>>, %arg8: memref<256x256xbf16, #tpu.memory_space<vmem>>, %arg9: memref<1x256xf32, #tpu.memory_space<vmem>>, %arg10: memref<256x256xbf16, #tpu.memory_space<vmem>>, %arg11: memref<1x256xf32, #tpu.memory_space<vmem>>, %arg12: memref<1x256xf32, #tpu.memory_space<vmem>>, %arg13: memref<1x256xf32, #tpu.memory_space<vmem>>, %arg14: memref<256x512xbf16, #tpu.memory_space<vmem>>, %arg15: memref<1x512xf32, #tpu.memory_space<vmem>>, %arg16: memref<512x256xbf16, #tpu.memory_space<vmem>>, %arg17: memref<1x256xf32, #tpu.memory_space<vmem>>, %arg18: memref<1x256xf32, #tpu.memory_space<vmem>>, %arg19: memref<1x256xf32, #tpu.memory_space<vmem>>, %arg20: memref<1x8x256xf32, #tpu.memory_space<vmem>>, %arg21: memref<2x16x128xbf16, #tpu.memory_space<vmem>>, %arg22: memref<2x16x128xbf16, #tpu.memory_space<vmem>>, %arg23: memref<2x8x128xbf16, #tpu.memory_space<vmem>>, %arg24: memref<8x256xbf16, #tpu.memory_space<vmem>>) attributes {dimension_semantics = [#tpu.dimension_semantics<parallel>, #tpu.dimension_semantics<arbitrary>], iteration_bounds = array<i64: 2, 2>, scalar_prefetch = 0 : i64, scratch_operands = 4 : i64, tpu.core_type = #tpu.core_type<tc>, window_params = [{transform_indices = @transform_0, window_bounds = array<i64: 1, 16, 256>}, {transform_indices = @transform_1, window_bounds = array<i64: 1, 8, 256>}, {pipeline_mode = #tpu.pipeline_mode<synchronous>, transform_indices = @transform_2, window_bounds = array<i64: 256, 256>}, {pipeline_mode = #tpu.pipeline_mode<synchronous>, transform_indices = @transform_3, window_bounds = array<i64: 1, 256>}, {pipeline_mode = #tpu.pipeline_mode<synchronous>, transform_indices = @transform_4, window_bounds = array<i64: 256, 256>}, {pipeline_mode = #tpu.pipeline_mode<synchronous>, transform_indices = @transform_5, window_bounds = array<i64: 1, 256>}, {pipeline_mode = #tpu.pipeline_mode<synchronous>, transform_indices = @transform_6, window_bounds = array<i64: 256, 256>}, {pipeline_mode = #tpu.pipeline_mode<synchronous>, transform_indices = @transform_7, window_bounds = array<i64: 1, 256>}, {pipeline_mode = #tpu.pipeline_mode<synchronous>, transform_indices = @transform_8, window_bounds = array<i64: 256, 256>}, {pipeline_mode = #tpu.pipeline_mode<synchronous>, transform_indices = @transform_9, window_bounds = array<i64: 1, 256>}, {pipeline_mode = #tpu.pipeline_mode<synchronous>, transform_indices = @transform_10, window_bounds = array<i64: 1, 256>}, {pipeline_mode = #tpu.pipeline_mode<synchronous>, transform_indices = @transform_11, window_bounds = array<i64: 1, 256>}, {pipeline_mode = #tpu.pipeline_mode<synchronous>, transform_indices = @transform_12, window_bounds = array<i64: 256, 512>}, {pipeline_mode = #tpu.pipeline_mode<synchronous>, transform_indices = @transform_13, window_bounds = array<i64: 1, 512>}, {pipeline_mode = #tpu.pipeline_mode<synchronous>, transform_indices = @transform_14, window_bounds = array<i64: 512, 256>}, {pipeline_mode = #tpu.pipeline_mode<synchronous>, transform_indices = @transform_15, window_bounds = array<i64: 1, 256>}, {pipeline_mode = #tpu.pipeline_mode<synchronous>, transform_indices = @transform_16, window_bounds = array<i64: 1, 256>}, {pipeline_mode = #tpu.pipeline_mode<synchronous>, transform_indices = @transform_17, window_bounds = array<i64: 1, 256>}, {transform_indices = @transform_18, window_bounds = array<i64: 1, 8, 256>}]} {
    %c0_i32 = arith.constant 0 : i32
    %0 = arith.cmpi eq, %arg1, %c0_i32 : i32
    %1 = arith.extui %0 : i1 to i32
    %c0_i32_0 = arith.constant 0 : i32
    %2 = arith.cmpi ne, %1, %c0_i32_0 : i32
    scf.if %2 {
      %c0_79 = arith.constant 0 : index
      %c0_80 = arith.constant 0 : index
      %c0_81 = arith.constant 0 : index
      %149 = vector.load %arg2[%c0_79, %c0_80, %c0_81] : memref<1x16x256xbf16, #tpu.memory_space<vmem>>, vector<1x16x256xbf16>
      %150 = vector.shape_cast %149 : vector<1x16x256xbf16> to vector<16x256xbf16>
      %c0_82 = arith.constant 0 : index
      %c0_83 = arith.constant 0 : index
      %151 = vector.load %arg6[%c0_82, %c0_83] : memref<256x256xbf16, #tpu.memory_space<vmem>>, vector<256x256xbf16>
      %cst_84 = arith.constant dense<0.000000e+00> : vector<16x256xf32>
      %152 = tpu.matmul %150, %151, %cst_84 {dimension_numbers = #tpu.dot_dimension_numbers<[1], [0], [0], [1], [0, 0, 1, 1], [], []>} : vector<16x256xbf16>, vector<256x256xbf16>, vector<16x256xf32> -> vector<16x256xf32>
      %c0_85 = arith.constant 0 : index
      %c0_86 = arith.constant 0 : index
      %153 = vector.load %arg7[%c0_85, %c0_86] : memref<1x256xf32, #tpu.memory_space<vmem>>, vector<1x256xf32>
      %154 = vector.broadcast %153 : vector<1x256xf32> to vector<16x256xf32>
      %155 = arith.addf %152, %154 : vector<16x256xf32>
      %c0_87 = arith.constant 0 : index
      %c0_88 = arith.constant 0 : index
      %156 = vector.load %arg8[%c0_87, %c0_88] : memref<256x256xbf16, #tpu.memory_space<vmem>>, vector<256x256xbf16>
      %cst_89 = arith.constant dense<0.000000e+00> : vector<16x256xf32>
      %157 = tpu.matmul %150, %156, %cst_89 {dimension_numbers = #tpu.dot_dimension_numbers<[1], [0], [0], [1], [0, 0, 1, 1], [], []>} : vector<16x256xbf16>, vector<256x256xbf16>, vector<16x256xf32> -> vector<16x256xf32>
      %c0_90 = arith.constant 0 : index
      %c0_91 = arith.constant 0 : index
      %158 = vector.load %arg9[%c0_90, %c0_91] : memref<1x256xf32, #tpu.memory_space<vmem>>, vector<1x256xf32>
      %159 = vector.broadcast %158 : vector<1x256xf32> to vector<16x256xf32>
      %160 = arith.addf %157, %159 : vector<16x256xf32>
      %161 = vector.extract_strided_slice %155 {offsets = [0, 0], sizes = [16, 128], strides = [1, 1]} : vector<16x256xf32> to vector<16x128xf32>
      %162 = arith.truncf %161 : vector<16x128xf32> to vector<16x128xbf16>
      %c0_92 = arith.constant 0 : index
      %c0_93 = arith.constant 0 : index
      %c0_94 = arith.constant 0 : index
      %163 = vector.load %arg21[%c0_92, %c0_93, %c0_94] : memref<2x16x128xbf16, #tpu.memory_space<vmem>>, vector<1x16x128xbf16>
      %164 = vector.shape_cast %163 : vector<1x16x128xbf16> to vector<16x128xbf16>
      %165 = vector.shape_cast %162 : vector<16x128xbf16> to vector<1x16x128xbf16>
      tpu.vector_store %arg21[%c0_92, %c0_93, %c0_94], %165 {strides = array<i32>} : memref<2x16x128xbf16, #tpu.memory_space<vmem>>, vector<1x16x128xbf16>,
      %166 = vector.extract_strided_slice %160 {offsets = [0, 0], sizes = [16, 128], strides = [1, 1]} : vector<16x256xf32> to vector<16x128xf32>
      %167 = arith.truncf %166 : vector<16x128xf32> to vector<16x128xbf16>
      %c0_95 = arith.constant 0 : index
      %c0_96 = arith.constant 0 : index
      %c0_97 = arith.constant 0 : index
      %168 = vector.load %arg22[%c0_95, %c0_96, %c0_97] : memref<2x16x128xbf16, #tpu.memory_space<vmem>>, vector<1x16x128xbf16>
      %169 = vector.shape_cast %168 : vector<1x16x128xbf16> to vector<16x128xbf16>
      %170 = vector.shape_cast %167 : vector<16x128xbf16> to vector<1x16x128xbf16>
      tpu.vector_store %arg22[%c0_95, %c0_96, %c0_97], %170 {strides = array<i32>} : memref<2x16x128xbf16, #tpu.memory_space<vmem>>, vector<1x16x128xbf16>,
      %171 = vector.extract_strided_slice %155 {offsets = [0, 128], sizes = [16, 128], strides = [1, 1]} : vector<16x256xf32> to vector<16x128xf32>
      %172 = arith.truncf %171 : vector<16x128xf32> to vector<16x128xbf16>
      %c1_98 = arith.constant 1 : index
      %c0_99 = arith.constant 0 : index
      %c0_100 = arith.constant 0 : index
      %173 = vector.load %arg21[%c1_98, %c0_99, %c0_100] : memref<2x16x128xbf16, #tpu.memory_space<vmem>>, vector<1x16x128xbf16>
      %174 = vector.shape_cast %173 : vector<1x16x128xbf16> to vector<16x128xbf16>
      %175 = vector.shape_cast %172 : vector<16x128xbf16> to vector<1x16x128xbf16>
      tpu.vector_store %arg21[%c1_98, %c0_99, %c0_100], %175 {strides = array<i32>} : memref<2x16x128xbf16, #tpu.memory_space<vmem>>, vector<1x16x128xbf16>,
      %176 = vector.extract_strided_slice %160 {offsets = [0, 128], sizes = [16, 128], strides = [1, 1]} : vector<16x256xf32> to vector<16x128xf32>
      %177 = arith.truncf %176 : vector<16x128xf32> to vector<16x128xbf16>
      %c1_101 = arith.constant 1 : index
      %c0_102 = arith.constant 0 : index
      %c0_103 = arith.constant 0 : index
      %178 = vector.load %arg22[%c1_101, %c0_102, %c0_103] : memref<2x16x128xbf16, #tpu.memory_space<vmem>>, vector<1x16x128xbf16>
      %179 = vector.shape_cast %178 : vector<1x16x128xbf16> to vector<16x128xbf16>
      %180 = vector.shape_cast %177 : vector<16x128xbf16> to vector<1x16x128xbf16>
      tpu.vector_store %arg22[%c1_101, %c0_102, %c0_103], %180 {strides = array<i32>} : memref<2x16x128xbf16, #tpu.memory_space<vmem>>, vector<1x16x128xbf16>,
    } else {
    }
    %c0 = arith.constant 0 : index
    %c0_1 = arith.constant 0 : index
    %c0_2 = arith.constant 0 : index
    %3 = vector.load %arg3[%c0, %c0_1, %c0_2] : memref<1x8x256xf32, #tpu.memory_space<vmem>>, vector<1x8x256xf32>
    %4 = vector.shape_cast %3 : vector<1x8x256xf32> to vector<8x256xf32>
    %5 = arith.truncf %4 : vector<8x256xf32> to vector<8x256xbf16>
    %c0_3 = arith.constant 0 : index
    %c0_4 = arith.constant 0 : index
    %6 = vector.load %arg4[%c0_3, %c0_4] : memref<256x256xbf16, #tpu.memory_space<vmem>>, vector<256x256xbf16>
    %cst = arith.constant dense<0.000000e+00> : vector<8x256xf32>
    %7 = tpu.matmul %5, %6, %cst {dimension_numbers = #tpu.dot_dimension_numbers<[1], [0], [0], [1], [0, 0, 1, 1], [], []>} : vector<8x256xbf16>, vector<256x256xbf16>, vector<8x256xf32> -> vector<8x256xf32>
    %c0_5 = arith.constant 0 : index
    %c0_6 = arith.constant 0 : index
    %8 = vector.load %arg5[%c0_5, %c0_6] : memref<1x256xf32, #tpu.memory_space<vmem>>, vector<1x256xf32>
    %9 = vector.broadcast %8 : vector<1x256xf32> to vector<8x256xf32>
    %10 = arith.addf %7, %9 : vector<8x256xf32>
    %11 = vector.extract_strided_slice %10 {offsets = [0, 0], sizes = [8, 128], strides = [1, 1]} : vector<8x256xf32> to vector<8x128xf32>
    %12 = arith.truncf %11 : vector<8x128xf32> to vector<8x128xbf16>
    %c0_7 = arith.constant 0 : index
    %c0_8 = arith.constant 0 : index
    %c0_9 = arith.constant 0 : index
    %13 = vector.load %arg23[%c0_7, %c0_8, %c0_9] : memref<2x8x128xbf16, #tpu.memory_space<vmem>>, vector<1x8x128xbf16>
    %14 = vector.shape_cast %13 : vector<1x8x128xbf16> to vector<8x128xbf16>
    %15 = vector.shape_cast %12 : vector<8x128xbf16> to vector<1x8x128xbf16>
    tpu.vector_store %arg23[%c0_7, %c0_8, %c0_9], %15 {strides = array<i32>} : memref<2x8x128xbf16, #tpu.memory_space<vmem>>, vector<1x8x128xbf16>,
    %16 = vector.extract_strided_slice %10 {offsets = [0, 128], sizes = [8, 128], strides = [1, 1]} : vector<8x256xf32> to vector<8x128xf32>
    %17 = arith.truncf %16 : vector<8x128xf32> to vector<8x128xbf16>
    %c1 = arith.constant 1 : index
    %c0_10 = arith.constant 0 : index
    %c0_11 = arith.constant 0 : index
    %18 = vector.load %arg23[%c1, %c0_10, %c0_11] : memref<2x8x128xbf16, #tpu.memory_space<vmem>>, vector<1x8x128xbf16>
    %19 = vector.shape_cast %18 : vector<1x8x128xbf16> to vector<8x128xbf16>
    %20 = vector.shape_cast %17 : vector<8x128xbf16> to vector<1x8x128xbf16>
    tpu.vector_store %arg23[%c1, %c0_10, %c0_11], %20 {strides = array<i32>} : memref<2x8x128xbf16, #tpu.memory_space<vmem>>, vector<1x8x128xbf16>,
    %c0_12 = arith.constant 0 : index
    %c0_13 = arith.constant 0 : index
    %c0_14 = arith.constant 0 : index
    %21 = vector.load %arg23[%c0_12, %c0_13, %c0_14] : memref<2x8x128xbf16, #tpu.memory_space<vmem>>, vector<2x8x128xbf16>
    %cst_15 = arith.constant 0xFF800000 : f32
    %22 = vector.broadcast %cst_15 : f32 to vector<2x8x1xf32>
    %cst_16 = arith.constant 0.000000e+00 : f32
    %23 = vector.broadcast %cst_16 : f32 to vector<2x8x1xf32>
    %cst_17 = arith.constant 0.000000e+00 : f32
    %24 = vector.broadcast %cst_17 : f32 to vector<2x8x128xf32>
    %c0_18 = arith.constant 0 : index
    %c0_19 = arith.constant 0 : index
    %c0_20 = arith.constant 0 : index
    %25 = vector.load %arg21[%c0_18, %c0_19, %c0_20] : memref<2x16x128xbf16, #tpu.memory_space<vmem>>, vector<2x8x128xbf16>
    %c0_21 = arith.constant 0 : index
    %c0_22 = arith.constant 0 : index
    %c0_23 = arith.constant 0 : index
    %26 = vector.load %arg22[%c0_21, %c0_22, %c0_23] : memref<2x16x128xbf16, #tpu.memory_space<vmem>>, vector<2x8x128xbf16>
    "tpu.trace_start"() <{level = 10 : i32, message = "hqd,hkd->hqk"}> : () -> ()
    %cst_24 = arith.constant dense<0.000000e+00> : vector<2x8x8xf32>
    %27 = tpu.matmul %21, %25, %cst_24 {dimension_numbers = #tpu.dot_dimension_numbers<[2], [2], [1], [1], [0, 0, 0, 1, 1, 1], [0], [0]>} : vector<2x8x128xbf16>, vector<2x8x128xbf16>, vector<2x8x8xf32> -> vector<2x8x8xf32>
    "tpu.trace_stop"() : () -> ()
    %cst_25 = arith.constant dense<0xFF800000> : vector<2x8xf32>
    %28 = vector.multi_reduction <maximumf>, %27, %cst_25 [2] : vector<2x8x8xf32> to vector<2x8xf32>
    %29 = vector.shape_cast %28 : vector<2x8xf32> to vector<2x8x1xf32>
    %30 = arith.maximumf %22, %29 : vector<2x8x1xf32>
    %31 = arith.subf %22, %30 : vector<2x8x1xf32>
    %32 = math.exp %31 : vector<2x8x1xf32>
    %33 = vector.broadcast %30 : vector<2x8x1xf32> to vector<2x8x8xf32>
    %34 = arith.subf %27, %33 : vector<2x8x8xf32>
    %35 = math.exp %34 : vector<2x8x8xf32>
    %36 = arith.mulf %32, %23 : vector<2x8x1xf32>
    %cst_26 = arith.constant dense<0.000000e+00> : vector<2x8xf32>
    %37 = vector.multi_reduction <add>, %35, %cst_26 [2] : vector<2x8x8xf32> to vector<2x8xf32>
    %38 = vector.shape_cast %37 : vector<2x8xf32> to vector<2x8x1xf32>
    %39 = arith.addf %36, %38 : vector<2x8x1xf32>
    %40 = vector.broadcast %32 : vector<2x8x1xf32> to vector<2x8x128xf32>
    %41 = arith.mulf %40, %24 : vector<2x8x128xf32>
    %42 = arith.truncf %35 : vector<2x8x8xf32> to vector<2x8x8xbf16>
    "tpu.trace_start"() <{level = 10 : i32, message = "hqk,hkd->hqd"}> : () -> ()
    %cst_27 = arith.constant dense<0.000000e+00> : vector<2x8x128xf32>
    %43 = tpu.matmul %42, %26, %cst_27 {dimension_numbers = #tpu.dot_dimension_numbers<[2], [1], [1], [2], [0, 0, 0, 1, 1, 2], [0], [0]>} : vector<2x8x8xbf16>, vector<2x8x128xbf16>, vector<2x8x128xf32> -> vector<2x8x128xf32>
    "tpu.trace_stop"() : () -> ()
    %44 = arith.addf %41, %43 : vector<2x8x128xf32>
    %c0_28 = arith.constant 0 : index
    %c8 = arith.constant 8 : index
    %c0_29 = arith.constant 0 : index
    %45 = vector.load %arg21[%c0_28, %c8, %c0_29] : memref<2x16x128xbf16, #tpu.memory_space<vmem>>, vector<2x8x128xbf16>
    %c0_30 = arith.constant 0 : index
    %c8_31 = arith.constant 8 : index
    %c0_32 = arith.constant 0 : index
    %46 = vector.load %arg22[%c0_30, %c8_31, %c0_32] : memref<2x16x128xbf16, #tpu.memory_space<vmem>>, vector<2x8x128xbf16>
    "tpu.trace_start"() <{level = 10 : i32, message = "hqd,hkd->hqk"}> : () -> ()
    %cst_33 = arith.constant dense<0.000000e+00> : vector<2x8x8xf32>
    %47 = tpu.matmul %21, %45, %cst_33 {dimension_numbers = #tpu.dot_dimension_numbers<[2], [2], [1], [1], [0, 0, 0, 1, 1, 1], [0], [0]>} : vector<2x8x128xbf16>, vector<2x8x128xbf16>, vector<2x8x8xf32> -> vector<2x8x8xf32>
    "tpu.trace_stop"() : () -> ()
    %cst_34 = arith.constant dense<0xFF800000> : vector<2x8xf32>
    %48 = vector.multi_reduction <maximumf>, %47, %cst_34 [2] : vector<2x8x8xf32> to vector<2x8xf32>
    %49 = vector.shape_cast %48 : vector<2x8xf32> to vector<2x8x1xf32>
    %50 = arith.maximumf %30, %49 : vector<2x8x1xf32>
    %51 = arith.subf %30, %50 : vector<2x8x1xf32>
    %52 = math.exp %51 : vector<2x8x1xf32>
    %53 = vector.broadcast %50 : vector<2x8x1xf32> to vector<2x8x8xf32>
    %54 = arith.subf %47, %53 : vector<2x8x8xf32>
    %55 = math.exp %54 : vector<2x8x8xf32>
    %56 = arith.mulf %52, %39 : vector<2x8x1xf32>
    %cst_35 = arith.constant dense<0.000000e+00> : vector<2x8xf32>
    %57 = vector.multi_reduction <add>, %55, %cst_35 [2] : vector<2x8x8xf32> to vector<2x8xf32>
    %58 = vector.shape_cast %57 : vector<2x8xf32> to vector<2x8x1xf32>
    %59 = arith.addf %56, %58 : vector<2x8x1xf32>
    %60 = vector.broadcast %52 : vector<2x8x1xf32> to vector<2x8x128xf32>
    %61 = arith.mulf %60, %44 : vector<2x8x128xf32>
    %62 = arith.truncf %55 : vector<2x8x8xf32> to vector<2x8x8xbf16>
    "tpu.trace_start"() <{level = 10 : i32, message = "hqk,hkd->hqd"}> : () -> ()
    %cst_36 = arith.constant dense<0.000000e+00> : vector<2x8x128xf32>
    %63 = tpu.matmul %62, %46, %cst_36 {dimension_numbers = #tpu.dot_dimension_numbers<[2], [1], [1], [2], [0, 0, 0, 1, 1, 2], [0], [0]>} : vector<2x8x8xbf16>, vector<2x8x128xbf16>, vector<2x8x128xf32> -> vector<2x8x128xf32>
    "tpu.trace_stop"() : () -> ()
    %64 = arith.addf %61, %63 : vector<2x8x128xf32>
    %65 = tpu.reciprocal %59 {approx = true} : vector<2x8x1xf32> -> vector<2x8x1xf32>
    %66 = vector.broadcast %65 : vector<2x8x1xf32> to vector<2x8x128xf32>
    %67 = arith.mulf %64, %66 : vector<2x8x128xf32>
    %68 = vector.extract_strided_slice %67 {offsets = [0, 0, 0], sizes = [1, 8, 128], strides = [1, 1, 1]} : vector<2x8x128xf32> to vector<1x8x128xf32>
    %69 = vector.shape_cast %68 : vector<1x8x128xf32> to vector<8x128xf32>
    %70 = arith.truncf %69 : vector<8x128xf32> to vector<8x128xbf16>
    %c0_37 = arith.constant 0 : index
    %c0_38 = arith.constant 0 : index
    %71 = vector.load %arg24[%c0_37, %c0_38] : memref<8x256xbf16, #tpu.memory_space<vmem>>, vector<8x128xbf16>
    tpu.vector_store %arg24[%c0_37, %c0_38], %70 {strides = array<i32>} : memref<8x256xbf16, #tpu.memory_space<vmem>>, vector<8x128xbf16>,
    %72 = vector.extract_strided_slice %67 {offsets = [1, 0, 0], sizes = [1, 8, 128], strides = [1, 1, 1]} : vector<2x8x128xf32> to vector<1x8x128xf32>
    %73 = vector.shape_cast %72 : vector<1x8x128xf32> to vector<8x128xf32>
    %74 = arith.truncf %73 : vector<8x128xf32> to vector<8x128xbf16>
    %c0_39 = arith.constant 0 : index
    %c128 = arith.constant 128 : index
    %75 = vector.load %arg24[%c0_39, %c128] : memref<8x256xbf16, #tpu.memory_space<vmem>>, vector<8x128xbf16>
    tpu.vector_store %arg24[%c0_39, %c128], %74 {strides = array<i32>} : memref<8x256xbf16, #tpu.memory_space<vmem>>, vector<8x128xbf16>,
    %c0_40 = arith.constant 0 : index
    %c0_41 = arith.constant 0 : index
    %76 = vector.load %arg24[%c0_40, %c0_41] : memref<8x256xbf16, #tpu.memory_space<vmem>>, vector<8x256xbf16>
    %c0_42 = arith.constant 0 : index
    %c0_43 = arith.constant 0 : index
    %77 = vector.load %arg10[%c0_42, %c0_43] : memref<256x256xbf16, #tpu.memory_space<vmem>>, vector<256x256xbf16>
    %cst_44 = arith.constant dense<0.000000e+00> : vector<8x256xf32>
    %78 = tpu.matmul %76, %77, %cst_44 {dimension_numbers = #tpu.dot_dimension_numbers<[1], [0], [0], [1], [0, 0, 1, 1], [], []>} : vector<8x256xbf16>, vector<256x256xbf16>, vector<8x256xf32> -> vector<8x256xf32>
    %c0_45 = arith.constant 0 : index
    %c0_46 = arith.constant 0 : index
    %79 = vector.load %arg11[%c0_45, %c0_46] : memref<1x256xf32, #tpu.memory_space<vmem>>, vector<1x256xf32>
    %80 = vector.broadcast %79 : vector<1x256xf32> to vector<8x256xf32>
    %81 = arith.addf %78, %80 : vector<8x256xf32>
    %82 = arith.addf %4, %81 : vector<8x256xf32>
    %cst_47 = arith.constant dense<0.000000e+00> : vector<8xf32>
    %83 = vector.multi_reduction <add>, %82, %cst_47 [1] : vector<8x256xf32> to vector<8xf32>
    %84 = vector.shape_cast %83 : vector<8xf32> to vector<8x1xf32>
    %cst_48 = arith.constant 2.560000e+02 : f32
    %85 = vector.broadcast %cst_48 : f32 to vector<8x1xf32>
    %86 = arith.divf %84, %85 : vector<8x1xf32>
    %87 = vector.broadcast %86 : vector<8x1xf32> to vector<8x256xf32>
    %88 = arith.subf %82, %87 : vector<8x256xf32>
    %89 = arith.mulf %88, %88 : vector<8x256xf32>
    %cst_49 = arith.constant dense<0.000000e+00> : vector<8xf32>
    %90 = vector.multi_reduction <add>, %89, %cst_49 [1] : vector<8x256xf32> to vector<8xf32>
    %91 = vector.shape_cast %90 : vector<8xf32> to vector<8x1xf32>
    %cst_50 = arith.constant 2.560000e+02 : f32
    %92 = vector.broadcast %cst_50 : f32 to vector<8x1xf32>
    %93 = arith.divf %91, %92 : vector<8x1xf32>
    %94 = vector.broadcast %86 : vector<8x1xf32> to vector<8x256xf32>
    %95 = arith.subf %82, %94 : vector<8x256xf32>
    %cst_51 = arith.constant 9.99999974E-6 : f32
    %96 = vector.broadcast %cst_51 : f32 to vector<8x1xf32>
    %97 = arith.addf %93, %96 : vector<8x1xf32>
    %98 = math.rsqrt %97 : vector<8x1xf32>
    %99 = vector.broadcast %98 : vector<8x1xf32> to vector<8x256xf32>
    %100 = arith.mulf %95, %99 : vector<8x256xf32>
    %c0_52 = arith.constant 0 : index
    %c0_53 = arith.constant 0 : index
    %101 = vector.load %arg12[%c0_52, %c0_53] : memref<1x256xf32, #tpu.memory_space<vmem>>, vector<1x256xf32>
    %102 = vector.broadcast %101 : vector<1x256xf32> to vector<8x256xf32>
    %103 = arith.mulf %100, %102 : vector<8x256xf32>
    %c0_54 = arith.constant 0 : index
    %c0_55 = arith.constant 0 : index
    %104 = vector.load %arg13[%c0_54, %c0_55] : memref<1x256xf32, #tpu.memory_space<vmem>>, vector<1x256xf32>
    %105 = vector.broadcast %104 : vector<1x256xf32> to vector<8x256xf32>
    %106 = arith.addf %103, %105 : vector<8x256xf32>
    %107 = arith.truncf %106 : vector<8x256xf32> to vector<8x256xbf16>
    %c0_56 = arith.constant 0 : index
    %c0_57 = arith.constant 0 : index
    %108 = vector.load %arg14[%c0_56, %c0_57] : memref<256x512xbf16, #tpu.memory_space<vmem>>, vector<256x512xbf16>
    %cst_58 = arith.constant dense<0.000000e+00> : vector<8x512xf32>
    %109 = tpu.matmul %107, %108, %cst_58 {dimension_numbers = #tpu.dot_dimension_numbers<[1], [0], [0], [1], [0, 0, 1, 1], [], []>} : vector<8x256xbf16>, vector<256x512xbf16>, vector<8x512xf32> -> vector<8x512xf32>
    %c0_59 = arith.constant 0 : index
    %c0_60 = arith.constant 0 : index
    %110 = vector.load %arg15[%c0_59, %c0_60] : memref<1x512xf32, #tpu.memory_space<vmem>>, vector<1x512xf32>
    %111 = vector.broadcast %110 : vector<1x512xf32> to vector<8x512xf32>
    %112 = arith.addf %109, %111 : vector<8x512xf32>
    %cst_61 = arith.constant 0.000000e+00 : f32
    %113 = vector.broadcast %cst_61 : f32 to vector<8x512xf32>
    %114 = arith.maximumf %112, %113 : vector<8x512xf32>
    %115 = arith.truncf %114 : vector<8x512xf32> to vector<8x512xbf16>
    %c0_62 = arith.constant 0 : index
    %c0_63 = arith.constant 0 : index
    %116 = vector.load %arg16[%c0_62, %c0_63] : memref<512x256xbf16, #tpu.memory_space<vmem>>, vector<512x256xbf16>
    %cst_64 = arith.constant dense<0.000000e+00> : vector<8x256xf32>
    %117 = tpu.matmul %115, %116, %cst_64 {dimension_numbers = #tpu.dot_dimension_numbers<[1], [0], [0], [1], [0, 0, 1, 1], [], []>} : vector<8x512xbf16>, vector<512x256xbf16>, vector<8x256xf32> -> vector<8x256xf32>
    %c0_65 = arith.constant 0 : index
    %c0_66 = arith.constant 0 : index
    %118 = vector.load %arg17[%c0_65, %c0_66] : memref<1x256xf32, #tpu.memory_space<vmem>>, vector<1x256xf32>
    %119 = vector.broadcast %118 : vector<1x256xf32> to vector<8x256xf32>
    %120 = arith.addf %117, %119 : vector<8x256xf32>
    %121 = arith.addf %106, %120 : vector<8x256xf32>
    %cst_67 = arith.constant dense<0.000000e+00> : vector<8xf32>
    %122 = vector.multi_reduction <add>, %121, %cst_67 [1] : vector<8x256xf32> to vector<8xf32>
    %123 = vector.shape_cast %122 : vector<8xf32> to vector<8x1xf32>
    %cst_68 = arith.constant 2.560000e+02 : f32
    %124 = vector.broadcast %cst_68 : f32 to vector<8x1xf32>
    %125 = arith.divf %123, %124 : vector<8x1xf32>
    %126 = vector.broadcast %125 : vector<8x1xf32> to vector<8x256xf32>
    %127 = arith.subf %121, %126 : vector<8x256xf32>
    %128 = arith.mulf %127, %127 : vector<8x256xf32>
    %cst_69 = arith.constant dense<0.000000e+00> : vector<8xf32>
    %129 = vector.multi_reduction <add>, %128, %cst_69 [1] : vector<8x256xf32> to vector<8xf32>
    %130 = vector.shape_cast %129 : vector<8xf32> to vector<8x1xf32>
    %cst_70 = arith.constant 2.560000e+02 : f32
    %131 = vector.broadcast %cst_70 : f32 to vector<8x1xf32>
    %132 = arith.divf %130, %131 : vector<8x1xf32>
    %133 = vector.broadcast %125 : vector<8x1xf32> to vector<8x256xf32>
    %134 = arith.subf %121, %133 : vector<8x256xf32>
    %cst_71 = arith.constant 9.99999974E-6 : f32
    %135 = vector.broadcast %cst_71 : f32 to vector<8x1xf32>
    %136 = arith.addf %132, %135 : vector<8x1xf32>
    %137 = math.rsqrt %136 : vector<8x1xf32>
    %138 = vector.broadcast %137 : vector<8x1xf32> to vector<8x256xf32>
    %139 = arith.mulf %134, %138 : vector<8x256xf32>
    %c0_72 = arith.constant 0 : index
    %c0_73 = arith.constant 0 : index
    %140 = vector.load %arg18[%c0_72, %c0_73] : memref<1x256xf32, #tpu.memory_space<vmem>>, vector<1x256xf32>
    %141 = vector.broadcast %140 : vector<1x256xf32> to vector<8x256xf32>
    %142 = arith.mulf %139, %141 : vector<8x256xf32>
    %c0_74 = arith.constant 0 : index
    %c0_75 = arith.constant 0 : index
    %143 = vector.load %arg19[%c0_74, %c0_75] : memref<1x256xf32, #tpu.memory_space<vmem>>, vector<1x256xf32>
    %144 = vector.broadcast %143 : vector<1x256xf32> to vector<8x256xf32>
    %145 = arith.addf %142, %144 : vector<8x256xf32>
    %c0_76 = arith.constant 0 : index
    %c0_77 = arith.constant 0 : index
    %c0_78 = arith.constant 0 : index
    %146 = vector.load %arg20[%c0_76, %c0_77, %c0_78] : memref<1x8x256xf32, #tpu.memory_space<vmem>>, vector<1x8x256xf32>
    %147 = vector.shape_cast %146 : vector<1x8x256xf32> to vector<8x256xf32>
    %148 = vector.shape_cast %145 : vector<8x256xf32> to vector<1x8x256xf32>
    tpu.vector_store %arg20[%c0_76, %c0_77, %c0_78], %148 {strides = array<i32>} : memref<1x8x256xf32, #tpu.memory_space<vmem>>, vector<1x8x256xf32>,
    return
  }
  func.func @transform_0(%arg0: i32, %arg1: i32) -> (i32, i32, i32) {
    %c0_i32 = arith.constant 0 : i32
    %c0_i32_0 = arith.constant 0 : i32
    %c0_i32_1 = arith.constant 0 : i32
    return %arg0, %c0_i32, %c0_i32_0 : i32, i32, i32
  }
  func.func @transform_1(%arg0: i32, %arg1: i32) -> (i32, i32, i32) {
    %c0_i32 = arith.constant 0 : i32
    %c0_i32_0 = arith.constant 0 : i32
    return %arg0, %arg1, %c0_i32 : i32, i32, i32
  }
  func.func @transform_2(%arg0: i32, %arg1: i32) -> (i32, i32) {
    %c0_i32 = arith.constant 0 : i32
    %c0_i32_0 = arith.constant 0 : i32
    %c0_i32_1 = arith.constant 0 : i32
    return %c0_i32, %c0_i32_0 : i32, i32
  }
  func.func @transform_3(%arg0: i32, %arg1: i32) -> (i32, i32) {
    %c0_i32 = arith.constant 0 : i32
    %c0_i32_0 = arith.constant 0 : i32
    %c0_i32_1 = arith.constant 0 : i32
    return %c0_i32, %c0_i32_0 : i32, i32
  }
  func.func @transform_4(%arg0: i32, %arg1: i32) -> (i32, i32) {
    %c0_i32 = arith.constant 0 : i32
    %c0_i32_0 = arith.constant 0 : i32
    %c0_i32_1 = arith.constant 0 : i32
    return %c0_i32, %c0_i32_0 : i32, i32
  }
  func.func @transform_5(%arg0: i32, %arg1: i32) -> (i32, i32) {
    %c0_i32 = arith.constant 0 : i32
    %c0_i32_0 = arith.constant 0 : i32
    %c0_i32_1 = arith.constant 0 : i32
    return %c0_i32, %c0_i32_0 : i32, i32
  }
  func.func @transform_6(%arg0: i32, %arg1: i32) -> (i32, i32) {
    %c0_i32 = arith.constant 0 : i32
    %c0_i32_0 = arith.constant 0 : i32
    %c0_i32_1 = arith.constant 0 : i32
    return %c0_i32, %c0_i32_0 : i32, i32
  }
  func.func @transform_7(%arg0: i32, %arg1: i32) -> (i32, i32) {
    %c0_i32 = arith.constant 0 : i32
    %c0_i32_0 = arith.constant 0 : i32
    %c0_i32_1 = arith.constant 0 : i32
    return %c0_i32, %c0_i32_0 : i32, i32
  }
  func.func @transform_8(%arg0: i32, %arg1: i32) -> (i32, i32) {
    %c0_i32 = arith.constant 0 : i32
    %c0_i32_0 = arith.constant 0 : i32
    %c0_i32_1 = arith.constant 0 : i32
    return %c0_i32, %c0_i32_0 : i32, i32
  }
  func.func @transform_9(%arg0: i32, %arg1: i32) -> (i32, i32) {
    %c0_i32 = arith.constant 0 : i32
    %c0_i32_0 = arith.constant 0 : i32
    %c0_i32_1 = arith.constant 0 : i32
    return %c0_i32, %c0_i32_0 : i32, i32
  }
  func.func @transform_10(%arg0: i32, %arg1: i32) -> (i32, i32) {
    %c0_i32 = arith.constant 0 : i32
    %c0_i32_0 = arith.constant 0 : i32
    %c0_i32_1 = arith.constant 0 : i32
    return %c0_i32, %c0_i32_0 : i32, i32
  }
  func.func @transform_11(%arg0: i32, %arg1: i32) -> (i32, i32) {
    %c0_i32 = arith.constant 0 : i32
    %c0_i32_0 = arith.constant 0 : i32
    %c0_i32_1 = arith.constant 0 : i32
    return %c0_i32, %c0_i32_0 : i32, i32
  }
  func.func @transform_12(%arg0: i32, %arg1: i32) -> (i32, i32) {
    %c0_i32 = arith.constant 0 : i32
    %c0_i32_0 = arith.constant 0 : i32
    %c0_i32_1 = arith.constant 0 : i32
    return %c0_i32, %c0_i32_0 : i32, i32
  }
  func.func @transform_13(%arg0: i32, %arg1: i32) -> (i32, i32) {
    %c0_i32 = arith.constant 0 : i32
    %c0_i32_0 = arith.constant 0 : i32
    %c0_i32_1 = arith.constant 0 : i32
    return %c0_i32, %c0_i32_0 : i32, i32
  }
  func.func @transform_14(%arg0: i32, %arg1: i32) -> (i32, i32) {
    %c0_i32 = arith.constant 0 : i32
    %c0_i32_0 = arith.constant 0 : i32
    %c0_i32_1 = arith.constant 0 : i32
    return %c0_i32, %c0_i32_0 : i32, i32
  }
  func.func @transform_15(%arg0: i32, %arg1: i32) -> (i32, i32) {
    %c0_i32 = arith.constant 0 : i32
    %c0_i32_0 = arith.constant 0 : i32
    %c0_i32_1 = arith.constant 0 : i32
    return %c0_i32, %c0_i32_0 : i32, i32
  }
  func.func @transform_16(%arg0: i32, %arg1: i32) -> (i32, i32) {
    %c0_i32 = arith.constant 0 : i32
    %c0_i32_0 = arith.constant 0 : i32
    %c0_i32_1 = arith.constant 0 : i32
    return %c0_i32, %c0_i32_0 : i32, i32
  }
  func.func @transform_17(%arg0: i32, %arg1: i32) -> (i32, i32) {
    %c0_i32 = arith.constant 0 : i32
    %c0_i32_0 = arith.constant 0 : i32
    %c0_i32_1 = arith.constant 0 : i32
    return %c0_i32, %c0_i32_0 : i32, i32
  }
  func.func @transform_18(%arg0: i32, %arg1: i32) -> (i32, i32, i32) {
    %c0_i32 = arith.constant 0 : i32
    %c0_i32_0 = arith.constant 0 : i32
    return %arg0, %arg1, %c0_i32 : i32, i32, i32
  }
}

</mosaic_0001>

<bundles_post_ra>
// kernel: tpu_custom_call.1
= control target key start
LH: loop header
LB: loop body
LE: loop exit
PB: predicated region body
PF: predicated region fallthrough
CT: control target
= control target key end

     0   :  { %s6381_s0 = inlined_call_operand.hbm [shape: bf16[2,16,256], index: 0, kind: input, shape index: {}]   ;;  %s6382_s1 = inlined_call_operand.hbm [shape: f32[2,16,256], index: 1, kind: input, shape index: {}]   ;;  %s6383_s2 = inlined_call_operand.hbm [shape: bf16[256,256], index: 2, kind: input, shape index: {}]   ;;  %s6384_s3 = inlined_call_operand.hbm [shape: f32[1,256], index: 3, kind: input, shape index: {}]   ;;  %s6385_s4 = inlined_call_operand.hbm [shape: bf16[256,256], index: 4, kind: input, shape index: {}]   ;;  %s6386_s5 = inlined_call_operand.hbm [shape: f32[1,256], index: 5, kind: input, shape index: {}]   ;;  %s6387_s6 = inlined_call_operand.hbm [shape: bf16[256,256], index: 6, kind: input, shape index: {}]   ;;  %s6388_s7 = inlined_call_operand.hbm [shape: f32[1,256], index: 7, kind: input, shape index: {}]   ;;  %s6389_s8 = inlined_call_operand.hbm [shape: bf16[256,256], index: 8, kind: input, shape index: {}]   ;;  %s6390_s9 = inlined_call_operand.hbm [shape: f32[1,256], index: 9, kind: input, shape index: {}]   ;;  %s6391_s10 = inlined_call_operand.hbm [shape: f32[1,256], index: 10, kind: input, shape index: {}]   ;;  %s6392_s11 = inlined_call_operand.hbm [shape: f32[1,256], index: 11, kind: input, shape index: {}]   ;;  %s6393_s12 = inlined_call_operand.hbm [shape: bf16[256,512], index: 12, kind: input, shape index: {}]   ;;  %s6394_s13 = inlined_call_operand.hbm [shape: f32[1,512], index: 13, kind: input, shape index: {}]   ;;  %s6395_s14 = inlined_call_operand.hbm [shape: bf16[512,256], index: 14, kind: input, shape index: {}]   ;;  %s6396_s15 = inlined_call_operand.hbm [shape: f32[1,256], index: 15, kind: input, shape index: {}]   ;;  %s6397_s16 = inlined_call_operand.hbm [shape: f32[1,256], index: 16, kind: input, shape index: {}]   ;;  %s6398_s17 = inlined_call_operand.hbm [shape: f32[1,256], index: 17, kind: input, shape index: {}]   ;;  %s6399_s18 = inlined_call_operand.hbm [shape: f32[2,16,256], index: 18, kind: output, shape index: {}]  }
   0x1   :  { %6432 = sst [smem:[#allocation61_spill]] %s6381_s0 }
   0x2   :  { %6433 = sst [smem:[#allocation62_spill]] %s6382_s1 }
   0x3   :  { %6434 = sst [smem:[#allocation63_spill]] %s6383_s2 }
   0x4   :  { %6435 = sst [smem:[#allocation64_spill]] %s6384_s3 }
   0x5   :  { %6436 = sst [smem:[#allocation65_spill]] %s6385_s4 }
   0x6   :  { %6437 = sst [smem:[#allocation66_spill]] %s6386_s5 }
   0x7   :  { %6438 = sst [smem:[#allocation67_spill]] %s6387_s6 }
   0x8   :  { %6439 = sst [smem:[#allocation68_spill]] %s6388_s7 }
   0x9   :  { %6440 = sst [smem:[#allocation69_spill]] %s6389_s8 }
   0xa   :  { %6441 = sst [smem:[#allocation70_spill]] %s6390_s9 }
   0xb   :  { %6442 = sst [smem:[#allocation71_spill]] %s6391_s10 }
   0xc   :  { %6443 = sst [smem:[#allocation72_spill]] %s6392_s11 }
   0xd   :  { %6444 = sst [smem:[#allocation73_spill]] %s6393_s12 }
   0xe   :  { %6445 = sst [smem:[#allocation74_spill]] %s6394_s13 }
   0xf   :  { %6446 = sst [smem:[#allocation75_spill]] %s6395_s14 }
  0x10   :  { %6447 = sst [smem:[#allocation76_spill]] %s6396_s15 }
  0x11   :  { %6448 = sst [smem:[#allocation77_spill]] %s6397_s16 }
  0x12   :  { %6449 = sst [smem:[#allocation78_spill]] %s6398_s17 }
  0x13   :  { %6450 = sst [smem:[#allocation79_spill]] %s6399_s18 }
  0x14   :  { %23 = vsyncpa [#allocation7], 0 }
  0x15   :  { %25 = vsyncpa [#allocation7 + $0x1], 0 }
  0x16   :  { %26 = vsyncpa [#allocation10], 0 }
  0x17   :  { %28 = vsyncpa [#allocation10 + $0x1], 0 }
  0x18   :  { %29 = vsyncpa [#allocation13], 0 }
  0x19   :  { %30 = vsyncpa [#allocation16], 0 }
  0x1a   :  { %31 = vsyncpa [#allocation19], 0 }
  0x1b   :  { %32 = vsyncpa [#allocation22], 0 }
  0x1c   :  { %33 = vsyncpa [#allocation25], 0 }
  0x1d   :  { %34 = vsyncpa [#allocation28], 0 }
  0x1e   :  { %35 = vsyncpa [#allocation31], 0 }
  0x1f   :  { %36 = vsyncpa [#allocation34], 0 }
  0x20   :  { %37 = vsyncpa [#allocation8], 0 }
  0x21   :  { %39 = vsyncpa [#allocation8 + $0x1], 0  ;;  %s5554_s27 = smov 0   ;;  %s5556_s28 = smov 0  }
  0x22   :  { %s5558_s29 = smov 0   ;;  %s5560_s30 = smov 0  }
  0x23   :  { %s5562_s0 = smov 0   ;;  %s5564_s19 = smov 0  }
  0x24   :  { %s5566_s1 = smov 0   ;;  %s5568_s20 = smov 0  }
  0x25   :  { %s5570_s21 = smov 0   ;;  %s5572_s22 = smov 0  }
  0x26   :  { %s5574_s2 = smov 0  }
  0x27 LB: > { %6451 = sst [smem:[#allocation48_spill]] %s5392_s27  ;;  %s5610_s23 = sadd.s32 4294967295, %s5432_s2   ;;  %s5432_s2 = sphi %s5574_s2, %s45_s2   ;;  %s5428_s22 = sphi %s5572_s22, %s6551_s22   ;;  %s5424_s21 = sphi %s5570_s21, %s6557_s21   ;;  %s5420_s20 = sphi %s5568_s20, %s6549_s20   ;;  %s5416_s1 = sphi %s5566_s1, %s6556_s1   ;;  %s5412_s19 = sphi %s5564_s19, %s6555_s19   ;;  %s5408_s0 = sphi %s5562_s0, %s6546_s0   ;;  %s5404_s30 = sphi %s5560_s30, %s6554_s30   ;;  %s5400_s29 = sphi %s5558_s29, %s6553_s29   ;;  %s5396_s28 = sphi %s5556_s28, %s6544_s28   ;;  %s5392_s27 = sphi %s5554_s27, %s6552_s27  }
  0x28   : > { %6452 = sst [smem:[#allocation49_spill]] %s5396_s28  ;;  %p3684_p0 = scmp.ge.s32.totalorder %s5432_s2, 1 }
  0x29   : > { %6453 = sst [smem:[#allocation50_spill]] %s5400_s29  ;;  %p6419_p1 = scmp.eq.s32.totalorder %s5610_s23, 0 }
  0x2a   : > { %6454 = sst [smem:[#allocation51_spill]] %s5404_s30  ;;  %p480_p2 = scmp.lt.s32.totalorder %s5432_s2, 5 }
  0x2b   : > { %6455 = sst [smem:[#allocation52_spill]] %s5408_s0  ;;  %s5434_s25 = smov [#allocation11]  }
  0x2c   : > { %6456 = sst [smem:[#allocation53_spill]] %s5412_s19  ;;  %p5615_p3 = pnand %p3684_p0, %p480_p2 }
  0x2d   : > { %6457 = sst [smem:[#allocation54_spill]] %s5416_s1  ;;  %s492_s26 = sshll.u32 %s5434_s25, 4  ;;  %s5619_s26 = int_to_ptr.vmem [resolvable:$true] %s492_s26 }
  0x2e   : > { %6458 = sst [smem:[#allocation55_spill]] %s5420_s20  ;;  %p4147_p4 = pneg %p5615_p3 }
  0x2f   : > { %6459 = sst [smem:[#allocation56_spill]] %s5424_s21  ;;  %s5435_s20 = smov [#allocation12]  }
  0x30   : > { %6460 = sst [smem:[#allocation57_spill]] %s5428_s22  ;;  %p5625_p5 = pnand %p4147_p4, %p6419_p1 }
  0x31   : > { %6461 = sst [smem:[#allocation58_spill]] %s5432_s2  ;;  %s506_s1 = sshll.u32 %s5435_s20, 4  ;;  %s5629_s1 = int_to_ptr.vmem [resolvable:$true] %s506_s1 }
  0x32   : > { %6462 = sst [smem:[#allocation59_spill]] %s5610_s23  ;;  %s5436_s28 = smov [#allocation15]  }
  0x33   : > { %s6463_s24 = scalar_select %p5615_p3, 1, 0 }
  0x34   : > { %s5631_s27 = sshll.u32 %s5436_s28, 4  ;;  %s6466_s25 = sld [smem:[#allocation63_spill]]  ;;  %s531_s27 = int_to_ptr.vmem [resolvable:$true] %s5631_s27 }
  0x35   : > { %6464 = sst [smem:[#allocation60_spill]] %s6463_s24  ;;  %p5641_p7 = pneg %p5625_p5 }
  0x3a   : > { %s4762_s22 = scalar_lea.hbm %s6466_s25, 4096 }
  0x3b   : > { %p4763_p6 = scmp.ne.s32.totalorder %s6466_s25, %s4762_s22  ;;  %p4769_p10 = scmp.lt.u32.totalorder %s4762_s22, %s6466_s25 }
  0x3d   : > { %p4765_p8 = pnand %p5641_p7, %p4763_p6 }
  0x3f   : > { %p4766_p9 = pneg %p4765_p8 }
  0x41   : > { %p4771_p11 = pnand %p4769_p10, %p4766_p9 }
  0x43   : > { %4774 = shalt.err (!%p4771_p11)
}
  0x44   : > { %s4775_s29 = scalar_lea.vmem %s5619_s26, 4096  ;;  %p4783_p2 = scmp.lt.s32.totalorder %s5619_s26, %s5619_s26 }
  0x45   : > { %p4776_p12 = scmp.ne.s32.totalorder %s5619_s26, %s4775_s29  ;;  %p4784_p4 = scmp.lt.s32.totalorder %s4775_s29, %s4775_s29 }
  0x47   : > { %p4778_p13 = pnand %p4776_p12, %p5641_p7  ;;  %p4785_p6 = por %p4784_p4, %p4783_p2 }
  0x49   : > { %p4779_p0 = pneg %p4778_p13 }
  0x4b   : > { %p4786_p8 = pnand %p4785_p6, %p4779_p0 }
  0x4d   : > { %4789 = shalt.err (!%p4786_p8)
}
  0x4e   : > { %s6421_s30 = smov 128   ;;  %s6423_s21 = smov 8  }
  0x4f   : > { %4150 = dma.hbm_to_vmem [thread:$0]  (!%p5625_p5), %s6466_s25, 4096, %s5619_s26, [#allocation10], %s6421_s30, %s6421_s30, %s6423_s21  }
  0x50   : > { %s6468_s3 = sld [smem:[#allocation64_spill]] }
  0x56   : > { %s4790_s29 = scalar_lea.hbm %s6468_s3, 32 }
  0x57   : > { %p4791_p9 = scmp.ne.s32.totalorder %s6468_s3, %s4790_s29  ;;  %p4797_p12 = scmp.lt.u32.totalorder %s4790_s29, %s6468_s3 }
  0x59   : > { %p4793_p10 = pnand %p4791_p9, %p5641_p7 }
  0x5b   : > { %p4794_p11 = pneg %p4793_p10 }
  0x5d   : > { %p4799_p13 = pnand %p4797_p12, %p4794_p11 }
  0x5f   : > { %4802 = shalt.err (!%p4799_p13)
}
  0x60   : > { %s4803_s26 = scalar_lea.vmem %s5629_s1, 32  ;;  %p4811_p6 = scmp.lt.s32.totalorder %s5629_s1, %s5629_s1 }
  0x61   : > { %p4804_p0 = scmp.ne.s32.totalorder %s5629_s1, %s4803_s26  ;;  %p4812_p8 = scmp.lt.s32.totalorder %s4803_s26, %s4803_s26 }
  0x63   : > { %p4806_p2 = pnand %p4804_p0, %p5641_p7  ;;  %p4813_p9 = por %p4812_p8, %p4811_p6 }
  0x65   : > { %p4807_p4 = pneg %p4806_p2 }
  0x67   : > { %p4814_p10 = pnand %p4813_p9, %p4807_p4 }
  0x69   : > { %4817 = shalt.err (!%p4814_p10)
}
  0x6a   : > { %4153 = dma.hbm_to_vmem [thread:$0]  (!%p5625_p5), %s6468_s3, 32, %s5629_s1, [#allocation13]  }
  0x6b   : > { %s6469_s5 = sld [smem:[#allocation66_spill]] }
  0x71   : > { %s4818_s22 = scalar_lea.hbm %s6469_s5, 32 }
  0x72   : > { %p4819_p11 = scmp.ne.s32.totalorder %s6469_s5, %s4818_s22  ;;  %p4825_p0 = scmp.lt.u32.totalorder %s4818_s22, %s6469_s5 }
  0x74   : > { %p4821_p12 = pnand %p4819_p11, %p5641_p7 }
  0x76   : > { %p4822_p13 = pneg %p4821_p12 }
  0x78   : > { %p4827_p2 = pnand %p4825_p0, %p4822_p13 }
  0x7a   : > { %4830 = shalt.err (!%p4827_p2)
}
  0x7b   : > { %s4831_s26 = scalar_lea.vmem %s531_s27, 32  ;;  %p4839_p9 = scmp.lt.s32.totalorder %s531_s27, %s531_s27 }
  0x7c   : > { %p4832_p4 = scmp.ne.s32.totalorder %s531_s27, %s4831_s26  ;;  %p4840_p10 = scmp.lt.s32.totalorder %s4831_s26, %s4831_s26 }
  0x7e   : > { %p4834_p6 = pnand %p4832_p4, %p5641_p7  ;;  %p4841_p1 = por %p4840_p10, %p4839_p9 }
  0x80   : > { %p4835_p8 = pneg %p4834_p6 }
  0x82   : > { %p4842_p3 = pnand %p4841_p1, %p4835_p8 }
  0x84   : > { %4845 = shalt.err (!%p4842_p3)
}
  0x85   : > { %4159 = dma.hbm_to_vmem [thread:$0]  (!%p5625_p5), %s6469_s5, 32, %s531_s27, [#allocation16]  }
  0x86   : > { %s5439_s0 = smov [#allocation18]   ;;  %s5440_s2 = smov [#allocation21]  }
  0x87   : > { %s554_s19 = sshll.u32 %s5439_s0, 4  ;;  %s578_s22 = sshll.u32 %s5440_s2, 4  ;;  %s555_s19 = int_to_ptr.vmem [resolvable:$true] %s554_s19  ;;  %s579_s22 = int_to_ptr.vmem [resolvable:$true] %s578_s22 }
  0x88   : > { %s6470_s7 = sld [smem:[#allocation68_spill]] }
  0x8e   : > { %s4846_s28 = scalar_lea.hbm %s6470_s7, 32 }
  0x8f   : > { %p4847_p1 = scmp.ne.s32.totalorder %s6470_s7, %s4846_s28  ;;  %p4853_p12 = scmp.lt.u32.totalorder %s4846_s28, %s6470_s7 }
  0x91   : > { %p4849_p3 = pnand %p4847_p1, %p5641_p7 }
  0x93   : > { %p4850_p11 = pneg %p4849_p3 }
  0x95   : > { %p4855_p13 = pnand %p4853_p12, %p4850_p11 }
  0x97   : > { %4858 = shalt.err (!%p4855_p13)
}
  0x98   : > { %s4859_s27 = scalar_lea.vmem %s555_s19, 32  ;;  %p4867_p6 = scmp.lt.s32.totalorder %s555_s19, %s555_s19 }
  0x99   : > { %p4860_p0 = scmp.ne.s32.totalorder %s555_s19, %s4859_s27  ;;  %p4868_p8 = scmp.lt.s32.totalorder %s4859_s27, %s4859_s27 }
  0x9b   : > { %p4862_p2 = pnand %p4860_p0, %p5641_p7  ;;  %p4869_p9 = por %p4868_p8, %p4867_p6 }
  0x9d   : > { %p4863_p4 = pneg %p4862_p2 }
  0x9f   : > { %p4870_p10 = pnand %p4869_p9, %p4863_p4 }
  0xa1   : > { %4873 = shalt.err (!%p4870_p10)
}
  0xa2   : > { %4165 = dma.hbm_to_vmem [thread:$0]  (!%p5625_p5), %s6470_s7, 32, %s555_s19, [#allocation19]  }
  0xa3   : > { %s6471_s9 = sld [smem:[#allocation70_spill]] }
  0xa9   : > { %s4874_s24 = scalar_lea.hbm %s6471_s9, 32 }
  0xaa   : > { %p4875_p1 = scmp.ne.s32.totalorder %s6471_s9, %s4874_s24  ;;  %p4881_p12 = scmp.lt.u32.totalorder %s4874_s24, %s6471_s9 }
  0xac   : > { %p4877_p3 = pnand %p4875_p1, %p5641_p7 }
  0xae   : > { %p4878_p11 = pneg %p4877_p3 }
  0xb0   : > { %p4883_p13 = pnand %p4881_p12, %p4878_p11 }
  0xb2   : > { %4886 = shalt.err (!%p4883_p13)
}
  0xb3   : > { %s4887_s1 = scalar_lea.vmem %s579_s22, 32  ;;  %p4895_p6 = scmp.lt.s32.totalorder %s579_s22, %s579_s22 }
  0xb4   : > { %p4888_p0 = scmp.ne.s32.totalorder %s579_s22, %s4887_s1  ;;  %p4896_p8 = scmp.lt.s32.totalorder %s4887_s1, %s4887_s1 }
  0xb6   : > { %p4890_p2 = pnand %p4888_p0, %p5641_p7  ;;  %p4897_p9 = por %p4896_p8, %p4895_p6 }
  0xb8   : > { %p4891_p4 = pneg %p4890_p2 }
  0xba   : > { %p4898_p10 = pnand %p4897_p9, %p4891_p4 }
  0xbc   : > { %4901 = shalt.err (!%p4898_p10)
}
  0xbd   : > { %4171 = dma.hbm_to_vmem [thread:$0]  (!%p5625_p5), %s6471_s9, 32, %s579_s22, [#allocation22]  }
  0xbe   : > { %s5441_s17 = smov [#allocation24]   ;;  %s5442_s30 = smov [#allocation27]  }
  0xbf   : > { %s600_s0 = sshll.u32 %s5441_s17, 4  ;;  %s624_s2 = sshll.u32 %s5442_s30, 4  ;;  %s601_s0 = int_to_ptr.vmem [resolvable:$true] %s600_s0  ;;  %s625_s2 = int_to_ptr.vmem [resolvable:$true] %s624_s2 }
  0xc0   : > { %s6472_s11 = sld [smem:[#allocation72_spill]] }
  0xc6   : > { %s4902_s28 = scalar_lea.hbm %s6472_s11, 32 }
  0xc7   : > { %p4903_p1 = scmp.ne.s32.totalorder %s6472_s11, %s4902_s28  ;;  %p4909_p12 = scmp.lt.u32.totalorder %s4902_s28, %s6472_s11 }
  0xc9   : > { %p4905_p3 = pnand %p4903_p1, %p5641_p7 }
  0xcb   : > { %p4906_p11 = pneg %p4905_p3 }
  0xcd   : > { %p4911_p13 = pnand %p4909_p12, %p4906_p11 }
  0xcf   : > { %4914 = shalt.err (!%p4911_p13)
}
  0xd0   : > { %s4915_s22 = scalar_lea.vmem %s601_s0, 32  ;;  %p4923_p6 = scmp.lt.s32.totalorder %s601_s0, %s601_s0 }
  0xd1   : > { %p4916_p0 = scmp.ne.s32.totalorder %s601_s0, %s4915_s22  ;;  %p4924_p8 = scmp.lt.s32.totalorder %s4915_s22, %s4915_s22 }
  0xd3   : > { %p4918_p2 = pnand %p4916_p0, %p5641_p7  ;;  %p4925_p9 = por %p4924_p8, %p4923_p6 }
  0xd5   : > { %p4919_p4 = pneg %p4918_p2 }
  0xd7   : > { %p4926_p10 = pnand %p4925_p9, %p4919_p4 }
  0xd9   : > { %4929 = shalt.err (!%p4926_p10)
}
  0xda   : > { %4177 = dma.hbm_to_vmem [thread:$0]  (!%p5625_p5), %s6472_s11, 32, %s601_s0, [#allocation25]  }
  0xdb   : > { %s6473_s13 = sld [smem:[#allocation74_spill]] }
  0xe1   : > { %s4930_s20 = scalar_lea.hbm %s6473_s13, 64 }
  0xe2   : > { %p4931_p1 = scmp.ne.s32.totalorder %s6473_s13, %s4930_s20  ;;  %p4937_p12 = scmp.lt.u32.totalorder %s4930_s20, %s6473_s13 }
  0xe4   : > { %p4933_p3 = pnand %p4931_p1, %p5641_p7 }
  0xe6   : > { %p4934_p11 = pneg %p4933_p3 }
  0xe8   : > { %p4939_p13 = pnand %p4937_p12, %p4934_p11 }
  0xea   : > { %4942 = shalt.err (!%p4939_p13)
}
  0xeb   : > { %s4943_s19 = scalar_lea.vmem %s625_s2, 64  ;;  %p4951_p6 = scmp.lt.s32.totalorder %s625_s2, %s625_s2 }
  0xec   : > { %p4944_p0 = scmp.ne.s32.totalorder %s625_s2, %s4943_s19  ;;  %p4952_p8 = scmp.lt.s32.totalorder %s4943_s19, %s4943_s19 }
  0xee   : > { %p4946_p2 = pnand %p4944_p0, %p5641_p7  ;;  %p4953_p9 = por %p4952_p8, %p4951_p6 }
  0xf0   : > { %p4947_p4 = pneg %p4946_p2 }
  0xf2   : > { %p4954_p10 = pnand %p4953_p9, %p4947_p4 }
  0xf4   : > { %4957 = shalt.err (!%p4954_p10)
}
  0xf5   : > { %4183 = dma.hbm_to_vmem [thread:$0]  (!%p5625_p5), %s6473_s13, 64, %s625_s2, [#allocation28]  }
  0xf6   : > { %s5443_s27 = smov [#allocation30]   ;;  %s5444_s30 = smov [#allocation14]  }
  0xf7   : > { %s648_s17 = sshll.u32 %s5443_s27, 4  ;;  %s516_s24 = sshll.u32 %s5444_s30, 4  ;;  %s649_s17 = int_to_ptr.vmem [resolvable:$true] %s648_s17  ;;  %s517_s24 = int_to_ptr.vmem [resolvable:$true] %s516_s24 }
  0xf8   : > { %s6474_s15 = sld [smem:[#allocation76_spill]] }
  0xfe   : > { %s4958_s29 = scalar_lea.hbm %s6474_s15, 32 }
  0xff   : > { %p4959_p1 = scmp.ne.s32.totalorder %s6474_s15, %s4958_s29  ;;  %p4965_p12 = scmp.lt.u32.totalorder %s4958_s29, %s6474_s15 }
 0x101   : > { %p4961_p3 = pnand %p4959_p1, %p5641_p7 }
 0x103   : > { %p4962_p11 = pneg %p4961_p3 }
 0x105   : > { %p4967_p13 = pnand %p4965_p12, %p4962_p11 }
 0x107   : > { %4970 = shalt.err (!%p4967_p13)
}
 0x108   : > { %s4971_s2 = scalar_lea.vmem %s649_s17, 32  ;;  %p4979_p6 = scmp.lt.s32.totalorder %s649_s17, %s649_s17 }
 0x109   : > { %p4972_p0 = scmp.ne.s32.totalorder %s649_s17, %s4971_s2  ;;  %p4980_p8 = scmp.lt.s32.totalorder %s4971_s2, %s4971_s2 }
 0x10b   : > { %p4974_p2 = pnand %p4972_p0, %p5641_p7  ;;  %p4981_p9 = por %p4980_p8, %p4979_p6 }
 0x10d   : > { %p4975_p4 = pneg %p4974_p2 }
 0x10f   : > { %p4982_p10 = pnand %p4981_p9, %p4975_p4 }
 0x111   : > { %4985 = shalt.err (!%p4982_p10)
}
 0x112   : > { %4189 = dma.hbm_to_vmem [thread:$0]  (!%p5625_p5), %s6474_s15, 32, %s649_s17, [#allocation31]  }
 0x113   : > { %s6475_s4 = sld [smem:[#allocation65_spill]] }
 0x119   : > { %s4986_s28 = scalar_lea.hbm %s6475_s4, 4096 }
 0x11a   : > { %p4987_p1 = scmp.ne.s32.totalorder %s6475_s4, %s4986_s28  ;;  %p4993_p12 = scmp.lt.u32.totalorder %s4986_s28, %s6475_s4 }
 0x11c   : > { %p4989_p3 = pnand %p4987_p1, %p5641_p7 }
 0x11e   : > { %p4990_p11 = pneg %p4989_p3 }
 0x120   : > { %p4995_p13 = pnand %p4993_p12, %p4990_p11 }
 0x122   : > { %4998 = shalt.err (!%p4995_p13)
}
 0x123   : > { %s4999_s0 = scalar_lea.vmem %s517_s24, 4096  ;;  %p5007_p6 = scmp.lt.s32.totalorder %s517_s24, %s517_s24 }
 0x124   : > { %p5000_p0 = scmp.ne.s32.totalorder %s517_s24, %s4999_s0  ;;  %p5008_p8 = scmp.lt.s32.totalorder %s4999_s0, %s4999_s0 }
 0x126   : > { %p5002_p2 = pnand %p5000_p0, %p5641_p7  ;;  %p5009_p9 = por %p5008_p8, %p5007_p6 }
 0x128   : > { %p5003_p4 = pneg %p5002_p2 }
 0x12a   : > { %p5010_p10 = pnand %p5009_p9, %p5003_p4 }
 0x12c   : > { %5013 = shalt.err (!%p5010_p10)
}
 0x12d   : > { %s6476_s17 = smov 128   ;;  %s5445_s27 = smov [#allocation17]  }
 0x12e   : > { %4156 = dma.hbm_to_vmem [thread:$0]  (!%p5625_p5), %s6475_s4, 4096, %s517_s24, [#allocation13], %s6476_s17, %s6476_s17, %s6423_s21  }
 0x12f   : > { %s540_s30 = sshll.u32 %s5445_s27, 4  ;;  %s5446_s20 = smov [#allocation20]   ;;  %s541_s30 = int_to_ptr.vmem [resolvable:$true] %s540_s30 }
 0x130   : > { %s564_s28 = sshll.u32 %s5446_s20, 4  ;;  %s6477_s6 = sld [smem:[#allocation67_spill]]  ;;  %s565_s28 = int_to_ptr.vmem [resolvable:$true] %s564_s28 }
 0x136   : > { %s5014_s1 = scalar_lea.hbm %s6477_s6, 4096 }
 0x137   : > { %p5015_p1 = scmp.ne.s32.totalorder %s6477_s6, %s5014_s1  ;;  %p5021_p12 = scmp.lt.u32.totalorder %s5014_s1, %s6477_s6 }
 0x139   : > { %p5017_p3 = pnand %p5015_p1, %p5641_p7 }
 0x13b   : > { %p5018_p11 = pneg %p5017_p3 }
 0x13d   : > { %p5023_p13 = pnand %p5021_p12, %p5018_p11 }
 0x13f   : > { %5026 = shalt.err (!%p5023_p13)
}
 0x140   : > { %s5027_s24 = scalar_lea.vmem %s541_s30, 4096  ;;  %p5035_p6 = scmp.lt.s32.totalorder %s541_s30, %s541_s30 }
 0x141   : > { %p5028_p0 = scmp.ne.s32.totalorder %s541_s30, %s5027_s24  ;;  %p5036_p8 = scmp.lt.s32.totalorder %s5027_s24, %s5027_s24 }
 0x143   : > { %p5030_p2 = pnand %p5028_p0, %p5641_p7  ;;  %p5037_p9 = por %p5036_p8, %p5035_p6 }
 0x145   : > { %p5031_p4 = pneg %p5030_p2 }
 0x147   : > { %p5038_p10 = pnand %p5037_p9, %p5031_p4 }
 0x149   : > { %5041 = shalt.err (!%p5038_p10)
}
 0x14a   : > { %4162 = dma.hbm_to_vmem [thread:$0]  (!%p5625_p5), %s6477_s6, 4096, %s541_s30, [#allocation16], %s6476_s17, %s6476_s17, %s6423_s21  }
 0x14b   : > { %s6478_s8 = sld [smem:[#allocation69_spill]] }
 0x151   : > { %s5042_s29 = scalar_lea.hbm %s6478_s8, 4096 }
 0x152   : > { %p5043_p1 = scmp.ne.s32.totalorder %s6478_s8, %s5042_s29  ;;  %p5049_p12 = scmp.lt.u32.totalorder %s5042_s29, %s6478_s8 }
 0x154   : > { %p5045_p3 = pnand %p5043_p1, %p5641_p7 }
 0x156   : > { %p5046_p11 = pneg %p5045_p3 }
 0x158   : > { %p5051_p13 = pnand %p5049_p12, %p5046_p11 }
 0x15a   : > { %5054 = shalt.err (!%p5051_p13)
}
 0x15b   : > { %s5055_s2 = scalar_lea.vmem %s565_s28, 4096  ;;  %p5063_p6 = scmp.lt.s32.totalorder %s565_s28, %s565_s28 }
 0x15c   : > { %p5056_p0 = scmp.ne.s32.totalorder %s565_s28, %s5055_s2  ;;  %p5064_p8 = scmp.lt.s32.totalorder %s5055_s2, %s5055_s2 }
 0x15e   : > { %p5058_p2 = pnand %p5056_p0, %p5641_p7  ;;  %p5065_p9 = por %p5064_p8, %p5063_p6 }
 0x160   : > { %p5059_p4 = pneg %p5058_p2 }
 0x162   : > { %p5066_p10 = pnand %p5065_p9, %p5059_p4 }
 0x164   : > { %5069 = shalt.err (!%p5066_p10)
}
 0x165   : > { %4168 = dma.hbm_to_vmem [thread:$0]  (!%p5625_p5), %s6478_s8, 4096, %s565_s28, [#allocation19], %s6476_s17, %s6476_s17, %s6423_s21  }
 0x166   : > { %s5447_s3 = smov [#allocation23]   ;;  %s5448_s27 = smov [#allocation26]  }
 0x167   : > { %s589_s22 = sshll.u32 %s5447_s3, 4  ;;  %s610_s20 = sshll.u32 %s5448_s27, 4  ;;  %s590_s22 = int_to_ptr.vmem [resolvable:$true] %s589_s22  ;;  %s611_s20 = int_to_ptr.vmem [resolvable:$true] %s610_s20 }
 0x168   : > { %s6479_s10 = sld [smem:[#allocation71_spill]] }
 0x16e   : > { %s5070_s1 = scalar_lea.hbm %s6479_s10, 32 }
 0x16f   : > { %p5071_p1 = scmp.ne.s32.totalorder %s6479_s10, %s5070_s1  ;;  %p5077_p12 = scmp.lt.u32.totalorder %s5070_s1, %s6479_s10 }
 0x171   : > { %p5073_p3 = pnand %p5071_p1, %p5641_p7 }
 0x173   : > { %p5074_p11 = pneg %p5073_p3 }
 0x175   : > { %p5079_p13 = pnand %p5077_p12, %p5074_p11 }
 0x177   : > { %5082 = shalt.err (!%p5079_p13)
}
 0x178   : > { %s5083_s28 = scalar_lea.vmem %s590_s22, 32  ;;  %p5091_p6 = scmp.lt.s32.totalorder %s590_s22, %s590_s22 }
 0x179   : > { %p5084_p0 = scmp.ne.s32.totalorder %s590_s22, %s5083_s28  ;;  %p5092_p8 = scmp.lt.s32.totalorder %s5083_s28, %s5083_s28 }
 0x17b   : > { %p5086_p2 = pnand %p5084_p0, %p5641_p7  ;;  %p5093_p9 = por %p5092_p8, %p5091_p6 }
 0x17d   : > { %p5087_p4 = pneg %p5086_p2 }
 0x17f   : > { %p5094_p10 = pnand %p5093_p9, %p5087_p4 }
 0x181   : > { %5097 = shalt.err (!%p5094_p10)
}
 0x182   : > { %4174 = dma.hbm_to_vmem [thread:$0]  (!%p5625_p5), %s6479_s10, 32, %s590_s22, [#allocation22]  }
 0x183   : > { %s6480_s12 = sld [smem:[#allocation73_spill]] }
 0x189   : > { %s5098_s26 = scalar_lea.hbm %s6480_s12, 8192 }
 0x18a   : > { %p5099_p1 = scmp.ne.s32.totalorder %s6480_s12, %s5098_s26  ;;  %p5105_p12 = scmp.lt.u32.totalorder %s5098_s26, %s6480_s12 }
 0x18c   : > { %p5101_p3 = pnand %p5099_p1, %p5641_p7 }
 0x18e   : > { %p5102_p11 = pneg %p5101_p3 }
 0x190   : > { %p5107_p13 = pnand %p5105_p12, %p5102_p11 }
 0x192   : > { %5110 = shalt.err (!%p5107_p13)
}
 0x193   : > { %s5111_s30 = scalar_lea.vmem %s611_s20, 8192  ;;  %p5119_p6 = scmp.lt.s32.totalorder %s611_s20, %s611_s20 }
 0x194   : > { %p5112_p0 = scmp.ne.s32.totalorder %s611_s20, %s5111_s30  ;;  %p5120_p8 = scmp.lt.s32.totalorder %s5111_s30, %s5111_s30 }
 0x196   : > { %p5114_p2 = pnand %p5112_p0, %p5641_p7  ;;  %p5121_p9 = por %p5120_p8, %p5119_p6 }
 0x198   : > { %p5115_p4 = pneg %p5114_p2 }
 0x19a   : > { %p5122_p10 = pnand %p5121_p9, %p5115_p4 }
 0x19c   : > { %5125 = shalt.err (!%p5122_p10)
}
 0x19d   : > { %s5449_s22 = smov 256   ;;  %s5450_s28 = smov 16  }
 0x19e   : > { %4180 = dma.hbm_to_vmem [thread:$0]  (!%p5625_p5), %s6480_s12, 8192, %s611_s20, [#allocation25], %s5449_s22, %s5449_s22, %s5450_s28  }
 0x19f   : > { %s5451_s27 = smov [#allocation29]   ;;  %s5452_s26 = smov [#allocation32]  }
 0x1a0   : > { %s634_s29 = sshll.u32 %s5451_s27, 4  ;;  %s659_s1 = sshll.u32 %s5452_s26, 4  ;;  %s635_s29 = int_to_ptr.vmem [resolvable:$true] %s634_s29  ;;  %s660_s1 = int_to_ptr.vmem [resolvable:$true] %s659_s1 }
 0x1a1   : > { %s6481_s14 = sld [smem:[#allocation75_spill]] }
 0x1a7   : > { %s5126_s2 = scalar_lea.hbm %s6481_s14, 8192 }
 0x1a8   : > { %p5127_p1 = scmp.ne.s32.totalorder %s6481_s14, %s5126_s2  ;;  %p5133_p12 = scmp.lt.u32.totalorder %s5126_s2, %s6481_s14 }
 0x1aa   : > { %p5129_p3 = pnand %p5127_p1, %p5641_p7 }
 0x1ac   : > { %p5130_p11 = pneg %p5129_p3 }
 0x1ae   : > { %p5135_p13 = pnand %p5133_p12, %p5130_p11 }
 0x1b0   : > { %5138 = shalt.err (!%p5135_p13)
}
 0x1b1   : > { %s5139_s20 = scalar_lea.vmem %s635_s29, 8192  ;;  %p5147_p6 = scmp.lt.s32.totalorder %s635_s29, %s635_s29 }
 0x1b2   : > { %p5140_p0 = scmp.ne.s32.totalorder %s635_s29, %s5139_s20  ;;  %p5148_p8 = scmp.lt.s32.totalorder %s5139_s20, %s5139_s20 }
 0x1b4   : > { %p5142_p2 = pnand %p5140_p0, %p5641_p7  ;;  %p5149_p9 = por %p5148_p8, %p5147_p6 }
 0x1b6   : > { %p5143_p4 = pneg %p5142_p2 }
 0x1b8   : > { %p5150_p10 = pnand %p5149_p9, %p5143_p4 }
 0x1ba   : > { %5153 = shalt.err (!%p5150_p10)
}
 0x1bb   : > { %s6482_s21 = smov 8   ;;  %s6483_s16 = sld [smem:[#allocation77_spill]] }
 0x1bc   : > { %4186 = dma.hbm_to_vmem [thread:$0]  (!%p5625_p5), %s6481_s14, 8192, %s635_s29, [#allocation28], %s6476_s17, %s6476_s17, %s6482_s21  }
 0x1c1   : > { %s5154_s24 = scalar_lea.hbm %s6483_s16, 32 }
 0x1c2   : > { %p5155_p1 = scmp.ne.s32.totalorder %s6483_s16, %s5154_s24  ;;  %p5161_p12 = scmp.lt.u32.totalorder %s5154_s24, %s6483_s16 }
 0x1c4   : > { %p5157_p3 = pnand %p5155_p1, %p5641_p7 }
 0x1c6   : > { %p5158_p11 = pneg %p5157_p3 }
 0x1c8   : > { %p5163_p13 = pnand %p5161_p12, %p5158_p11 }
 0x1ca   : > { %5166 = shalt.err (!%p5163_p13)
}
 0x1cb   : > { %s5167_s0 = scalar_lea.vmem %s660_s1, 32  ;;  %p5175_p6 = scmp.lt.s32.totalorder %s660_s1, %s660_s1 }
 0x1cc   : > { %p5168_p0 = scmp.ne.s32.totalorder %s660_s1, %s5167_s0  ;;  %p5176_p8 = scmp.lt.s32.totalorder %s5167_s0, %s5167_s0 }
 0x1ce   : > { %p5170_p2 = pnand %p5168_p0, %p5641_p7  ;;  %p5177_p9 = por %p5176_p8, %p5175_p6 }
 0x1d0   : > { %p5171_p4 = pneg %p5170_p2 }
 0x1d2   : > { %p5178_p10 = pnand %p5177_p9, %p5171_p4 }
 0x1d4   : > { %5181 = shalt.err (!%p5178_p10)
}
 0x1d5   : > { %4192 = dma.hbm_to_vmem [thread:$0]  (!%p5625_p5), %s6483_s16, 32, %s660_s1, [#allocation31]  }
 0x1d6   : > { %s5453_s30 = smov [#allocation33]   ;;  %s6484_s22 = sld [smem:[#allocation78_spill]] }
 0x1d7   : > { %s670_s20 = sshll.u32 %s5453_s30, 4  ;;  %s671_s20 = int_to_ptr.vmem [resolvable:$true] %s670_s20 }
 0x1dc   : > { %s6485_s24 = smov %s6484_s22  ;;  %s5182_s28 = scalar_lea.hbm %s6484_s22, 32 }
 0x1dd   : > { %p5183_p1 = scmp.ne.s32.totalorder %s6485_s24, %s5182_s28  ;;  %p5189_p12 = scmp.lt.u32.totalorder %s5182_s28, %s6485_s24 }
 0x1df   : > { %p5185_p3 = pnand %p5183_p1, %p5641_p7 }
 0x1e1   : > { %p5186_p11 = pneg %p5185_p3 }
 0x1e3   : > { %p5191_p13 = pnand %p5189_p12, %p5186_p11 }
 0x1e5   : > { %5194 = shalt.err (!%p5191_p13)
}
 0x1e6   : > { %s5195_s1 = scalar_lea.vmem %s671_s20, 32  ;;  %p5203_p6 = scmp.lt.s32.totalorder %s671_s20, %s671_s20 }
 0x1e7   : > { %p5196_p0 = scmp.ne.s32.totalorder %s671_s20, %s5195_s1  ;;  %p5204_p8 = scmp.lt.s32.totalorder %s5195_s1, %s5195_s1 }
 0x1e9   : > { %p5198_p2 = pnand %p5196_p0, %p5641_p7  ;;  %p5205_p9 = por %p5204_p8, %p5203_p6 }
 0x1eb   : > { %p5199_p4 = pneg %p5198_p2 }
 0x1ed   : > { %p5206_p10 = pnand %p5205_p9, %p5199_p4 }
 0x1ef   : > { %5209 = shalt.err (!%p5206_p10)
}
 0x1f0   : > { %s6486_s2 = sld [smem:[#allocation52_spill]]  ;;  %s6487_s30 = sld [smem:[#allocation53_spill]] }
 0x1f1   : > { %s6488_s4 = sld [smem:[#allocation58_spill]]  ;;  %s6489_s5 = sld [smem:[#allocation51_spill]] }
 0x1f2   : > { %s6490_s23 = sld [smem:[#allocation59_spill]]  ;;  %s6491_s22 = sld [smem:[#allocation57_spill]] }
 0x1f3   : > { %4195 = dma.hbm_to_vmem [thread:$0]  (!%p5625_p5), %s6485_s24, 32, %s671_s20, [#allocation34]  }
 0x1f4   : > { %s6494_s1 = sld [smem:[#allocation61_spill]] }
 0x1f6   : > { %p71_p7 = scmp.ne.s32.totalorder %s6487_s30, %s6486_s2  ;;  %s681_s18 = sand.u32 1, %s6487_s30  }
 0x1f7   : > { %p6426_p1 = scmp.eq.s32.totalorder %s6488_s4, 0  ;;  %p77_p3 = scmp.ne.s32.totalorder %s6486_s2, %s6489_s5 }
 0x1f8   : > { %p6425_p11 = scmp.lt.s32.totalorder %s6488_s4, 4  ;;  %p6492_p13 = scmp.eq.s32.totalorder %s6490_s23, 0 }
 0x1f9   : > { %p73_p12 = por %p6426_p1, %p71_p7  ;;  %s3702_s3 = sshll.u32 %s681_s18, 4 }
 0x1fa   : > { %p5964_p0 = por %p6492_p13, %p77_p3  ;;  %s4000_s27 = sshll.u32 %s6491_s22, 8 }
 0x1fb   : > { %s6495_s6 = smov %s6494_s1  ;;  %s5972_s0 = scalar_lea.hbm %s6494_s1, %s4000_s27 }
 0x1fc   : > { %s685_s20 = scalar_lea.vmem [#allocation6], %s3702_s3  ;;  %p5978_p5 = pnand %p6425_p11, %p73_p12 }
 0x1fd   : > { %s692_s29 = sshll.u32 %s685_s20, 4  ;;  %s5982_s5 = scalar_lea.sflag [#allocation7], %s681_s18  ;;  %s5974_s29 = int_to_ptr.vmem [resolvable:$true] %s692_s29 }
 0x1fe   : > { %s5210_s26 = scalar_lea.hbm %s5972_s0, 256  ;;  %p5212_p4 = pneg %p5978_p5 }
 0x1ff   : > { %p5211_p2 = scmp.ne.s32.totalorder %s5972_s0, %s5210_s26  ;;  %s5215_s19 = scalar_lea.hbm %s6495_s6, 512 }
 0x200   : > { %p5216_p9 = scmp.lt.u32.totalorder %s5972_s0, %s6495_s6  ;;  %p5217_p10 = scmp.lt.u32.totalorder %s5215_s19, %s5210_s26 }
 0x201   : > { %p5213_p6 = pnand %p5212_p4, %p5211_p2  ;;  %p5219_p3 = scmp.lt.u32.totalorder %s5210_s26, %s5972_s0 }
 0x202   : > { %p5218_p7 = por %p5217_p10, %p5216_p9 }
 0x203   : > { %p5214_p8 = pneg %p5213_p6 }
 0x204   : > { %p5220_p12 = por %p5219_p3, %p5218_p7 }
 0x206   : > { %p5221_p13 = pnand %p5220_p12, %p5214_p8 }
 0x208   : > { %5224 = shalt.err (!%p5221_p13)
}
 0x209   : > { %s5225_s18 = scalar_lea.vmem %s5974_s29, 256  ;;  %s5454_s3 = smov [#allocation6]  }
 0x20a   : > { %p5226_p2 = scmp.ne.s32.totalorder %s5974_s29, %s5225_s18  ;;  %s5230_s27 = sshll.u32 %s5454_s3, 4  ;;  %s5231_s27 = int_to_ptr.vmem [resolvable:$false] %s5230_s27 }
 0x20b   : > { %s5232_s1 = scalar_lea.vmem %s5231_s27, 512  ;;  %p5233_p1 = scmp.lt.s32.totalorder %s5974_s29, %s5231_s27 }
 0x20c   : > { %p5228_p6 = pnand %p5226_p2, %p5212_p4  ;;  %p5234_p9 = scmp.lt.s32.totalorder %s5232_s1, %s5225_s18 }
 0x20e   : > { %p5229_p11 = pneg %p5228_p6  ;;  %p5235_p10 = por %p5234_p9, %p5233_p1 }
 0x210   : > { %p5236_p7 = pnand %p5235_p10, %p5229_p11 }
 0x212   : > { %5239 = shalt.err (!%p5236_p7)
}
 0x213   : > { %s6497_s26 = sld [smem:[#allocation56_spill]]  ;;  %s6498_s19 = sld [smem:[#allocation50_spill]] }
 0x214   : > { %s6499_s20 = sld [smem:[#allocation48_spill]]  ;;  %s6500_s3 = sld [smem:[#allocation49_spill]] }
 0x215   : > { %4199 = dma.hbm_to_vmem [thread:$0]  (!%p5978_p5), %s5972_s0, 256, %s5974_s29, %s5982_s5, %s6476_s17, %s6476_s17, %s6482_s21  }
 0x216   : > { %s64_s2 = sadd.s32 1, %s6487_s30  ;;  %s3683_s18 = sadd.s32 4294967294, %s6488_s4  }
 0x217   : > { %s57_s1 = sadd.s32 1, %s6491_s22  ;;  %p6501_p8 = scmp.eq.s32.totalorder %s6490_s23, 0 }
 0x218   : > { %p467_p12 = scmp.eq.s32.totalorder %s6490_s23, 3  ;;  %p473_p13 = scmp.eq.s32.totalorder %s3683_s18, 3 }
 0x219   : > { %s54_s27 = sadd.s32 1, %s6497_s26  ;;  %s92_s6 = sadd.s32 1, %s6498_s19 }
 0x21a   : > { %p55_p1 = scmp.ge.s32.totalorder %s54_s27, 2  ;;  %p105_p11 = scmp.ne.s32.totalorder %s6500_s3, %s6499_s20 }
 0x21b   : > { %p99_p4 = scmp.ne.s32.totalorder %s6498_s19, %s6500_s3  ;;  %p6505_p9 = scmp.eq.s32.totalorder %s6488_s4, 0 }
 0x21c   : > { %s6559_s27 = smov (%p55_p1, %s54_s27), 0  ;;  %s6561_s1 = smov (!%p55_p1, %s57_s1), %s6491_s22 }
 0x21d   : > { %s88_s7 = ssub.s32 %s6497_s26, %s6559_s27  ;;  %p59_p5 = scmp.ge.s32.totalorder %s6561_s1, 2 }
 0x21e   : > { %p6029_p3 = por %p105_p11, %p6501_p8  ;;  %p6036_p2 = por %p467_p12, %p99_p4 }
 0x21f   : > { %s6563_s1 = smov (%p59_p5, %s6561_s1), 0  ;;  %p6040_p6 = por %p473_p13, %p105_p11 }
 0x220   : > { %s6502_s17 = scalar_select %p6029_p3, 1, 0 }
 0x221   : > { %s6503_s21 = scalar_select %p6036_p2, 1, 0 }
 0x222   : > { %s6504_s0 = scalar_select %p6040_p6, 1, 0 }
 0x223   : > { %s61_s29 = ssub.s32 %s6491_s22, %s6563_s1  ;;  %p6048_p10 = por %p99_p4, %p6505_p9 }
 0x224   : > { %p62_p7 = scmp.eq.s32.totalorder %s61_s29, 0  ;;  %s89_s23 = sor.u32 %s88_s7, %s61_s29 }
 0x225   : > { %p90_p1 = scmp.eq.s32.totalorder %s89_s23, 0  ;;  %s702_s20 = sand.u32 1, %s6488_s4  }
 0x226   : > { %s6565_s30 = smov (!%p62_p7, %s6487_s30), %s64_s2  ;;  %s704_s18 = sand.u32 1, %s6498_s19  }
 0x227   : > { %s6057_s3 = scalar_select %p90_p1, %s6498_s19, %s92_s6  }
 0x228   : > { %s3706_s8 = sshll.u32 %s6497_s26, 1  ;;  %s3705_s9 = sshll.u32 %s704_s18, 4 }
 0x229   : > { %s3707_s10 = sshll.u32 %s6491_s22, 2  ;;  %s706_s13 = scalar_lea.vmem [#allocation9], %s3705_s9 }
 0x22a   : > { %s712_s11 = sadd.s32 %s3707_s10, %s3706_s8  ;;  %s716_s14 = sshll.u32 %s706_s13, 4  ;;  %s6067_s14 = int_to_ptr.vmem [resolvable:$true] %s716_s14 }
 0x22b   : > { %s3708_s12 = sshll.u32 %s712_s11, 7  ;;  %s6507_s24 = sld [smem:[#allocation62_spill]] }
 0x22c   : > { %p6508_p11 = scmp.lt.s32.totalorder %s6488_s4, 4  ;;  %s703_s7 = scalar_lea.sflag [#allocation10], %s702_s20 }
 0x22e   : > { %p6073_p4 = pnand %p6508_p11, %p6048_p10 }
 0x230   : > { %p5242_p8 = pneg %p6073_p4 }
 0x231   : > { %s6065_s25 = scalar_lea.hbm %s6507_s24, %s3708_s12  ;;  %s5245_s11 = scalar_lea.hbm %s6507_s24, 1024 }
 0x232   : > { %s5240_s8 = scalar_lea.hbm %s6065_s25, 256  ;;  %p5246_p9 = scmp.lt.u32.totalorder %s6065_s25, %s6507_s24 }
 0x233   : > { %p5241_p5 = scmp.ne.s32.totalorder %s6065_s25, %s5240_s8  ;;  %p5247_p10 = scmp.lt.u32.totalorder %s5245_s11, %s5240_s8 }
 0x234   : > { %p5249_p1 = scmp.lt.u32.totalorder %s5240_s8, %s6065_s25 }
 0x235   : > { %p5243_p12 = pnand %p5242_p8, %p5241_p5  ;;  %p5248_p7 = por %p5247_p10, %p5246_p9 }
 0x237   : > { %p5244_p13 = pneg %p5243_p12  ;;  %p5250_p11 = por %p5249_p1, %p5248_p7 }
 0x239   : > { %p5251_p6 = pnand %p5250_p11, %p5244_p13 }
 0x23b   : > { %5254 = shalt.err (!%p5251_p6)
}
 0x23c   : > { %s5255_s15 = scalar_lea.vmem %s6067_s14, 256  ;;  %s5455_s16 = smov [#allocation9]  }
 0x23d   : > { %p5256_p5 = scmp.ne.s32.totalorder %s6067_s14, %s5255_s15  ;;  %s5260_s4 = sshll.u32 %s5455_s16, 4  ;;  %s5261_s4 = int_to_ptr.vmem [resolvable:$false] %s5260_s4 }
 0x23e   : > { %s5262_s22 = scalar_lea.vmem %s5261_s4, 512  ;;  %p5263_p3 = scmp.lt.s32.totalorder %s6067_s14, %s5261_s4 }
 0x23f   : > { %p5258_p12 = pnand %p5256_p5, %p5242_p8  ;;  %p5264_p9 = scmp.lt.s32.totalorder %s5262_s22, %s5255_s15 }
 0x241   : > { %p5259_p2 = pneg %p5258_p12  ;;  %p5265_p10 = por %p5264_p9, %p5263_p3 }
 0x243   : > { %p5266_p7 = pnand %p5265_p10, %p5259_p2 }
 0x245   : > { %5269 = shalt.err (!%p5266_p7)
}
 0x246   : > { %4202 = dma.hbm_to_vmem [thread:$0]  (!%p6073_p4), %s6065_s25, 256, %s6067_s14, %s703_s7  }
 0x247   : > { %s6510_s26 = sld [smem:[#allocation60_spill]] }
 0x24d   : > { %p6511_p6 = scmp.ne.s32.totalorder %s6510_s26, 0 }
 0x24e   : > { %s6512_s19 = sld [smem:[#allocation52_spill]] (!%p6511_p6) }
 0x24f   : > { %725 = sbr.rel (%p6511_p6) target bundleno = 3515 (0xdbb), region = 92 }
 0x254   : > { %s727_s2 = sand.u32 (!%p6511_p6), 1, %s6512_s19  }
 0x255   : > { %s6105_s29 = sshll.u32 (!%p6511_p6), %s727_s2, 4  ;;  %s728_s5 = scalar_lea.sflag (!%p6511_p6), [#allocation7], %s727_s2 }
 0x256   : > { %s731_s23 = scalar_lea.vmem [#allocation6], %s6105_s29 }
 0x257   : > { %5343 = dma.done.wait (%p5964_p0), %s728_s5, 256  }
 0x258   : > { %5345 = vsyncadd (%p5964_p0), %s728_s5, 4294967040  ;;  %s6513_s20 = sld [smem:[#allocation59_spill]]  ;;  %s6514_s18 = sld [smem:[#allocation49_spill]] }
 0x259   : > { %p6515_p3 = scmp.ne.s32.totalorder %s6502_s17, 0 }
 0x25e   : > { %s736_s14 = sand.u32 1, %s6513_s20   ;;  %s738_s25 = sand.u32 1, %s6514_s18  }
 0x25f   : > { %s6116_s6 = sshll.u32 %s738_s25, 4  ;;  %s737_s7 = scalar_lea.sflag [#allocation10], %s736_s14 }
 0x260   : > { %s740_s8 = scalar_lea.vmem [#allocation9], %s6116_s6 }
 0x261   : > { %5347 = dma.done.wait (%p6515_p3), %s737_s7, 256  }
 0x262   : > { %5349 = vsyncadd (%p6515_p3), %s737_s7, 4294967040  ;;  %p6516_p2 = scmp.eq.s32.totalorder %s6513_s20, 0 }
 0x264   : > { %5351 = dma.done.wait (%p6516_p2), [#allocation10], 4096   ;;  %p6517_p0 = pmov %p6516_p2 }
 0x266   : > { %5353 = vsyncadd (%p6517_p0), [#allocation10], 4294963200  ;;  %p6518_p4 = pmov %p6517_p0 }
 0x267   : > { %p6519_p8 = pmov %p6517_p0 }
 0x268   : > { %5355 = dma.done.wait (%p6518_p4), [#allocation13], 4128  }
 0x269   : > { %5357 = vsyncadd (%p6519_p8), [#allocation13], 4294963168  ;;  %p6520_p13 = pmov %p6517_p0 }
 0x26a   : > { %p6521_p1 = pmov %p6517_p0 }
 0x26b   : > { %5359 = dma.done.wait (%p6520_p13), [#allocation16], 4128  }
 0x26c   : > { %5361 = vsyncadd (%p6521_p1), [#allocation16], 4294963168  ;;  %p6522_p11 = pmov %p6517_p0 }
 0x26d   : > { %p6523_p5 = pmov %p6517_p0 }
 0x26e   : > { %5363 = dma.done.wait (%p6522_p11), [#allocation19], 4128  }
 0x26f   : > { %5365 = vsyncadd (%p6523_p5), [#allocation19], 4294963168  ;;  %p6524_p12 = pmov %p6517_p0 }
 0x270   : > { %p6525_p9 = pmov %p6517_p0 }
 0x271   : > { %5367 = dma.done.wait (%p6524_p12), [#allocation22], 64  }
 0x272   : > { %5369 = vsyncadd (%p6525_p9), [#allocation22], 4294967232  ;;  %p6526_p10 = pmov %p6517_p0 }
 0x273   : > { %p6527_p7 = pmov %p6517_p0 }
 0x274   : > { %5371 = dma.done.wait (%p6526_p10), [#allocation25], 8224  }
 0x275   : > { %5373 = vsyncadd (%p6527_p7), [#allocation25], 4294959072  ;;  %p6528_p6 = pmov %p6517_p0 }
 0x276   : > { %p6529_p3 = pmov %p6517_p0 }
 0x277   : > { %5375 = dma.done.wait (%p6528_p6), [#allocation28], 8256  }
 0x278   : > { %5377 = vsyncadd (%p6529_p3), [#allocation28], 4294959040  ;;  %p6530_p2 = pmov %p6517_p0 }
 0x27a   : > { %5379 = dma.done.wait (%p6530_p2), [#allocation31], 64  }
 0x27b   : > { %5381 = vsyncadd (%p6517_p0), [#allocation31], 4294967232  ;;  %p6531_p4 = pmov %p6517_p0 }
 0x27c   : > { %p6532_p8 = pmov %p6517_p0 }
 0x27d   : > { %5383 = dma.done.wait (%p6531_p4), [#allocation34], 32  }
 0x27e   : > { %5385 = vsyncadd (%p6532_p8), [#allocation34], 4294967264  ;;  %s6160_s28 = scalar_lea.vmem [#allocation35], %s6116_s6  ;;  %s6533_s17 = sld [smem:[#allocation54_spill]] }
 0x284   : > { %p3729_p13 = scmp.ne.s32.totalorder %s6533_s17, 0 }
 0x285   : > { %v4351_v0 = vld [vmem:[#allocation14 + $0x4] ss:$8 sps:$4 sm:$0xff] (!%p3729_p13)   ;;  %v4355_v2 = vld [vmem:[#allocation14] ss:$8 sps:$4 sm:$0xff] (!%p3729_p13)   ;;  %v4357_v4 = vld [vmem:[#allocation14 + $0x14] ss:$8 sps:$4 sm:$0xff] (!%p3729_p13)  }
 0x286   : > { %866 = sbr.rel (%p3729_p13) target bundleno = 931 (0x3a3), region = 168  ;;  %v4353_v1 = vld [vmem:[#allocation17 + $0x4] ss:$8 sps:$4 sm:$0xff] (!%p3729_p13)   ;;  %1083 = vmatprep.subr.bf16.mxu0 (!%p3729_p13), %v4351_v0  ;;  %v4356_v3 = vld [vmem:[#allocation17] ss:$8 sps:$4 sm:$0xff] (!%p3729_p13)  }
 0x287   : > { %1330 = vmatprep.subr.bf16.mxu1 (!%p3729_p13), %v4353_v1  ;;  %1084 = vmatpush1.bf16.msra.mxu0 (!%p3729_p13), %v4355_v2  ;;  %v4359_v5 = vld [vmem:[#allocation17 + $0x14] ss:$8 sps:$4 sm:$0xff] (!%p3729_p13)   ;;  %v4362_v7 = vld [vmem:[#allocation17 + $0x10] ss:$8 sps:$4 sm:$0xff] (!%p3729_p13)   ;;  %v4363_v8 = vld [vmem:[#allocation14 + $0x24] ss:$8 sps:$4 sm:$0xff] (!%p3729_p13)   ;;  %v903_v2 = vlaneseq (!%p3729_p13) }
 0x288   : > { %1331 = vmatpush1.bf16.msra.mxu1 (!%p3729_p13), %v4356_v3  ;;  %v4361_v6 = vld [vmem:[#allocation14 + $0x10] ss:$8 sps:$4 sm:$0xff] (!%p3729_p13)   ;;  %1085 = vmatprep.subr.bf16.mxu0 (!%p3729_p13), %v4357_v4  ;;  %v4367_v10 = vld [vmem:[#allocation14 + $0x20] ss:$8 sps:$4 sm:$0xff] (!%p3729_p13)   ;;  %v4369_v12 = vld [vmem:[#allocation14 + $0x34] ss:$8 sps:$4 sm:$0xff] (!%p3729_p13)  }
 0x289   : > { %1332 = vmatprep.subr.bf16.mxu1 (!%p3729_p13), %v4359_v5  ;;  %v4365_v9 = vld [vmem:[#allocation17 + $0x24] ss:$8 sps:$4 sm:$0xff] (!%p3729_p13)   ;;  %v4368_v11 = vld [vmem:[#allocation17 + $0x20] ss:$8 sps:$4 sm:$0xff] (!%p3729_p13)   ;;  %v4371_v13 = vld [vmem:[#allocation17 + $0x34] ss:$8 sps:$4 sm:$0xff] (!%p3729_p13)  }
 0x28a   : > { %v4373_v14 = vld [vmem:[#allocation14 + $0x30] ss:$8 sps:$4 sm:$0xff] (!%p3729_p13)   ;;  %v4375_v16 = vld [vmem:[#allocation14 + $0x44] ss:$8 sps:$4 sm:$0xff] (!%p3729_p13)   ;;  %v4379_v18 = vld [vmem:[#allocation14 + $0x40] ss:$8 sps:$4 sm:$0xff] (!%p3729_p13)  }
 0x28b   : > { %1086 = vmatpush1.bf16.msra.mxu0 (!%p3729_p13), %v4361_v6  ;;  %v4374_v15 = vld [vmem:[#allocation17 + $0x30] ss:$8 sps:$4 sm:$0xff] (!%p3729_p13)   ;;  %v4377_v17 = vld [vmem:[#allocation17 + $0x44] ss:$8 sps:$4 sm:$0xff] (!%p3729_p13)   ;;  %v4380_v19 = vld [vmem:[#allocation17 + $0x40] ss:$8 sps:$4 sm:$0xff] (!%p3729_p13)  }
 0x28c   : > { %1333 = vmatpush1.bf16.msra.mxu1 (!%p3729_p13), %v4362_v7  ;;  %1087 = vmatprep.subr.bf16.mxu0 (!%p3729_p13), %v4363_v8  ;;  %v4381_v20 = vld [vmem:[#allocation14 + $0x54] ss:$8 sps:$4 sm:$0xff] (!%p3729_p13)   ;;  %v4385_v22 = vld [vmem:[#allocation14 + $0x50] ss:$8 sps:$4 sm:$0xff] (!%p3729_p13)   ;;  %v4387_v24 = vld [vmem:[#allocation14 + $0x64] ss:$8 sps:$4 sm:$0xff] (!%p3729_p13)  }
 0x28d   : > { %1334 = vmatprep.subr.bf16.mxu1 %v4365_v9  ;;  %v4383_v21 = vld [vmem:[#allocation17 + $0x54] ss:$8 sps:$4 sm:$0xff]   ;;  %v4386_v23 = vld [vmem:[#allocation17 + $0x50] ss:$8 sps:$4 sm:$0xff]   ;;  %v4389_v25 = vld [vmem:[#allocation17 + $0x64] ss:$8 sps:$4 sm:$0xff]  }
 0x28e   : > { %v4391_v26 = vld [vmem:[#allocation14 + $0x60] ss:$8 sps:$4 sm:$0xff]   ;;  %v4393_v28 = vld [vmem:[#allocation14 + $0x74] ss:$8 sps:$4 sm:$0xff]   ;;  %v4397_v30 = vld [vmem:[#allocation14 + $0x70] ss:$8 sps:$4 sm:$0xff]  }
 0x28f   : > { %1088 = vmatpush1.bf16.msra.mxu0 %v4367_v10  ;;  %v4392_v27 = vld [vmem:[#allocation17 + $0x60] ss:$8 sps:$4 sm:$0xff]   ;;  %v4395_v29 = vld [vmem:[#allocation17 + $0x74] ss:$8 sps:$4 sm:$0xff]   ;;  %v4398_v31 = vld [vmem:[#allocation17 + $0x70] ss:$8 sps:$4 sm:$0xff]  }
 0x290   : > { %1335 = vmatpush1.bf16.msra.mxu1 %v4368_v11  ;;  %1089 = vmatprep.subr.bf16.mxu0 %v4369_v12  ;;  %v4399_v32 = vld [vmem:[#allocation14 + $0x84] ss:$8 sps:$4 sm:$0xff]   ;;  %v4403_v34 = vld [vmem:[#allocation14 + $0x80] ss:$8 sps:$4 sm:$0xff]   ;;  %v4405_v36 = vld [vmem:[#allocation14 + $0x94] ss:$8 sps:$4 sm:$0xff]  }
 0x291   : > { %1336 = vmatprep.subr.bf16.mxu1 %v4371_v13  ;;  %v4401_v33 = vld [vmem:[#allocation17 + $0x84] ss:$8 sps:$4 sm:$0xff]   ;;  %v4404_v35 = vld [vmem:[#allocation17 + $0x80] ss:$8 sps:$4 sm:$0xff]   ;;  %v4407_v37 = vld [vmem:[#allocation17 + $0x94] ss:$8 sps:$4 sm:$0xff]  }
 0x292   : > { %v4409_v38 = vld [vmem:[#allocation14 + $0x90] ss:$8 sps:$4 sm:$0xff]   ;;  %v4411_v40 = vld [vmem:[#allocation14 + $0xa4] ss:$8 sps:$4 sm:$0xff]   ;;  %v4415_v42 = vld [vmem:[#allocation14 + $0xa0] ss:$8 sps:$4 sm:$0xff]  }
 0x293   : > { %1090 = vmatpush1.bf16.msra.mxu0 %v4373_v14  ;;  %v4410_v39 = vld [vmem:[#allocation17 + $0x90] ss:$8 sps:$4 sm:$0xff]   ;;  %v4413_v41 = vld [vmem:[#allocation17 + $0xa4] ss:$8 sps:$4 sm:$0xff]   ;;  %v4416_v43 = vld [vmem:[#allocation17 + $0xa0] ss:$8 sps:$4 sm:$0xff]  }
 0x294   : > { %1337 = vmatpush1.bf16.msra.mxu1 %v4374_v15  ;;  %1091 = vmatprep.subr.bf16.mxu0 %v4375_v16  ;;  %v4417_v44 = vld [vmem:[#allocation14 + $0xb4] ss:$8 sps:$4 sm:$0xff]   ;;  %v4421_v47 = vld [vmem:[#allocation14 + $0xb0] ss:$8 sps:$4 sm:$0xff]   ;;  %v4423_v49 = vld [vmem:[#allocation14 + $0xc4] ss:$8 sps:$4 sm:$0xff]  }
 0x295   : > { %1338 = vmatprep.subr.bf16.mxu1 %v4377_v17  ;;  %v4419_v45 = vld [vmem:[#allocation17 + $0xb4] ss:$8 sps:$4 sm:$0xff]   ;;  %v4449_v46 = vld [vmem:[%s731_s23 + $0x4] ss:$8 sps:$4 sm:$0xff]   ;;  %v4425_v50 = vld [vmem:[#allocation17 + $0xc4] ss:$8 sps:$4 sm:$0xff]  }
 0x296   : > { %v4422_v48 = vld [vmem:[#allocation17 + $0xb0] ss:$8 sps:$4 sm:$0xff]   ;;  %1115 = vmatprep.mubr.bf16.mxu0 %v4449_v46  ;;  %1362 = vmatprep.mubr.bf16.mxu1 %v4449_v46  ;;  %v4427_v51 = vld [vmem:[#allocation14 + $0xc0] ss:$8 sps:$4 sm:$0xff]   ;;  %v4435_v57 = vld [vmem:[#allocation14 + $0xe4] ss:$8 sps:$4 sm:$0xff]  }
 0x297   : > { %1092 = vmatpush1.bf16.msra.mxu0 %v4379_v18  ;;  %v4428_v52 = vld [vmem:[#allocation17 + $0xc0] ss:$8 sps:$4 sm:$0xff]   ;;  %v4429_v53 = vld [vmem:[#allocation14 + $0xd4] ss:$8 sps:$4 sm:$0xff]   ;;  %v4433_v55 = vld [vmem:[#allocation14 + $0xd0] ss:$8 sps:$4 sm:$0xff]  }
 0x298   : > { %1339 = vmatpush1.bf16.msra.mxu1 %v4380_v19  ;;  %1093 = vmatprep.subr.bf16.mxu0 %v4381_v20  ;;  %v4431_v54 = vld [vmem:[#allocation17 + $0xd4] ss:$8 sps:$4 sm:$0xff]   ;;  %v4434_v56 = vld [vmem:[#allocation17 + $0xd0] ss:$8 sps:$4 sm:$0xff]   ;;  %v4437_v58 = vld [vmem:[#allocation17 + $0xe4] ss:$8 sps:$4 sm:$0xff]  }
 0x299   : > { %1340 = vmatprep.subr.bf16.mxu1 %v4383_v21  ;;  %v4439_v59 = vld [vmem:[#allocation14 + $0xe0] ss:$8 sps:$4 sm:$0xff]   ;;  %v4441_v61 = vld [vmem:[#allocation14 + $0xf4] ss:$8 sps:$4 sm:$0xff]   ;;  %v4445_v63 = vld [vmem:[#allocation14 + $0xf0] ss:$8 sps:$4 sm:$0xff]  }
 0x29a   : > { %v4440_v60 = vld [vmem:[#allocation17 + $0xe0] ss:$8 sps:$4 sm:$0xff]   ;;  %v4443_v62 = vld [vmem:[#allocation17 + $0xf4] ss:$8 sps:$4 sm:$0xff]   ;;  %v4446_v0 = vld [vmem:[#allocation17 + $0xf0] ss:$8 sps:$4 sm:$0xff]  }
 0x29b   : > { %1094 = vmatpush1.bf16.msra.mxu0 %v4385_v22  ;;  %v4447_v1 = vld [vmem:[%s731_s23] ss:$8 sps:$4 sm:$0xff]   ;;  %v904_v3 = vshrl.u32 %v903_v2, 7  ;;  %v1158_v6 = vld [vmem:[#allocation18] sm:$0x3] }
 0x29c   : > { %1341 = vmatpush1.bf16.msra.mxu1 %v4386_v23  ;;  %1095 = vmatprep.subr.bf16.mxu0 %v4387_v24  ;;  %v901_v5 = vld [vmem:[#allocation15] sm:$0x3] }
 0x29d   : > { %1342 = vmatprep.subr.bf16.mxu1 %v4389_v25  ;;  %v905_v4 = vsub.s32 0, %v904_v3  ;;  %v909_v7 = vsub.s32 1, %v904_v3 }
 0x29f   : > { %1096 = vmatpush1.bf16.msra.mxu0 %v4391_v26  ;;  %v906_v8 = vrot.slane %v901_v5, %v905_v4  ;;  %v1163_v9 = vrot.slane %v1158_v6, %v905_v4  ;;  %v910_v12 = vrot.slane %v901_v5, %v909_v7  ;;  %v1167_v13 = vrot.slane %v1158_v6, %v909_v7 }
 0x2a0   : > { %1343 = vmatpush1.bf16.msra.mxu1 %v4392_v27  ;;  %1097 = vmatprep.subr.bf16.mxu0 %v4393_v28 }
 0x2a1   : > { %1344 = vmatprep.subr.bf16.mxu1 %v4395_v29 }
 0x2a3   : > { %1098 = vmatpush1.bf16.msra.mxu0 %v4397_v30 }
 0x2a4   : > { %1345 = vmatpush1.bf16.msra.mxu1 %v4398_v31  ;;  %1099 = vmatprep.subr.bf16.mxu0 %v4399_v32 }
 0x2a5   : > { %1346 = vmatprep.subr.bf16.mxu1 %v4401_v33 }
 0x2a7   : > { %1100 = vmatpush1.bf16.msra.mxu0 %v4403_v34 }
 0x2a8   : > { %1347 = vmatpush1.bf16.msra.mxu1 %v4404_v35  ;;  %1101 = vmatprep.subr.bf16.mxu0 %v4405_v36 }
 0x2a9   : > { %1348 = vmatprep.subr.bf16.mxu1 %v4407_v37 }
 0x2ab   : > { %1102 = vmatpush1.bf16.msra.mxu0 %v4409_v38 }
 0x2ac   : > { %1349 = vmatpush1.bf16.msra.mxu1 %v4410_v39  ;;  %1103 = vmatprep.subr.bf16.mxu0 %v4411_v40 }
 0x2ad   : > { %1350 = vmatprep.subr.bf16.mxu1 %v4413_v41 }
 0x2af   : > { %1104 = vmatpush1.bf16.msra.mxu0 %v4415_v42 }
 0x2b0   : > { %1351 = vmatpush1.bf16.msra.mxu1 %v4416_v43  ;;  %1105 = vmatprep.subr.bf16.mxu0 %v4417_v44 }
 0x2b1   : > { %1352 = vmatprep.subr.bf16.mxu1 %v4419_v45 }
 0x2b3   : > { %1106 = vmatpush1.bf16.msra.mxu0 %v4421_v47 }
 0x2b4   : > { %1353 = vmatpush1.bf16.msra.mxu1 %v4422_v48  ;;  %1107 = vmatprep.subr.bf16.mxu0 %v4423_v49 }
 0x2b5   : > { %1354 = vmatprep.subr.bf16.mxu1 %v4425_v50 }
 0x2b7   : > { %1108 = vmatpush1.bf16.msra.mxu0 %v4427_v51 }
 0x2b8   : > { %1355 = vmatpush1.bf16.msra.mxu1 %v4428_v52  ;;  %1109 = vmatprep.subr.bf16.mxu0 %v4429_v53 }
 0x2b9   : > { %1356 = vmatprep.subr.bf16.mxu1 %v4431_v54 }
 0x2bb   : > { %1110 = vmatpush1.bf16.msra.mxu0 %v4433_v55 }
 0x2bc   : > { %1357 = vmatpush1.bf16.msra.mxu1 %v4434_v56  ;;  %1111 = vmatprep.subr.bf16.mxu0 %v4435_v57 }
 0x2bd   : > { %1358 = vmatprep.subr.bf16.mxu1 %v4437_v58 }
 0x2bf   : > { %1112 = vmatpush1.bf16.msra.mxu0 %v4439_v59 }
 0x2c0   : > { %1359 = vmatpush1.bf16.msra.mxu1 %v4440_v60  ;;  %1113 = vmatprep.subr.bf16.mxu0 %v4441_v61 }
 0x2c1   : > { %1360 = vmatprep.subr.bf16.mxu1 %v4443_v62 }
 0x2c3   : > { %1114 = vmatpush1.bf16.msra.mxu0 %v4445_v63 }
 0x2c4   : > { %1361 = vmatpush1.bf16.msra.mxu1 %v4446_v0 }
 0x2c6   : > { %1116 = vmatmul.mubr.bf16.vlgmr.msra.gmra.mrb[0].mxu0 %v4447_v1 }
 0x2c7   : > { %1363 = vmatmul.mubr.bf16.vlgmr.msra.gmra.mrb[0].mxu1 %v4447_v1 }
 0x399   : > { %v1117_v10 = vpop.f32.mrb[0].mxu0 }
 0x39a   : > { %v1364_v11 = vpop.f32.mrb[0].mxu1  ;;  %v1119_v14 = vpop.f32.mrb[1].mxu0  ;;  %v1118_v18 = vadd.f32 %v1117_v10, %v906_v8 }
 0x39b   : > { %v1366_v15 = vpop.f32.mrb[1].mxu1  ;;  %v1121_v16 = vpop.f32.mrb[2].mxu0  ;;  %v1365_v19 = vadd.f32 %v1364_v11, %v1163_v9  ;;  %v1120_v24 = vadd.f32 %v1119_v14, %v910_v12 }
 0x39c   : > { %v1368_v17 = vpop.f32.mrb[2].mxu1  ;;  %v1122_v20 = vadd.f32 %v1121_v16, %v906_v8  ;;  %v1123_v22 = vpop.f32.mrb[3].mxu0  ;;  %v1367_v25 = vadd.f32 %v1366_v15, %v1167_v13 }
 0x39d   : > { %v1369_v21 = vadd.f32 %v1368_v17, %v1163_v9  ;;  %v1370_v23 = vpop.f32.mrb[3].mxu1  ;;  %v1124_v26 = vadd.f32 %v1123_v22, %v910_v12 }
 0x39e   : > { %v1371_v27 = vadd.f32 %v1370_v23, %v1167_v13  ;;  %v1373_v28 = vpack.c.bf16 %v1122_v20, %v1118_v18 }
 0x39f   : > { %v1375_v29 = vpack.c.bf16 %v1369_v21, %v1365_v19  ;;  %v1377_v30 = vpack.c.bf16 %v1124_v26, %v1120_v24 }
 0x3a0   : > { %v1380_v31 = vpack.c.bf16 %v1371_v27, %v1367_v25  ;;  %1374 = vst [vmem:[#allocation2] sm:$0xff] %v1373_v28 }
 0x3a1   : > { %1376 = vst [vmem:[#allocation3] sm:$0xff] %v1375_v29  ;;  %1379 = vst [vmem:[#allocation2 + $0x8] sm:$0xff] %v1377_v30 }
 0x3a2   : > { %1382 = vst [vmem:[#allocation3 + $0x8] sm:$0xff] %v1380_v31 }
 0x3a3 PF: > { %v4450_v32 = vld [vmem:[#allocation11 + $0x4] ss:$8 sps:$4 sm:$0xff]   ;;  %v4452_v33 = vld [vmem:[#allocation11] ss:$8 sps:$4 sm:$0xff]   ;;  %v4453_v34 = vld [vmem:[#allocation11 + $0x14] ss:$8 sps:$4 sm:$0xff]   ;;  %v1421_v6 = vlaneseq }
 0x3a4   : > { %1591 = vmatprep.subr.bf16.mxu0 %v4450_v32  ;;  %v4455_v35 = vld [vmem:[#allocation11 + $0x10] ss:$8 sps:$4 sm:$0xff]   ;;  %v4456_v36 = vld [vmem:[#allocation11 + $0x24] ss:$8 sps:$4 sm:$0xff]   ;;  %v4458_v37 = vld [vmem:[#allocation11 + $0x20] ss:$8 sps:$4 sm:$0xff]  }
 0x3a5   : > { %1592 = vmatpush1.bf16.msra.mxu0 %v4452_v33  ;;  %v4459_v38 = vld [vmem:[#allocation11 + $0x34] ss:$8 sps:$4 sm:$0xff]   ;;  %v4461_v39 = vld [vmem:[#allocation11 + $0x30] ss:$8 sps:$4 sm:$0xff]   ;;  %v4462_v40 = vld [vmem:[#allocation11 + $0x44] ss:$8 sps:$4 sm:$0xff]  }
 0x3a6   : > { %1593 = vmatprep.subr.bf16.mxu0 %v4453_v34  ;;  %v4464_v41 = vld [vmem:[#allocation11 + $0x40] ss:$8 sps:$4 sm:$0xff]   ;;  %v4465_v42 = vld [vmem:[#allocation11 + $0x54] ss:$8 sps:$4 sm:$0xff]   ;;  %v4467_v43 = vld [vmem:[#allocation11 + $0x50] ss:$8 sps:$4 sm:$0xff]  }
 0x3a7   : > { %v4468_v44 = vld [vmem:[#allocation11 + $0x64] ss:$8 sps:$4 sm:$0xff]   ;;  %v4470_v45 = vld [vmem:[#allocation11 + $0x60] ss:$8 sps:$4 sm:$0xff]   ;;  %v4471_v47 = vld [vmem:[#allocation11 + $0x74] ss:$8 sps:$4 sm:$0xff]  }
 0x3a8   : > { %v6169_v46 = vld [vmem:[%s740_s8 + $0x8] sm:$0xff]  ;;  %v6175_v2 = vld [vmem:[%s740_s8] sm:$0xff]  ;;  %v5456_v4 = vmov 0.0   ;;  %vm5457_vm0 = vmmov 0   ;;  %v6183_v7 = vshrl.u32 %v1421_v6, 7  ;;  %vm1723_vm1 = vcmask 64512  }
 0x3a9   : > { %1594 = vmatpush1.bf16.msra.mxu0 %v4455_v35  ;;  %v1386_v48 = vpack.c.bf16 %v6169_v46, %v6169_v46  ;;  %v4473_v49 = vld [vmem:[#allocation11 + $0x70] ss:$8 sps:$4 sm:$0xff]   ;;  %v4474_v50 = vld [vmem:[#allocation11 + $0x84] ss:$8 sps:$4 sm:$0xff]   ;;  %v4476_v51 = vld [vmem:[#allocation11 + $0x80] ss:$8 sps:$4 sm:$0xff]   ;;  %v1385_v3 = vpack.c.bf16 %v6175_v2, %v6175_v2  ;;  %4029 = vmatprep.subr.bf16.mxu1 %v5456_v4 }
 0x3aa   : > { %1595 = vmatprep.subr.bf16.mxu0 %v4456_v36  ;;  %v4477_v52 = vld [vmem:[#allocation11 + $0x94] ss:$8 sps:$4 sm:$0xff]   ;;  %v4479_v53 = vld [vmem:[#allocation11 + $0x90] ss:$8 sps:$4 sm:$0xff]   ;;  %v4480_v54 = vld [vmem:[#allocation11 + $0xa4] ss:$8 sps:$4 sm:$0xff]   ;;  %4031 = vmatprep.mubr.msk.bf16.mxu1 %vm5457_vm0, %v5456_v4 }
 0x3ab   : > { %1623 = vmatprep.mubr.bf16.mxu0 %v1386_v48  ;;  %v4482_v55 = vld [vmem:[#allocation11 + $0xa0] ss:$8 sps:$4 sm:$0xff]   ;;  %v4483_v56 = vld [vmem:[#allocation11 + $0xb4] ss:$8 sps:$4 sm:$0xff]   ;;  %v4485_v57 = vld [vmem:[#allocation11 + $0xb0] ss:$8 sps:$4 sm:$0xff]  }
 0x3ac   : > { %v4486_v58 = vld [vmem:[#allocation11 + $0xc4] ss:$8 sps:$4 sm:$0xff]   ;;  %v4488_v59 = vld [vmem:[#allocation11 + $0xc0] ss:$8 sps:$4 sm:$0xff]   ;;  %v4489_v60 = vld [vmem:[#allocation11 + $0xd4] ss:$8 sps:$4 sm:$0xff]  }
 0x3ad   : > { %1596 = vmatpush1.bf16.msra.mxu0 %v4458_v37  ;;  %v4491_v61 = vld [vmem:[#allocation11 + $0xd0] ss:$8 sps:$4 sm:$0xff]   ;;  %v4492_v62 = vld [vmem:[#allocation11 + $0xe4] ss:$8 sps:$4 sm:$0xff]   ;;  %v4494_v63 = vld [vmem:[#allocation11 + $0xe0] ss:$8 sps:$4 sm:$0xff]  }
 0x3ae   : > { %1597 = vmatprep.subr.bf16.mxu0 %v4459_v38  ;;  %v4495_v0 = vld [vmem:[#allocation11 + $0xf4] ss:$8 sps:$4 sm:$0xff]   ;;  %v4497_v1 = vld [vmem:[#allocation11 + $0xf0] ss:$8 sps:$4 sm:$0xff]   ;;  %v6186_v8 = vsub.s32 0, %v6183_v7  ;;  %v6189_v10 = vsub.s32 1, %v6183_v7 }
 0x3af   : > { %v1639_v5 = vld [vmem:[#allocation2] sm:$0xf]  ;;  %v1419_v9 = vld [vmem:[#allocation12] sm:$0x3]  ;;  %v1641_v33 = vld [vmem:[#allocation3] sm:$0xf] }
 0x3b0   : > { %4030 = vmatpush3.bf16.xpose.msra.mxu1 %v1639_v5  ;;  %v1424_v11 = vrot.slane %v1419_v9, %v6186_v8  ;;  %v1428_v12 = vrot.slane %v1419_v9, %v6189_v10  ;;  %v1640_v20 = vld [vmem:[#allocation2 + $0x8] sm:$0xf]  ;;  %vm1757_vm2 = vcmask 1043456   ;;  %s6534_s9 = sld [smem:[#allocation54_spill]]  ;;  %s6535_s10 = sld [smem:[#allocation55_spill]] }
 0x3b1   : > { %1598 = vmatpush1.bf16.msra.mxu0 %v4461_v39  ;;  %4035 = vmatprep.subr.bf16.mxu1 %v5456_v4  ;;  %v1759_v34 = vsel %vm1757_vm2, %v1641_v33, 0  ;;  %s3420_s4 = sshll.u32 %s6160_s28, 4  ;;  %s6537_s19 = sld [smem:[#allocation79_spill]]  ;;  %s6317_s4 = int_to_ptr.vmem [resolvable:$true] %s3420_s4 }
 0x3b2   : > { %1599 = vmatprep.subr.bf16.mxu0 %v4462_v40  ;;  %s3404_s29 = scalar_lea.sflag [#allocation8], %s738_s25  ;;  %s5270_s23 = scalar_lea.vmem %s6317_s4, 256 }
 0x3b3   : > { %p5271_p1 = scmp.ne.s32.totalorder %s6317_s4, %s5270_s23  ;;  %p6539_p11 = scmp.ne.s32.totalorder %s6503_s21, 0 }
 0x3b4   : > { %s5458_s20 = smov [#allocation35]  }
 0x3b5   : > { %1600 = vmatpush1.bf16.msra.mxu0 %v4464_v41  ;;  %v1642_v41 = vld [vmem:[#allocation3 + $0x8] sm:$0xf]  ;;  %p5272_p5 = pnand %p5271_p1, %p6539_p11  ;;  %s5274_s18 = sshll.u32 %s5458_s20, 4  ;;  %s5275_s18 = int_to_ptr.vmem [resolvable:$false] %s5274_s18 }
 0x3b6   : > { %1601 = vmatprep.subr.bf16.mxu0 %v4465_v42  ;;  %s3995_s11 = sshll.u32 %s6534_s9, 1  ;;  %s3996_s12 = sshll.u32 %s6535_s10, 2 }
 0x3b7   : > { %s3416_s13 = sadd.s32 %s3996_s12, %s3995_s11  ;;  %s6538_s5 = smov %s6537_s19 }
 0x3b8   : > { %s3997_s16 = sshll.u32 %s3416_s13, 7  ;;  %p5273_p12 = pneg %p5272_p5 }
 0x3b9   : > { %1602 = vmatpush1.bf16.msra.mxu0 %v4467_v43  ;;  %s6315_s2 = scalar_lea.hbm %s6537_s19, %s3997_s16  ;;  %s5276_s14 = scalar_lea.vmem %s5275_s18, 512 }
 0x3ba   : > { %1603 = vmatprep.subr.bf16.mxu0 %v4468_v44  ;;  %v1805_v44 = vsel %vm1757_vm2, %v1642_v41, 0  ;;  %p5277_p9 = scmp.lt.s32.totalorder %s6317_s4, %s5275_s18  ;;  %p5278_p10 = scmp.lt.s32.totalorder %s5276_s14, %s5270_s23 }
 0x3bc   : > { %p5279_p7 = por %p5278_p10, %p5277_p9 }
 0x3bd   : > { %1604 = vmatpush1.bf16.msra.mxu0 %v4470_v45  ;;  %v1849_v45 = vld [vmem:[#allocation2] sm:$0xf0] }
 0x3be   : > { %1605 = vmatprep.subr.bf16.mxu0 %v4471_v47  ;;  %p5280_p6 = pnand %p5279_p7, %p5273_p12 }
 0x3c1   : > { %1606 = vmatpush1.bf16.msra.mxu0 %v4473_v49 }
 0x3c2   : > { %1607 = vmatprep.subr.bf16.mxu0 %v4474_v50  ;;  %v1854_v50 = vrot.slane %v1849_v45, 4 }
 0x3c5   : > { %1608 = vmatpush1.bf16.msra.mxu0 %v4476_v51  ;;  %v1850_v51 = vld [vmem:[#allocation2 + $0x8] sm:$0xf0] }
 0x3c6   : > { %1609 = vmatprep.subr.bf16.mxu0 %v4477_v52  ;;  %v1897_v52 = vrot.slane %v1850_v51, 4 }
 0x3c9   : > { %1610 = vmatpush1.bf16.msra.mxu0 %v4479_v53 }
 0x3ca   : > { %1611 = vmatprep.subr.bf16.mxu0 %v4480_v54 }
 0x3cd   : > { %1612 = vmatpush1.bf16.msra.mxu0 %v4482_v55 }
 0x3ce   : > { %1613 = vmatprep.subr.bf16.mxu0 %v4483_v56 }
 0x3d1   : > { %1614 = vmatpush1.bf16.msra.mxu0 %v4485_v57 }
 0x3d2   : > { %1615 = vmatprep.subr.bf16.mxu0 %v4486_v58 }
 0x3d5   : > { %1616 = vmatpush1.bf16.msra.mxu0 %v4488_v59 }
 0x3d6   : > { %1617 = vmatprep.subr.bf16.mxu0 %v4489_v60 }
 0x3d9   : > { %1618 = vmatpush1.bf16.msra.mxu0 %v4491_v61 }
 0x3da   : > { %1619 = vmatprep.subr.bf16.mxu0 %v4492_v62 }
 0x3dd   : > { %1620 = vmatpush1.bf16.msra.mxu0 %v4494_v63 }
 0x3de   : > { %1621 = vmatprep.subr.bf16.mxu0 %v4495_v0 }
 0x3e1   : > { %1622 = vmatpush1.bf16.msra.mxu0 %v4497_v1 }
 0x3e4   : > { %1624 = vmatmul.mubr.bf16.vlgmr.msra.gmra.mrb[0].mxu0 %v1385_v3 }
 0x4b7   : > { %v1625_v13 = vpop.f32.mrb[0].mxu0 }
 0x4b8   : > { %v1626_v14 = vadd.f32 %v1625_v13, %v1424_v11  ;;  %v1627_v15 = vpop.f32.mrb[1].mxu0  ;;  %v1851_v13 = vld [vmem:[#allocation3] sm:$0xf0] }
 0x4b9   : > { %v1628_v16 = vadd.f32 %v1627_v15, %v1428_v12  ;;  %v1629_v17 = vpop.f32.mrb[2].mxu0 }
 0x4ba   : > { %v1630_v18 = vpop.f32.mrb[3].mxu0 }
 0x4bb   : > { %v4004_v19 = vpack.c.bf16 %v1628_v16, %v1626_v14  ;;  %v1974_v14 = vrot.slane %v1851_v13, 4  ;;  %v4528_v13 = vld [vmem:[#allocation20 + $0xa0] ss:$8 sps:$4 sm:$0xff]  }
 0x4bd   : > { %4005 = vst [vmem:[#allocation4] sm:$0xff] %v4004_v19   ;;  %v1979_v15 = vsel %vm1757_vm2, %v1974_v14, 0  ;;  %v4533_v14 = vld [vmem:[#allocation20 + $0xb4] ss:$8 sps:$4 sm:$0xff]  }
 0x4c4   : > { %v1637_v21 = vld [vmem:[#allocation4] sm:$0xf]  ;;  %v1638_v22 = vld [vmem:[#allocation4 + $0x4] sm:$0xf] }
 0x4c5   : > { %4032 = vmatmul.mubr.bf16.vlgmr.msra.gmra.mrb[0].mxu1 %v1637_v21 }
 0x4c6   : > { %4036 = vmatpush3.bf16.xpose.msra.mxu1 %v1640_v20  ;;  %4037 = vmatprep.mubr.msk.bf16.mxu1 %vm5457_vm0, %v5456_v4 }
 0x4c7   : > { %4041 = vmatprep.subr.bf16.mxu1 %v5456_v4 }
 0x4cd   : > { %4038 = vmatmul.mubr.bf16.vlgmr.msra.gmra.mrb[4].mxu1 %v1638_v22 }
 0x4ce   : > { %4043 = vmatprep.mubr.msk.bf16.mxu1 %vm5457_vm0, %v5456_v4  ;;  %4042 = vmatpush3.bf16.msra.mxu1 %v1759_v34 }
 0x4cf   : > { %4047 = vmatprep.subr.bf16.mxu1 %v5456_v4 }
 0x598   : > { %v1677_v23 = vpop.f32.mrb[0].mxu1 }
 0x599   : > { %v4033_v24 = vpop.f32.mrb[1].mxu1  ;;  %v1724_v25 = vsel %vm1723_vm1, %v1677_v23, -inf }
 0x59a   : > { %1725 = vmax.xlane.f32.xlu0 %v1724_v25  ;;  %v1680_v26 = vpop.f32.mrb[2].mxu1 }
 0x59b   : > { %v4034_v27 = vpop.f32.mrb[3].mxu1 }
 0x5a0   : > { %v1717_v28 = vpop.f32.mrb[4].mxu1 }
 0x5a1   : > { %v4039_v29 = vpop.f32.mrb[5].mxu1  ;;  %v1727_v30 = vsel %vm1723_vm1, %v1717_v28, -inf }
 0x5a2   : > { %1728 = vmax.xlane.f32.xlu0 %v1727_v30  ;;  %v1720_v31 = vpop.f32.mrb[6].mxu1 }
 0x5a3   : > { %v4040_v32 = vpop.f32.mrb[7].mxu1  ;;  %v1852_v31 = vld [vmem:[#allocation3 + $0x8] sm:$0xf0] }
 0x627   : > { %v6202_v35 = vpop.xlane.xlu0 %1725 }
 0x628   : > { %v1736_v36 = vsub.f32 %v1677_v23, %v6202_v35  ;;  %v1730_v16 = vsub.f32 -inf, %v6202_v35 }
 0x62a   : > { %v1738_v37 = vmul.f32 1.442695, %v1736_v36  ;;  %v1732_v17 = vmul.f32 1.442695, %v1730_v16  ;;  %v4536_v16 = vld [vmem:[#allocation20 + $0xc4] ss:$8 sps:$4 sm:$0xff]  }
 0x62c   : > { %4738 = vpow2.f32 %v1738_v37 }
 0x62f   : > { %v6205_v38 = vpop.xlane.xlu0 %1728 }
 0x630   : > { %v1737_v39 = vsub.f32 %v1717_v28, %v6205_v38  ;;  %v1731_v19 = vsub.f32 -inf, %v6205_v38 }
 0x632   : > { %v1740_v40 = vmul.f32 1.442695, %v1737_v39  ;;  %v1734_v23 = vmul.f32 1.442695, %v1731_v19  ;;  %v4537_v19 = vld [vmem:[#allocation20 + $0xd0] ss:$8 sps:$4 sm:$0xff]  }
 0x634   : > { %4740 = vpow2.f32 %v1740_v40 }
 0x635   : > { %4742 = vpow2.f32 %v1732_v17  ;;  %v4534_v17 = vld [vmem:[#allocation20 + $0xc0] ss:$8 sps:$4 sm:$0xff]  }
 0x636   : > { %v4739_v42 = vpop.eup %4738 }
 0x637   : > { %v1752_v43 = vpack.c.bf16 %v4739_v42, %v4739_v42  ;;  %v1744_v12 = vsel %vm1723_vm1, %v4739_v42, 0.0 }
 0x639   : > { %4044 = vmatmul.mubr.msk.bf16.vlgmr.msra.gmra.mrb[8].mxu1 %vm1723_vm1, %v1752_v43 }
 0x63a   : > { %4048 = vmatpush3.bf16.msra.mxu1 %v1805_v44  ;;  %4049 = vmatprep.mubr.msk.bf16.mxu1 %vm5457_vm0, %v5456_v4 }
 0x63b   : > { %4053 = vmatprep.subr.bf16.mxu1 %v5456_v4 }
 0x63e   : > { %v4741_v47 = vpop.eup %4740 }
 0x63f   : > { %v1747_v48 = vsel %vm1723_vm1, %v4741_v47, 0.0  ;;  %v1753_v49 = vpack.c.bf16 %v4741_v47, %v4741_v47  ;;  %v4743_v28 = vpop.eup %4742 }
 0x640   : > { %1748 = vadd.xlane.f32.xlu0 %v1747_v48  ;;  %v6234_v34 = vmul.f32 0.0, %v4743_v28 }
 0x641   : > { %4050 = vmatmul.mubr.msk.bf16.vlgmr.msra.gmra.mrb[12].mxu1 %vm1723_vm1, %v1753_v49 }
 0x642   : > { %4055 = vmatprep.mubr.msk.bf16.mxu1 %vm5457_vm0, %v5456_v4 }
 0x643   : > { %4054 = vmatpush3.bf16.xpose.msra.mxu1 %v1854_v50 }
 0x644   : > { %4059 = vmatprep.subr.bf16.mxu1 %v5456_v4 }
 0x64a   : > { %4056 = vmatmul.mubr.bf16.vlgmr.msra.gmra.mrb[16].mxu1 %v1637_v21 }
 0x64b   : > { %4060 = vmatpush3.bf16.xpose.msra.mxu1 %v1897_v52  ;;  %4061 = vmatprep.mubr.msk.bf16.mxu1 %vm5457_vm0, %v5456_v4  ;;  %v4498_v52 = vld [vmem:[#allocation20] ss:$8 sps:$4 sm:$0xff]  }
 0x64c   : > { %4065 = vmatprep.subr.bf16.mxu1 %v5456_v4 }
 0x652   : > { %4062 = vmatmul.mubr.bf16.vlgmr.msra.gmra.mrb[20].mxu1 %v1638_v22 }
 0x653   : > { %4067 = vmatprep.mubr.msk.bf16.mxu1 %vm5457_vm0, %v5456_v4  ;;  %4066 = vmatpush3.bf16.msra.mxu1 %v1979_v15  ;;  %v4531_v15 = vld [vmem:[#allocation20 + $0xb0] ss:$8 sps:$4 sm:$0xff]  }
 0x654   : > { %4071 = vmatprep.subr.bf16.mxu1 %v5456_v4 }
 0x70c   : > { %v1795_v53 = vpop.f32.mrb[8].mxu1 }
 0x70d   : > { %v4045_v54 = vpop.f32.mrb[9].mxu1  ;;  %v1847_v36 = vadd.f32 %v1795_v53, %v6234_v34  ;;  %v4500_v53 = vld [vmem:[#allocation20 + $0x4] ss:$8 sps:$4 sm:$0xff]  }
 0x70e   : > { %v1798_v55 = vpop.f32.mrb[10].mxu1  ;;  %v4503_v54 = vld [vmem:[#allocation20 + $0x14] ss:$8 sps:$4 sm:$0xff]   ;;  %2291 = vmatprep.subr.bf16.mxu0 %v4500_v53  ;;  %v2112_v53 = vld [vmem:[#allocation21] sm:$0x3] }
 0x70f   : > { %v4046_v56 = vpop.f32.mrb[11].mxu1  ;;  %2292 = vmatpush1.bf16.msra.mxu0 %v4498_v52  ;;  %v4506_v55 = vld [vmem:[#allocation20 + $0x24] ss:$8 sps:$4 sm:$0xff]  }
 0x710   : > { %2293 = vmatprep.subr.bf16.mxu0 %v4503_v54  ;;  %v4504_v56 = vld [vmem:[#allocation20 + $0x20] ss:$8 sps:$4 sm:$0xff]   ;;  %v2121_v54 = vrot.slane %v2112_v53, %v6189_v10 }
 0x714   : > { %v1841_v57 = vpop.f32.mrb[12].mxu1 }
 0x715   : > { %v4051_v58 = vpop.f32.mrb[13].mxu1 }
 0x716   : > { %v1844_v59 = vpop.f32.mrb[14].mxu1  ;;  %v4507_v58 = vld [vmem:[#allocation20 + $0x30] ss:$8 sps:$4 sm:$0xff]  }
 0x717   : > { %v4052_v60 = vpop.f32.mrb[15].mxu1  ;;  %v4512_v59 = vld [vmem:[#allocation20 + $0x44] ss:$8 sps:$4 sm:$0xff]  }
 0x718   : > { %v4510_v60 = vld [vmem:[#allocation20 + $0x40] ss:$8 sps:$4 sm:$0xff]  }
 0x71d   : > { %v1890_v61 = vpop.f32.mrb[16].mxu1 }
 0x71e   : > { %v4057_v62 = vpop.f32.mrb[17].mxu1  ;;  %v1939_v63 = vsel %vm1723_vm1, %v1890_v61, -inf }
 0x71f   : > { %1940 = vmax.xlane.f32.xlu1 %v1939_v63  ;;  %v1893_v0 = vpop.f32.mrb[18].mxu1  ;;  %v4513_v62 = vld [vmem:[#allocation20 + $0x50] ss:$8 sps:$4 sm:$0xff]   ;;  %v4518_v63 = vld [vmem:[#allocation20 + $0x64] ss:$8 sps:$4 sm:$0xff]  }
 0x720   : > { %v4058_v1 = vpop.f32.mrb[19].mxu1  ;;  %v4516_v0 = vld [vmem:[#allocation20 + $0x60] ss:$8 sps:$4 sm:$0xff]  }
 0x721   : > { %v4521_v1 = vld [vmem:[#allocation20 + $0x74] ss:$8 sps:$4 sm:$0xff]  }
 0x725   : > { %v1933_v3 = vpop.f32.mrb[20].mxu1 }
 0x726   : > { %v4063_v5 = vpop.f32.mrb[21].mxu1  ;;  %v1942_v6 = vsel %vm1723_vm1, %v1933_v3, -inf }
 0x727   : > { %1943 = vmax.xlane.f32.xlu1 %v1942_v6  ;;  %v1936_v9 = vpop.f32.mrb[22].mxu1  ;;  %v4524_v5 = vld [vmem:[#allocation20 + $0x84] ss:$8 sps:$4 sm:$0xff]   ;;  %v4522_v6 = vld [vmem:[#allocation20 + $0x80] ss:$8 sps:$4 sm:$0xff]  }
 0x728   : > { %v4064_v11 = vpop.f32.mrb[23].mxu1  ;;  %v4527_v9 = vld [vmem:[#allocation20 + $0x94] ss:$8 sps:$4 sm:$0xff]  }
 0x729   : > { %v4525_v11 = vld [vmem:[#allocation20 + $0x90] ss:$8 sps:$4 sm:$0xff]  }
 0x72b   : > { %1745 = vadd.xlane.f32.xlu1 %v1744_v12  ;;  %v4530_v12 = vld [vmem:[#allocation20 + $0xa4] ss:$8 sps:$4 sm:$0xff]  }
 0x7ac   : > { %v1941_v18 = vpop.xlane.xlu1 %1940 }
 0x7ad   : > { %v1945_v20 = vmax.f32 %v6202_v35, %v1941_v18  ;;  %v4539_v18 = vld [vmem:[#allocation20 + $0xd4] ss:$8 sps:$4 sm:$0xff]  }
 0x7af   : > { %v1947_v21 = vsub.f32 %v6202_v35, %v1945_v20  ;;  %v1953_v22 = vsub.f32 %v1890_v61, %v1945_v20  ;;  %v2022_v35 = vrot.slane %v1852_v31, 4  ;;  %v4515_v61 = vld [vmem:[#allocation20 + $0x54] ss:$8 sps:$4 sm:$0xff]   ;;  %v4542_v20 = vld [vmem:[#allocation20 + $0xe4] ss:$8 sps:$4 sm:$0xff]  }
 0x7b1   : > { %v1949_v24 = vmul.f32 1.442695, %v1947_v21  ;;  %v1955_v25 = vmul.f32 1.442695, %v1953_v22  ;;  %v2027_v43 = vsel %vm1757_vm2, %v2022_v35, 0 }
 0x7b2   : > { %v4540_v21 = vld [vmem:[#allocation20 + $0xe0] ss:$8 sps:$4 sm:$0xff]   ;;  %v4545_v22 = vld [vmem:[#allocation20 + $0xf4] ss:$8 sps:$4 sm:$0xff]  }
 0x7b3   : > { %4744 = vpow2.f32 %v1949_v24 }
 0x7b4   : > { %4746 = vpow2.f32 %v1955_v25  ;;  %v1944_v26 = vpop.xlane.xlu1 %1943 }
 0x7b5   : > { %4748 = vpow2.f32 %v1734_v23  ;;  %v1946_v27 = vmax.f32 %v6205_v38, %v1944_v26  ;;  %v4543_v23 = vld [vmem:[#allocation20 + $0xf0] ss:$8 sps:$4 sm:$0xff]  }
 0x7b7   : > { %v1948_v29 = vsub.f32 %v6205_v38, %v1946_v27  ;;  %v1954_v30 = vsub.f32 %v1933_v3, %v1946_v27  ;;  %v4519_v3 = vld [vmem:[#allocation20 + $0x70] ss:$8 sps:$4 sm:$0xff]  }
 0x7b8   : > { %v1746_v24 = vpop.xlane.xlu1 %1745 }
 0x7b9   : > { %v1951_v32 = vmul.f32 1.442695, %v1948_v29  ;;  %v1957_v33 = vmul.f32 1.442695, %v1954_v30  ;;  %v1750_v25 = vadd.f32 %v1746_v24, %v6234_v34  ;;  %v1749_v29 = vpop.xlane.xlu0 %1748  ;;  %v4579_v24 = vld [vmem:[#allocation26 + $0xa8] ss:$16 sps:$4 sm:$0xff]  }
 0x7bb   : > { %4750 = vpow2.f32 %v1951_v32 }
 0x7bc   : > { %4752 = vpow2.f32 %v1957_v33 }
 0x7bd   : > { %v6237_v37 = vpop.eup %4744 }
 0x7be   : > { %v4747_v39 = vpop.eup %4746  ;;  %v6240_v40 = vmul.f32 %v6237_v37, %v1847_v36  ;;  %v1959_v27 = vmul.f32 %v6237_v37, %v1750_v25  ;;  %v4584_v25 = vld [vmem:[#allocation26 + $0xc4] ss:$16 sps:$4 sm:$0xff]  }
 0x7bf   : > { %v4749_v41 = vpop.eup %4748  ;;  %v1961_v38 = vsel %vm1723_vm1, %v4747_v39, 0.0  ;;  %v1971_v42 = vpack.c.bf16 %v4747_v39, %v4747_v39 }
 0x7c0   : > { %1962 = vadd.xlane.f32.xlu1 %v1961_v38  ;;  %v6245_v44 = vmul.f32 0.0, %v4749_v41 }
 0x7c1   : > { %4068 = vmatmul.mubr.msk.bf16.vlgmr.msra.gmra.mrb[24].mxu1 %vm1723_vm1, %v1971_v42 }
 0x7c2   : > { %4072 = vmatpush3.bf16.msra.mxu1 %v2027_v43  ;;  %4073 = vmatprep.mubr.msk.bf16.mxu1 %vm5457_vm0, %v5456_v4  ;;  %v1848_v45 = vadd.f32 %v1841_v57, %v6245_v44  ;;  %v4501_v4 = vld [vmem:[#allocation20 + $0x10] ss:$8 sps:$4 sm:$0xff]   ;;  %v4509_v57 = vld [vmem:[#allocation20 + $0x34] ss:$8 sps:$4 sm:$0xff]   ;;  %v1751_v30 = vadd.f32 %v1749_v29, %v6245_v44 }
 0x7c3   : > { %2294 = vmatpush1.bf16.msra.mxu0 %v4501_v4  ;;  %v4590_v29 = vld [vmem:[#allocation26 + $0xe4] ss:$16 sps:$4 sm:$0xff]  }
 0x7c4   : > { %2295 = vmatprep.subr.bf16.mxu0 %v4506_v55 }
 0x7c5   : > { %v6250_v47 = vpop.eup %4750 }
 0x7c6   : > { %v4753_v48 = vpop.eup %4752  ;;  %v6253_v49 = vmul.f32 %v6250_v47, %v1848_v45  ;;  %v1960_v32 = vmul.f32 %v6250_v47, %v1751_v30  ;;  %v4593_v30 = vld [vmem:[#allocation26 + $0xec] ss:$16 sps:$4 sm:$0xff]  }
 0x7c7   : > { %v1964_v50 = vsel %vm1723_vm1, %v4753_v48, 0.0  ;;  %v1972_v51 = vpack.c.bf16 %v4753_v48, %v4753_v48  ;;  %2296 = vmatpush1.bf16.msra.mxu0 %v4504_v56 }
 0x7c8   : > { %1965 = vadd.xlane.f32.xlu0 %v1964_v50  ;;  %2297 = vmatprep.subr.bf16.mxu0 %v4509_v57 }
 0x7c9   : > { %4074 = vmatmul.mubr.msk.bf16.vlgmr.msra.gmra.mrb[28].mxu1 %vm1723_vm1, %v1972_v51 }
 0x7cb   : > { %2298 = vmatpush1.bf16.msra.mxu0 %v4507_v58 }
 0x7cc   : > { %2299 = vmatprep.subr.bf16.mxu0 %v4512_v59 }
 0x7cf   : > { %2300 = vmatpush1.bf16.msra.mxu0 %v4510_v60 }
 0x7d0   : > { %2301 = vmatprep.subr.bf16.mxu0 %v4515_v61 }
 0x7d3   : > { %2302 = vmatpush1.bf16.msra.mxu0 %v4513_v62  ;;  %v4546_v62 = vld [vmem:[#allocation26] ss:$16 sps:$4 sm:$0xff]  }
 0x7d4   : > { %2303 = vmatprep.subr.bf16.mxu0 %v4518_v63  ;;  %v4548_v63 = vld [vmem:[#allocation26 + $0x4] ss:$16 sps:$4 sm:$0xff]  }
 0x7d5   : > { %2787 = vmatprep.subr.bf16.mxu1 %v4548_v63  ;;  %v4627_v63 = vld [vmem:[#allocation26 + $0x1a8] ss:$16 sps:$4 sm:$0xff]  }
 0x7d6   : > { %2788 = vmatpush1.bf16.msra.mxu1 %v4546_v62  ;;  %v4624_v62 = vld [vmem:[#allocation26 + $0x1a0] ss:$16 sps:$4 sm:$0xff]  }
 0x7d7   : > { %2304 = vmatpush1.bf16.msra.mxu0 %v4516_v0  ;;  %v4549_v0 = vld [vmem:[#allocation26 + $0x8] ss:$16 sps:$4 sm:$0xff]  }
 0x7d8   : > { %2305 = vmatprep.subr.bf16.mxu0 %v4521_v1  ;;  %v4551_v1 = vld [vmem:[#allocation26 + $0xc] ss:$16 sps:$4 sm:$0xff]  }
 0x7db   : > { %2306 = vmatpush1.bf16.msra.mxu0 %v4519_v3  ;;  %v4554_v3 = vld [vmem:[#allocation26 + $0x24] ss:$16 sps:$4 sm:$0xff]  }
 0x7dc   : > { %2307 = vmatprep.subr.bf16.mxu0 %v4524_v5  ;;  %v4557_v5 = vld [vmem:[#allocation26 + $0x2c] ss:$16 sps:$4 sm:$0xff]   ;;  %2789 = vmatprep.subr.bf16.mxu1 %v4554_v3  ;;  %v4630_v3 = vld [vmem:[#allocation26 + $0x1c0] ss:$16 sps:$4 sm:$0xff]  }
 0x7df   : > { %2308 = vmatpush1.bf16.msra.mxu0 %v4522_v6  ;;  %v4552_v6 = vld [vmem:[#allocation26 + $0x20] ss:$16 sps:$4 sm:$0xff]  }
 0x7e0   : > { %2309 = vmatprep.subr.bf16.mxu0 %v4527_v9  ;;  %v4560_v9 = vld [vmem:[#allocation26 + $0x44] ss:$16 sps:$4 sm:$0xff]   ;;  %2790 = vmatpush1.bf16.msra.mxu1 %v4552_v6 }
 0x7e1   : > { %2791 = vmatprep.subr.bf16.mxu1 %v4560_v9  ;;  %v4638_v6 = vld [vmem:[#allocation26 + $0x1e4] ss:$16 sps:$4 sm:$0xff]   ;;  %v4636_v9 = vld [vmem:[#allocation26 + $0x1e0] ss:$16 sps:$4 sm:$0xff]  }
 0x7e3   : > { %2310 = vmatpush1.bf16.msra.mxu0 %v4525_v11  ;;  %v4558_v11 = vld [vmem:[#allocation26 + $0x40] ss:$16 sps:$4 sm:$0xff]  }
 0x7e4   : > { %2311 = vmatprep.subr.bf16.mxu0 %v4530_v12  ;;  %v4561_v12 = vld [vmem:[#allocation26 + $0x48] ss:$16 sps:$4 sm:$0xff]   ;;  %2792 = vmatpush1.bf16.msra.mxu1 %v4558_v11 }
 0x7e5   : > { %v4644_v11 = vld [vmem:[#allocation29 + $0x4] ss:$8 sps:$4 sm:$0xff]  }
 0x7e7   : > { %2312 = vmatpush1.bf16.msra.mxu0 %v4528_v13  ;;  %v4566_v13 = vld [vmem:[#allocation26 + $0x64] ss:$16 sps:$4 sm:$0xff]  }
 0x7e8   : > { %2313 = vmatprep.subr.bf16.mxu0 %v4533_v14  ;;  %v4569_v14 = vld [vmem:[#allocation26 + $0x6c] ss:$16 sps:$4 sm:$0xff]   ;;  %2793 = vmatprep.subr.bf16.mxu1 %v4566_v13 }
 0x7eb   : > { %2314 = vmatpush1.bf16.msra.mxu0 %v4531_v15  ;;  %v4564_v15 = vld [vmem:[#allocation26 + $0x60] ss:$16 sps:$4 sm:$0xff]  }
 0x7ec   : > { %2315 = vmatprep.subr.bf16.mxu0 %v4536_v16  ;;  %v4567_v16 = vld [vmem:[#allocation26 + $0x68] ss:$16 sps:$4 sm:$0xff]   ;;  %2794 = vmatpush1.bf16.msra.mxu1 %v4564_v15 }
 0x7ef   : > { %2316 = vmatpush1.bf16.msra.mxu0 %v4534_v17  ;;  %v4572_v17 = vld [vmem:[#allocation26 + $0x84] ss:$16 sps:$4 sm:$0xff]  }
 0x7f0   : > { %2317 = vmatprep.subr.bf16.mxu0 %v4539_v18  ;;  %v4575_v18 = vld [vmem:[#allocation26 + $0x8c] ss:$16 sps:$4 sm:$0xff]   ;;  %2795 = vmatprep.subr.bf16.mxu1 %v4572_v17 }
 0x7f1   : > { %v2365_v17 = vld [vmem:[#allocation24] sm:$0x3] }
 0x7f3   : > { %2318 = vmatpush1.bf16.msra.mxu0 %v4537_v19  ;;  %v4570_v19 = vld [vmem:[#allocation26 + $0x80] ss:$16 sps:$4 sm:$0xff]  }
 0x7f4   : > { %2319 = vmatprep.subr.bf16.mxu0 %v4542_v20  ;;  %v4573_v20 = vld [vmem:[#allocation26 + $0x88] ss:$16 sps:$4 sm:$0xff]   ;;  %2796 = vmatpush1.bf16.msra.mxu1 %v4570_v19 }
 0x7f7   : > { %2320 = vmatpush1.bf16.msra.mxu0 %v4540_v21  ;;  %v4578_v21 = vld [vmem:[#allocation26 + $0xa4] ss:$16 sps:$4 sm:$0xff]  }
 0x7f8   : > { %2321 = vmatprep.subr.bf16.mxu0 %v4545_v22  ;;  %v4581_v22 = vld [vmem:[#allocation26 + $0xac] ss:$16 sps:$4 sm:$0xff]   ;;  %2797 = vmatprep.subr.bf16.mxu1 %v4578_v21 }
 0x7fb   : > { %2322 = vmatpush1.bf16.msra.mxu0 %v4543_v23  ;;  %v4576_v23 = vld [vmem:[#allocation26 + $0xa0] ss:$16 sps:$4 sm:$0xff]  }
 0x7fc   : > { %2828 = vmatprep.subr.bf16.mxu0 %v4551_v1  ;;  %2798 = vmatpush1.bf16.msra.mxu1 %v4576_v23  ;;  %v4635_v1 = vld [vmem:[#allocation26 + $0x1cc] ss:$16 sps:$4 sm:$0xff]   ;;  %v2370_v23 = vrot.slane %v2365_v17, %v6186_v8 }
 0x7fd   : > { %2799 = vmatprep.subr.bf16.mxu1 %v4584_v25 }
 0x84d   : > { %v1963_v26 = vpop.xlane.xlu1 %1962 }
 0x84e   : > { %v1967_v28 = vadd.f32 %v1963_v26, %v1959_v27  ;;  %v4587_v26 = vld [vmem:[#allocation26 + $0xcc] ss:$16 sps:$4 sm:$0xff]   ;;  %v4582_v27 = vld [vmem:[#allocation26 + $0xc0] ss:$16 sps:$4 sm:$0xff]  }
 0x84f   : > { %2800 = vmatpush1.bf16.msra.mxu1 %v4582_v27 }
 0x850   : > { %4754 = vrcp.f32 %v1967_v28  ;;  %v4585_v28 = vld [vmem:[#allocation26 + $0xc8] ss:$16 sps:$4 sm:$0xff]   ;;  %2801 = vmatprep.subr.bf16.mxu1 %v4590_v29 }
 0x855   : > { %v1966_v31 = vpop.xlane.xlu0 %1965 }
 0x856   : > { %v1968_v33 = vadd.f32 %v1966_v31, %v1960_v32  ;;  %v4588_v31 = vld [vmem:[#allocation26 + $0xe0] ss:$16 sps:$4 sm:$0xff]   ;;  %v4591_v32 = vld [vmem:[#allocation26 + $0xe8] ss:$16 sps:$4 sm:$0xff]  }
 0x857   : > { %2802 = vmatpush1.bf16.msra.mxu1 %v4588_v31  ;;  %v4642_v31 = vld [vmem:[#allocation29] ss:$8 sps:$4 sm:$0xff]  }
 0x858   : > { %4756 = vrcp.f32 %v1968_v33  ;;  %v4596_v33 = vld [vmem:[#allocation26 + $0x104] ss:$16 sps:$4 sm:$0xff]  }
 0x859   : > { %2803 = vmatprep.subr.bf16.mxu1 %v4596_v33  ;;  %v4650_v33 = vld [vmem:[#allocation29 + $0x14] ss:$8 sps:$4 sm:$0xff]  }
 0x85a   : > { %v4755_v41 = vpop.eup %4754 }
 0x862   : > { %v4757_v48 = vpop.eup %4756 }
 0x894   : > { %v2015_v35 = vpop.f32.mrb[24].mxu1 }
 0x895   : > { %v2069_v36 = vadd.f32 %v2015_v35, %v6240_v40  ;;  %v4069_v39 = vpop.f32.mrb[25].mxu1  ;;  %v2117_v40 = vrot.slane %v2112_v53, %v6186_v8  ;;  %v4599_v35 = vld [vmem:[#allocation26 + $0x10c] ss:$16 sps:$4 sm:$0xff]   ;;  %v4606_v53 = vld [vmem:[#allocation26 + $0x140] ss:$16 sps:$4 sm:$0xff]  }
 0x896   : > { %v2018_v38 = vpop.f32.mrb[26].mxu1  ;;  %v4597_v39 = vld [vmem:[#allocation26 + $0x108] ss:$16 sps:$4 sm:$0xff]  }
 0x897   : > { %v2073_v34 = vmul.f32 %v4755_v41, %v2069_v36  ;;  %v4070_v42 = vpop.f32.mrb[27].mxu1  ;;  %v4594_v36 = vld [vmem:[#allocation26 + $0x100] ss:$16 sps:$4 sm:$0xff]   ;;  %v4602_v41 = vld [vmem:[#allocation26 + $0x124] ss:$16 sps:$4 sm:$0xff]  }
 0x898   : > { %v4605_v38 = vld [vmem:[#allocation26 + $0x12c] ss:$16 sps:$4 sm:$0xff]   ;;  %2804 = vmatpush1.bf16.msra.mxu1 %v4594_v36  ;;  %v4603_v42 = vld [vmem:[#allocation26 + $0x128] ss:$16 sps:$4 sm:$0xff]  }
 0x899   : > { %v4011_v47 = vpack.c.bf16 %v2073_v34, %v2073_v34  ;;  %v4600_v34 = vld [vmem:[#allocation26 + $0x120] ss:$16 sps:$4 sm:$0xff]   ;;  %2805 = vmatprep.subr.bf16.mxu1 %v4602_v41  ;;  %v4648_v36 = vld [vmem:[#allocation29 + $0x10] ss:$8 sps:$4 sm:$0xff]  }
 0x89a   : > { %v4656_v41 = vld [vmem:[#allocation29 + $0x24] ss:$8 sps:$4 sm:$0xff]  }
 0x89c   : > { %v2063_v43 = vpop.f32.mrb[28].mxu1  ;;  %2806 = vmatpush1.bf16.msra.mxu1 %v4600_v34  ;;  %v4654_v34 = vld [vmem:[#allocation29 + $0x20] ss:$8 sps:$4 sm:$0xff]  }
 0x89d   : > { %v2070_v37 = vadd.f32 %v2063_v43, %v6253_v49  ;;  %v4075_v45 = vpop.f32.mrb[29].mxu1 }
 0x89e   : > { %v2066_v44 = vpop.f32.mrb[30].mxu1 }
 0x89f   : > { %v2074_v50 = vmul.f32 %v4757_v48, %v2070_v37  ;;  %v4076_v51 = vpop.f32.mrb[31].mxu1 }
 0x8a1   : > { %v4012_v52 = vpack.c.bf16 %v2074_v50, %v2074_v50 }
 0x8a3   : > { %2323 = vmatprep.mubr.bf16.mxu0 %v4012_v52  ;;  %v4608_v52 = vld [vmem:[#allocation26 + $0x144] ss:$16 sps:$4 sm:$0xff]  }
 0x8a4   : > { %2324 = vmatmul.mubr.bf16.vlgmr.msra.gmra.mrb[4].mxu0 %v4011_v47  ;;  %v4611_v47 = vld [vmem:[#allocation26 + $0x14c] ss:$16 sps:$4 sm:$0xff]   ;;  %2807 = vmatprep.subr.bf16.mxu1 %v4608_v52 }
 0x8a5   : > { %2829 = vmatpush1.bf16.msra.mxu0 %v4549_v0  ;;  %2808 = vmatpush1.bf16.msra.mxu1 %v4606_v53  ;;  %v4632_v0 = vld [vmem:[#allocation26 + $0x1c4] ss:$16 sps:$4 sm:$0xff]   ;;  %v4677_v53 = vld [vmem:[#allocation29 + $0x154] ss:$8 sps:$4 sm:$0xff]  }
 0x8a6   : > { %2830 = vmatprep.subr.bf16.mxu0 %v4557_v5  ;;  %v4633_v5 = vld [vmem:[#allocation26 + $0x1c8] ss:$16 sps:$4 sm:$0xff]   ;;  %v4669_v52 = vld [vmem:[#allocation29 + $0x140] ss:$8 sps:$4 sm:$0xff]  }
 0x977   : > { %v2325_v4 = vpop.f32.mrb[4].mxu0 }
 0x978   : > { %v2326_v55 = vadd.f32 %v2325_v4, %v2117_v40  ;;  %v2327_v56 = vpop.f32.mrb[5].mxu0  ;;  %v4609_v40 = vld [vmem:[#allocation26 + $0x148] ss:$16 sps:$4 sm:$0xff]   ;;  %v4617_v4 = vld [vmem:[#allocation26 + $0x16c] ss:$16 sps:$4 sm:$0xff]  }
 0x979   : > { %v2328_v57 = vadd.f32 %v2327_v56, %v2121_v54  ;;  %v2329_v58 = vpop.f32.mrb[6].mxu0  ;;  %v4614_v54 = vld [vmem:[#allocation26 + $0x164] ss:$16 sps:$4 sm:$0xff]   ;;  %v4615_v56 = vld [vmem:[#allocation26 + $0x168] ss:$16 sps:$4 sm:$0xff]  }
 0x97a   : > { %v6266_v49 = vadd.f32 %v2326_v55, %v6175_v2  ;;  %v2330_v59 = vpop.f32.mrb[7].mxu0  ;;  %v4555_v2 = vld [vmem:[#allocation26 + $0x28] ss:$16 sps:$4 sm:$0xff]   ;;  %v4612_v55 = vld [vmem:[#allocation26 + $0x160] ss:$16 sps:$4 sm:$0xff]   ;;  %2809 = vmatprep.subr.bf16.mxu1 %v4614_v54 }
 0x97b   : > { %v6269_v60 = vadd.f32 %v2328_v57, %v6169_v46  ;;  %v4563_v46 = vld [vmem:[#allocation26 + $0x4c] ss:$16 sps:$4 sm:$0xff]   ;;  %2831 = vmatpush1.bf16.msra.mxu0 %v4555_v2  ;;  %2810 = vmatpush1.bf16.msra.mxu1 %v4612_v55  ;;  %v4620_v57 = vld [vmem:[#allocation26 + $0x184] ss:$16 sps:$4 sm:$0xff]   ;;  %v4621_v59 = vld [vmem:[#allocation26 + $0x188] ss:$16 sps:$4 sm:$0xff]  }
 0x97c   : > { %2832 = vmatprep.subr.bf16.mxu0 %v4563_v46  ;;  %v4623_v58 = vld [vmem:[#allocation26 + $0x18c] ss:$16 sps:$4 sm:$0xff]   ;;  %2811 = vmatprep.subr.bf16.mxu1 %v4620_v57  ;;  %v4639_v46 = vld [vmem:[#allocation26 + $0x1e8] ss:$16 sps:$4 sm:$0xff]  }
 0x97d   : > { %v2334_v61 = vadd.f32 %v6269_v60, %v6266_v49  ;;  %v4641_v2 = vld [vmem:[#allocation26 + $0x1ec] ss:$16 sps:$4 sm:$0xff]   ;;  %v4683_v55 = vld [vmem:[#allocation29 + $0x164] ss:$8 sps:$4 sm:$0xff]  }
 0x97e   : > { %v4675_v54 = vld [vmem:[#allocation29 + $0x150] ss:$8 sps:$4 sm:$0xff]   ;;  %v4681_v57 = vld [vmem:[#allocation29 + $0x160] ss:$8 sps:$4 sm:$0xff]  }
 0x97f   : > { %2335 = vadd.xlane.f32.xlu0 %v2334_v61  ;;  %2833 = vmatpush1.bf16.msra.mxu0 %v4561_v12  ;;  %v4629_v61 = vld [vmem:[#allocation26 + $0x1ac] ss:$16 sps:$4 sm:$0xff]   ;;  %v4647_v12 = vld [vmem:[#allocation29 + $0x104] ss:$8 sps:$4 sm:$0xff]  }
 0x980   : > { %2834 = vmatprep.subr.bf16.mxu0 %v4569_v14 }
 0x983   : > { %2835 = vmatpush1.bf16.msra.mxu0 %v4567_v16  ;;  %v2351_v16 = vld [vmem:[#allocation23] sm:$0x3] }
 0x984   : > { %2836 = vmatprep.subr.bf16.mxu0 %v4575_v18  ;;  %v2356_v18 = vrot.slane %v2351_v16, %v6186_v8  ;;  %v2360_v19 = vrot.slane %v2351_v16, %v6189_v10  ;;  %v4716_v16 = vld [vmem:[#allocation29 + $0xc4] ss:$8 sps:$4 sm:$0xff]  }
 0x987   : > { %2837 = vmatpush1.bf16.msra.mxu0 %v4573_v20 }
 0x988   : > { %2838 = vmatprep.subr.bf16.mxu0 %v4581_v22 }
 0x98b   : > { %2839 = vmatpush1.bf16.msra.mxu0 %v4579_v24  ;;  %v2374_v24 = vrot.slane %v2365_v17, %v6189_v10  ;;  %v4719_v17 = vld [vmem:[#allocation29 + $0x1c4] ss:$8 sps:$4 sm:$0xff]  }
 0x98c   : > { %2840 = vmatprep.subr.bf16.mxu0 %v4587_v26 }
 0x98f   : > { %2841 = vmatpush1.bf16.msra.mxu0 %v4585_v28 }
 0x990   : > { %2842 = vmatprep.subr.bf16.mxu0 %v4593_v30 }
 0x993   : > { %2843 = vmatpush1.bf16.msra.mxu0 %v4591_v32  ;;  %v4645_v32 = vld [vmem:[#allocation29 + $0x100] ss:$8 sps:$4 sm:$0xff]  }
 0x994   : > { %2844 = vmatprep.subr.bf16.mxu0 %v4599_v35  ;;  %v4653_v35 = vld [vmem:[#allocation29 + $0x114] ss:$8 sps:$4 sm:$0xff]  }
 0x997   : > { %2845 = vmatpush1.bf16.msra.mxu0 %v4597_v39  ;;  %v4651_v39 = vld [vmem:[#allocation29 + $0x110] ss:$8 sps:$4 sm:$0xff]  }
 0x998   : > { %2846 = vmatprep.subr.bf16.mxu0 %v4605_v38  ;;  %v4659_v38 = vld [vmem:[#allocation29 + $0x124] ss:$8 sps:$4 sm:$0xff]  }
 0x99b   : > { %2847 = vmatpush1.bf16.msra.mxu0 %v4603_v42  ;;  %v4657_v42 = vld [vmem:[#allocation29 + $0x120] ss:$8 sps:$4 sm:$0xff]  }
 0x99c   : > { %2848 = vmatprep.subr.bf16.mxu0 %v4611_v47  ;;  %v4674_v47 = vld [vmem:[#allocation29 + $0x54] ss:$8 sps:$4 sm:$0xff]  }
 0x99f   : > { %2849 = vmatpush1.bf16.msra.mxu0 %v4609_v40  ;;  %v4672_v40 = vld [vmem:[#allocation29 + $0x50] ss:$8 sps:$4 sm:$0xff]  }
 0x9a0   : > { %2850 = vmatprep.subr.bf16.mxu0 %v4617_v4  ;;  %v4680_v4 = vld [vmem:[#allocation29 + $0x64] ss:$8 sps:$4 sm:$0xff]  }
 0x9a3   : > { %2851 = vmatpush1.bf16.msra.mxu0 %v4615_v56  ;;  %v4678_v56 = vld [vmem:[#allocation29 + $0x60] ss:$8 sps:$4 sm:$0xff]  }
 0x9a4   : > { %2852 = vmatprep.subr.bf16.mxu0 %v4623_v58  ;;  %v4686_v58 = vld [vmem:[#allocation29 + $0x74] ss:$8 sps:$4 sm:$0xff]  }
 0x9a7   : > { %2853 = vmatpush1.bf16.msra.mxu0 %v4621_v59  ;;  %v4684_v59 = vld [vmem:[#allocation29 + $0x70] ss:$8 sps:$4 sm:$0xff]  }
 0x9a8   : > { %2854 = vmatprep.subr.bf16.mxu0 %v4629_v61  ;;  %v4692_v61 = vld [vmem:[#allocation29 + $0x84] ss:$8 sps:$4 sm:$0xff]  }
 0x9ab   : > { %2855 = vmatpush1.bf16.msra.mxu0 %v4627_v63  ;;  %v4690_v63 = vld [vmem:[#allocation29 + $0x80] ss:$8 sps:$4 sm:$0xff]  }
 0x9ac   : > { %2856 = vmatprep.subr.bf16.mxu0 %v4635_v1  ;;  %v4698_v1 = vld [vmem:[#allocation29 + $0x94] ss:$8 sps:$4 sm:$0xff]  }
 0x9af   : > { %2857 = vmatpush1.bf16.msra.mxu0 %v4633_v5  ;;  %v4696_v5 = vld [vmem:[#allocation29 + $0x90] ss:$8 sps:$4 sm:$0xff]  }
 0x9b0   : > { %2858 = vmatprep.subr.bf16.mxu0 %v4641_v2  ;;  %v4704_v2 = vld [vmem:[#allocation29 + $0xa4] ss:$8 sps:$4 sm:$0xff]  }
 0x9b3   : > { %2859 = vmatpush1.bf16.msra.mxu0 %v4639_v46  ;;  %v4702_v46 = vld [vmem:[#allocation29 + $0xa0] ss:$8 sps:$4 sm:$0xff]  }
 0x9b4   : > { %3314 = vmatprep.subr.bf16.mxu0 %v4647_v12  ;;  %v4710_v12 = vld [vmem:[#allocation29 + $0xb4] ss:$8 sps:$4 sm:$0xff]  }
 0xa0c   : > { %v2336_v43 = vpop.xlane.xlu0 %2335 }
 0xa0d   : > { %v2338_v37 = vmul.f32 0.00390625, %v2336_v43  ;;  %v4662_v43 = vld [vmem:[#allocation29 + $0x34] ss:$8 sps:$4 sm:$0xff]  }
 0xa0f   : > { %v6274_v45 = vsub.f32 %v6266_v49, %v2338_v37  ;;  %v6277_v48 = vsub.f32 %v6269_v60, %v2338_v37  ;;  %v4618_v49 = vld [vmem:[#allocation26 + $0x180] ss:$16 sps:$4 sm:$0xff]   ;;  %v4626_v60 = vld [vmem:[#allocation26 + $0x1a4] ss:$16 sps:$4 sm:$0xff]  }
 0xa10   : > { %2812 = vmatpush1.bf16.msra.mxu1 %v4618_v49  ;;  %v4665_v37 = vld [vmem:[#allocation29 + $0x134] ss:$8 sps:$4 sm:$0xff]  }
 0xa11   : > { %v2341_v44 = vmul.f32 %v6274_v45, %v6274_v45  ;;  %v2342_v50 = vmul.f32 %v6277_v48, %v6277_v48  ;;  %2813 = vmatprep.subr.bf16.mxu1 %v4626_v60  ;;  %v4689_v49 = vld [vmem:[#allocation29 + $0x174] ss:$8 sps:$4 sm:$0xff]   ;;  %v4687_v60 = vld [vmem:[#allocation29 + $0x170] ss:$8 sps:$4 sm:$0xff]  }
 0xa13   : > { %v2343_v51 = vadd.f32 %v2342_v50, %v2341_v44  ;;  %v4668_v44 = vld [vmem:[#allocation29 + $0x44] ss:$8 sps:$4 sm:$0xff]  }
 0xa14   : > { %2814 = vmatpush1.bf16.msra.mxu1 %v4624_v62  ;;  %v4671_v50 = vld [vmem:[#allocation29 + $0x144] ss:$8 sps:$4 sm:$0xff]  }
 0xa15   : > { %2344 = vadd.xlane.f32.xlu1 %v2343_v51  ;;  %2815 = vmatprep.subr.bf16.mxu1 %v4632_v0  ;;  %v4666_v51 = vld [vmem:[#allocation29 + $0x40] ss:$8 sps:$4 sm:$0xff]   ;;  %v4695_v62 = vld [vmem:[#allocation29 + $0x184] ss:$8 sps:$4 sm:$0xff]  }
 0xa16   : > { %v4693_v0 = vld [vmem:[#allocation29 + $0x180] ss:$8 sps:$4 sm:$0xff]  }
 0xa18   : > { %2816 = vmatpush1.bf16.msra.mxu1 %v4630_v3  ;;  %v4701_v3 = vld [vmem:[#allocation29 + $0x194] ss:$8 sps:$4 sm:$0xff]  }
 0xa19   : > { %2817 = vmatprep.subr.bf16.mxu1 %v4638_v6  ;;  %v4699_v6 = vld [vmem:[#allocation29 + $0x190] ss:$8 sps:$4 sm:$0xff]  }
 0xa1c   : > { %2818 = vmatpush1.bf16.msra.mxu1 %v4636_v9  ;;  %v4707_v9 = vld [vmem:[#allocation29 + $0x1a4] ss:$8 sps:$4 sm:$0xff]  }
 0xa1d   : > { %3273 = vmatprep.subr.bf16.mxu1 %v4644_v11  ;;  %v4705_v11 = vld [vmem:[#allocation29 + $0x1a0] ss:$8 sps:$4 sm:$0xff]  }
 0xaa2   : > { %v2345_v13 = vpop.xlane.xlu1 %2344 }
 0xaa3   : > { %v2346_v14 = vmul.f32 0.00390625, %v2345_v13  ;;  %v4713_v13 = vld [vmem:[#allocation29 + $0x1b4] ss:$8 sps:$4 sm:$0xff]  }
 0xaa5   : > { %v2347_v15 = vadd.f32 1e-05, %v2346_v14  ;;  %v4708_v14 = vld [vmem:[#allocation29 + $0xb0] ss:$8 sps:$4 sm:$0xff]  }
 0xaa7   : > { %4758 = vrsqrt.f32 %v2347_v15  ;;  %v4711_v15 = vld [vmem:[#allocation29 + $0x1b0] ss:$8 sps:$4 sm:$0xff]  }
 0xab1   : > { %v4759_v20 = vpop.eup %4758 }
 0xab2   : > { %v2349_v21 = vmul.f32 %v4759_v20, %v6274_v45  ;;  %v2350_v22 = vmul.f32 %v4759_v20, %v6277_v48  ;;  %v4660_v45 = vld [vmem:[#allocation29 + $0x30] ss:$8 sps:$4 sm:$0xff]   ;;  %v4722_v20 = vld [vmem:[#allocation29 + $0xd4] ss:$8 sps:$4 sm:$0xff]  }
 0xab3   : > { %v4663_v48 = vld [vmem:[#allocation29 + $0x130] ss:$8 sps:$4 sm:$0xff]  }
 0xab4   : > { %v2364_v25 = vmul.f32 %v2360_v19, %v2350_v22  ;;  %v2363_v26 = vmul.f32 %v2356_v18, %v2349_v21  ;;  %v4714_v18 = vld [vmem:[#allocation29 + $0xc0] ss:$8 sps:$4 sm:$0xff]   ;;  %v4725_v21 = vld [vmem:[#allocation29 + $0x1d4] ss:$8 sps:$4 sm:$0xff]   ;;  %v4720_v22 = vld [vmem:[#allocation29 + $0xd0] ss:$8 sps:$4 sm:$0xff]  }
 0xab5   : > { %v4717_v19 = vld [vmem:[#allocation29 + $0x1c0] ss:$8 sps:$4 sm:$0xff]  }
 0xab6   : > { %v6289_v27 = vadd.f32 %v2374_v24, %v2364_v25  ;;  %v6291_v28 = vadd.f32 %v2370_v23, %v2363_v26  ;;  %v4723_v23 = vld [vmem:[#allocation29 + $0x1d0] ss:$8 sps:$4 sm:$0xff]   ;;  %v4728_v24 = vld [vmem:[#allocation29 + $0xe4] ss:$8 sps:$4 sm:$0xff]   ;;  %v4726_v26 = vld [vmem:[#allocation29 + $0xe0] ss:$8 sps:$4 sm:$0xff]  }
 0xab7   : > { %v4731_v25 = vld [vmem:[#allocation29 + $0x1e4] ss:$8 sps:$4 sm:$0xff]  }
 0xab8   : > { %v2380_v29 = vpack.c.bf16 %v6289_v27, %v6289_v27  ;;  %v2379_v30 = vpack.c.bf16 %v6291_v28, %v6291_v28 }
 0xaba   : > { %2819 = vmatprep.mubr.bf16.mxu1 %v2380_v29  ;;  %2860 = vmatprep.mubr.bf16.mxu0 %v2380_v29  ;;  %v4729_v29 = vld [vmem:[#allocation29 + $0x1e0] ss:$8 sps:$4 sm:$0xff]  }
 0xabb   : > { %2820 = vmatmul.mubr.bf16.vlgmr.msra.gmra.mrb[32].mxu1 %v2379_v30  ;;  %2861 = vmatmul.mubr.bf16.vlgmr.msra.gmra.mrb[8].mxu0 %v2379_v30  ;;  %v4734_v30 = vld [vmem:[#allocation29 + $0xf4] ss:$8 sps:$4 sm:$0xff]  }
 0xabc   : > { %3274 = vmatpush1.bf16.msra.mxu1 %v4642_v31  ;;  %3315 = vmatpush1.bf16.msra.mxu0 %v4645_v32  ;;  %v4737_v31 = vld [vmem:[#allocation29 + $0x1f4] ss:$8 sps:$4 sm:$0xff]   ;;  %v4732_v32 = vld [vmem:[#allocation29 + $0xf0] ss:$8 sps:$4 sm:$0xff]  }
 0xabd   : > { %3275 = vmatprep.subr.bf16.mxu1 %v4650_v33  ;;  %3316 = vmatprep.subr.bf16.mxu0 %v4653_v35  ;;  %v4735_v33 = vld [vmem:[#allocation29 + $0x1f0] ss:$8 sps:$4 sm:$0xff]   ;;  %v2457_v35 = vsub.s32 2, %v6183_v7 }
 0xac0   : > { %3276 = vmatpush1.bf16.msra.mxu1 %v4648_v36  ;;  %3317 = vmatpush1.bf16.msra.mxu0 %v4651_v39  ;;  %v2445_v36 = vld [vmem:[#allocation27] sm:$0xf]  ;;  %v2461_v39 = vsub.s32 3, %v6183_v7 }
 0xac1   : > { %3277 = vmatprep.subr.bf16.mxu1 %v4656_v41  ;;  %3318 = vmatprep.subr.bf16.mxu0 %v4659_v38  ;;  %v2450_v41 = vrot.slane %v2445_v36, %v6186_v8  ;;  %v2458_v38 = vrot.slane %v2445_v36, %v2457_v35 }
 0xac4   : > { %3278 = vmatpush1.bf16.msra.mxu1 %v4654_v34  ;;  %3319 = vmatpush1.bf16.msra.mxu0 %v4657_v42  ;;  %v2454_v34 = vrot.slane %v2445_v36, %v6189_v10  ;;  %v2462_v42 = vrot.slane %v2445_v36, %v2461_v39 }
 0xac5   : > { %3279 = vmatprep.subr.bf16.mxu1 %v4662_v43  ;;  %3320 = vmatprep.subr.bf16.mxu0 %v4665_v37 }
 0xac8   : > { %3280 = vmatpush1.bf16.msra.mxu1 %v4660_v45  ;;  %3321 = vmatpush1.bf16.msra.mxu0 %v4663_v48 }
 0xac9   : > { %3281 = vmatprep.subr.bf16.mxu1 %v4668_v44  ;;  %3322 = vmatprep.subr.bf16.mxu0 %v4671_v50 }
 0xacc   : > { %3282 = vmatpush1.bf16.msra.mxu1 %v4666_v51  ;;  %3323 = vmatpush1.bf16.msra.mxu0 %v4669_v52 }
 0xacd   : > { %3283 = vmatprep.subr.bf16.mxu1 %v4674_v47  ;;  %3324 = vmatprep.subr.bf16.mxu0 %v4677_v53 }
 0xad0   : > { %3284 = vmatpush1.bf16.msra.mxu1 %v4672_v40  ;;  %3325 = vmatpush1.bf16.msra.mxu0 %v4675_v54 }
 0xad1   : > { %3285 = vmatprep.subr.bf16.mxu1 %v4680_v4  ;;  %3326 = vmatprep.subr.bf16.mxu0 %v4683_v55 }
 0xad4   : > { %3286 = vmatpush1.bf16.msra.mxu1 %v4678_v56  ;;  %3327 = vmatpush1.bf16.msra.mxu0 %v4681_v57 }
 0xad5   : > { %3287 = vmatprep.subr.bf16.mxu1 %v4686_v58  ;;  %3328 = vmatprep.subr.bf16.mxu0 %v4689_v49 }
 0xad8   : > { %3288 = vmatpush1.bf16.msra.mxu1 %v4684_v59  ;;  %3329 = vmatpush1.bf16.msra.mxu0 %v4687_v60  ;;  %v2941_v60 = vld [vmem:[#allocation30] sm:$0x3] }
 0xad9   : > { %3289 = vmatprep.subr.bf16.mxu1 %v4692_v61  ;;  %3330 = vmatprep.subr.bf16.mxu0 %v4695_v62  ;;  %v2946_v61 = vrot.slane %v2941_v60, %v6186_v8  ;;  %v2950_v62 = vrot.slane %v2941_v60, %v6189_v10 }
 0xadc   : > { %3290 = vmatpush1.bf16.msra.mxu1 %v4690_v63  ;;  %3331 = vmatpush1.bf16.msra.mxu0 %v4693_v0 }
 0xadd   : > { %3291 = vmatprep.subr.bf16.mxu1 %v4698_v1  ;;  %3332 = vmatprep.subr.bf16.mxu0 %v4701_v3 }
 0xae0   : > { %3292 = vmatpush1.bf16.msra.mxu1 %v4696_v5  ;;  %3333 = vmatpush1.bf16.msra.mxu0 %v4699_v6 }
 0xae1   : > { %3293 = vmatprep.subr.bf16.mxu1 %v4704_v2  ;;  %3334 = vmatprep.subr.bf16.mxu0 %v4707_v9 }
 0xae4   : > { %3294 = vmatpush1.bf16.msra.mxu1 %v4702_v46  ;;  %3335 = vmatpush1.bf16.msra.mxu0 %v4705_v11 }
 0xae5   : > { %3295 = vmatprep.subr.bf16.mxu1 %v4710_v12  ;;  %3336 = vmatprep.subr.bf16.mxu0 %v4713_v13 }
 0xae8   : > { %3296 = vmatpush1.bf16.msra.mxu1 %v4708_v14  ;;  %3337 = vmatpush1.bf16.msra.mxu0 %v4711_v15 }
 0xae9   : > { %3297 = vmatprep.subr.bf16.mxu1 %v4716_v16  ;;  %3338 = vmatprep.subr.bf16.mxu0 %v4719_v17 }
 0xaec   : > { %3298 = vmatpush1.bf16.msra.mxu1 %v4714_v18  ;;  %3339 = vmatpush1.bf16.msra.mxu0 %v4717_v19 }
 0xaed   : > { %3299 = vmatprep.subr.bf16.mxu1 %v4722_v20  ;;  %3340 = vmatprep.subr.bf16.mxu0 %v4725_v21 }
 0xaf0   : > { %3300 = vmatpush1.bf16.msra.mxu1 %v4720_v22  ;;  %3341 = vmatpush1.bf16.msra.mxu0 %v4723_v23 }
 0xaf1   : > { %3301 = vmatprep.subr.bf16.mxu1 %v4728_v24  ;;  %3342 = vmatprep.subr.bf16.mxu0 %v4731_v25 }
 0xaf4   : > { %3302 = vmatpush1.bf16.msra.mxu1 %v4726_v26  ;;  %3343 = vmatpush1.bf16.msra.mxu0 %v4729_v29 }
 0xaf5   : > { %3303 = vmatprep.subr.bf16.mxu1 %v4734_v30  ;;  %3344 = vmatprep.subr.bf16.mxu0 %v4737_v31 }
 0xaf8   : > { %3304 = vmatpush1.bf16.msra.mxu1 %v4732_v32  ;;  %3345 = vmatpush1.bf16.msra.mxu0 %v4735_v33 }
 0xb8e   : > { %v2821_v43 = vpop.f32.mrb[32].mxu1  ;;  %v2862_v37 = vpop.f32.mrb[8].mxu0 }
 0xb8f   : > { %v2822_v45 = vadd.f32 %v2821_v43, %v2450_v41  ;;  %v2863_v48 = vadd.f32 %v2862_v37, %v2458_v38  ;;  %v2823_v44 = vpop.f32.mrb[33].mxu1  ;;  %v2864_v50 = vpop.f32.mrb[9].mxu0 }
 0xb90   : > { %v2824_v51 = vadd.f32 %v2823_v44, %v2454_v34  ;;  %v2865_v52 = vadd.f32 %v2864_v50, %v2462_v42  ;;  %v2825_v47 = vpop.f32.mrb[34].mxu1  ;;  %v2866_v53 = vpop.f32.mrb[10].mxu0 }
 0xb91   : > { %v2869_v40 = vmax.f32 %v2822_v45, 0.0  ;;  %v2871_v54 = vmax.f32 %v2863_v48, 0.0  ;;  %v2826_v4 = vpop.f32.mrb[35].mxu1  ;;  %v2867_v7 = vpop.f32.mrb[11].mxu0 }
 0xb92   : > { %v2870_v55 = vmax.f32 %v2824_v51, 0.0  ;;  %v2872_v56 = vmax.f32 %v2865_v52, 0.0 }
 0xb93   : > { %v2873_v49 = vpack.c.bf16 %v2869_v40, %v2869_v40  ;;  %v2875_v59 = vpack.c.bf16 %v2871_v54, %v2871_v54 }
 0xb94   : > { %v2874_v57 = vpack.c.bf16 %v2870_v55, %v2870_v55  ;;  %v2876_v58 = vpack.c.bf16 %v2872_v56, %v2872_v56 }
 0xb96   : > { %3305 = vmatprep.mubr.bf16.mxu1 %v2874_v57  ;;  %3346 = vmatprep.mubr.bf16.mxu0 %v2876_v58 }
 0xb97   : > { %3306 = vmatmul.mubr.bf16.vlgmr.msra.gmra.mrb[36].mxu1 %v2873_v49  ;;  %3347 = vmatmul.mubr.bf16.vlgmr.msra.gmra.mrb[12].mxu0 %v2875_v59 }
 0xc6a   : > { %v3307_v63 = vpop.f32.mrb[36].mxu1  ;;  %v3348_v0 = vpop.f32.mrb[12].mxu0 }
 0xc6b   : > { %v3308_v1 = vadd.f32 %v3307_v63, %v2946_v61  ;;  %v3309_v3 = vpop.f32.mrb[37].mxu1  ;;  %v3350_v5 = vpop.f32.mrb[13].mxu0 }
 0xc6c   : > { %v3310_v6 = vadd.f32 %v3309_v3, %v2950_v62  ;;  %v3311_v2 = vpop.f32.mrb[38].mxu1  ;;  %v3352_v9 = vpop.f32.mrb[14].mxu0 }
 0xc6d   : > { %v3349_v46 = vadd.f32 %v3348_v0, %v3308_v1  ;;  %v3312_v11 = vpop.f32.mrb[39].mxu1  ;;  %v3353_v12 = vpop.f32.mrb[15].mxu0 }
 0xc6e   : > { %v3351_v13 = vadd.f32 %v3350_v5, %v3310_v6 }
 0xc6f   : > { %v3355_v14 = vadd.f32 %v3349_v46, %v6291_v28  ;;  %v3373_v28 = vld [vmem:[#allocation32] sm:$0x3] }
 0xc70   : > { %v3356_v15 = vadd.f32 %v3351_v13, %v6289_v27  ;;  %v3387_v27 = vld [vmem:[#allocation33] sm:$0x3]  ;;  %v3378_v29 = vrot.slane %v3373_v28, %v6186_v8  ;;  %v3382_v30 = vrot.slane %v3373_v28, %v6189_v10 }
 0xc71   : > { %v3392_v35 = vrot.slane %v3387_v27, %v6186_v8  ;;  %v3396_v36 = vrot.slane %v3387_v27, %v6189_v10 }
 0xc72   : > { %v3357_v16 = vadd.f32 %v3356_v15, %v3355_v14 }
 0xc74   : > { %3358 = vadd.xlane.f32.xlu0 %v3357_v16 }
 0xd01   : > { %v3359_v17 = vpop.xlane.xlu0 %3358 }
 0xd02   : > { %v3360_v18 = vmul.f32 0.00390625, %v3359_v17 }
 0xd04   : > { %v3361_v19 = vsub.f32 %v3355_v14, %v3360_v18  ;;  %v3362_v20 = vsub.f32 %v3356_v15, %v3360_v18 }
 0xd06   : > { %v3363_v21 = vmul.f32 %v3361_v19, %v3361_v19  ;;  %v3364_v22 = vmul.f32 %v3362_v20, %v3362_v20 }
 0xd08   : > { %v3365_v23 = vadd.f32 %v3364_v22, %v3363_v21 }
 0xd0a   : > { %3366 = vadd.xlane.f32.xlu1 %v3365_v23 }
 0xd97   : > { %v3367_v24 = vpop.xlane.xlu1 %3366 }
 0xd98   : > { %v3368_v25 = vmul.f32 0.00390625, %v3367_v24 }
 0xd9a   : > { %v3369_v26 = vadd.f32 1e-05, %v3368_v25 }
 0xd9c   : > { %4760 = vrsqrt.f32 %v3369_v26 }
 0xda6   : > { %v4761_v31 = vpop.eup %4760 }
 0xda7   : > { %v3371_v32 = vmul.f32 %v4761_v31, %v3361_v19  ;;  %v3372_v33 = vmul.f32 %v4761_v31, %v3362_v20 }
 0xda9   : > { %v3385_v39 = vmul.f32 %v3378_v29, %v3371_v32  ;;  %v3386_v41 = vmul.f32 %v3382_v30, %v3372_v33 }
 0xdab   : > { %v3399_v38 = vadd.f32 %v3392_v35, %v3385_v39  ;;  %v3400_v34 = vadd.f32 %v3396_v36, %v3386_v41 }
 0xdad   : > { %3401 = vst [vmem:[%s6160_s28] sm:$0xff] %v3399_v38  ;;  %3402 = vst [vmem:[%s6160_s28 + $0x8] sm:$0xff] %v3400_v34 }
 0xdae   : > { %5283 = shalt.err (!%p5280_p6)
}
 0xdaf   : > { %s5284_s25 = scalar_lea.hbm %s6315_s2, 256  ;;  %s5288_s8 = scalar_lea.hbm %s6538_s5, 1024 }
 0xdb0   : > { %p5285_p3 = scmp.ne.s32.totalorder %s6315_s2, %s5284_s25  ;;  %p5289_p4 = scmp.lt.u32.totalorder %s6315_s2, %s6538_s5 }
 0xdb1   : > { %p5290_p8 = scmp.lt.u32.totalorder %s5288_s8, %s5284_s25  ;;  %p5292_p1 = scmp.lt.u32.totalorder %s5284_s25, %s6315_s2 }
 0xdb2   : > { %p5286_p2 = pnand %p5285_p3, %p6539_p11 }
 0xdb3   : > { %p5291_p13 = por %p5290_p8, %p5289_p4 }
 0xdb4   : > { %p5287_p0 = pneg %p5286_p2 }
 0xdb5   : > { %p5293_p5 = por %p5292_p1, %p5291_p13 }
 0xdb7   : > { %p5294_p12 = pnand %p5293_p5, %p5287_p0 }
 0xdb9   : > { %5297 = shalt.err (!%p5294_p12)
}
 0xdba   : > { %4145 = dma.vmem_to_hbm [thread:$0]  (%p6539_p11), %s6317_s4, 256, %s6315_s2, %s3404_s29  }
 0xdbb PF: > { %s6540_s9 = sld [smem:[#allocation58_spill]]  ;;  %s6541_s10 = sld [smem:[#allocation48_spill]] }
 0xdbc   : > { %p6542_p10 = scmp.ne.s32.totalorder %s6504_s0, 0 }
 0xdc1   : > { %p4240_p9 = scmp.ge.s32.totalorder %s6540_s9, 2  ;;  %s3432_s11 = sand.u32 1, %s6541_s10  }
 0xdc2   : > { %s3433_s12 = scalar_lea.sflag [#allocation8], %s3432_s11 }
 0xdc3   : > { %p4204_p7 = pnand %p4240_p9, %p6542_p10 }
 0xdc5   : > { %5387 = dma.done.wait (!%p4204_p7), %s3433_s12, 256  }
 0xdc6   : > { %5389 = vsyncadd (!%p4204_p7), %s3433_s12, 4294967040  ;;  %s45_s2 = sadd.s32 1, %s6540_s9   ;;  %s6543_s13 = sld [smem:[#allocation49_spill]] }
 0xdc7   : > { %p42_p6 = scmp.ge.s32.totalorder %s45_s2, 6   ;;  %s6544_s28 = sld [smem:[#allocation50_spill]] }
 0xdc8   : > { %s6545_s21 = sld [smem:[#allocation52_spill]]  ;;  %s6546_s0 = sld [smem:[#allocation53_spill]] }
 0xdc9   : > { %s6547_s15 = smov %s6565_s30  ;;  %s6548_s16 = sld [smem:[#allocation56_spill]] }
 0xdca   : > { %s6549_s20 = sld [smem:[#allocation57_spill]]  ;;  %s6550_s4 = smov %s6559_s27 }
 0xdcb   : > { %s6551_s22 = smov %s6563_s1  ;;  %s6553_s29 = smov %s6057_s3 }
 0xdcc   : > { %s6552_s27 = smov %s6543_s13  ;;  %s6555_s19 = smov %s6547_s15 }
 0xdcd   :  { %44 = sbr.rel (!%p42_p6) target bundleno = 39 (0x27), region = 221 }
 0xdce   : > { %s6554_s30 = smov %s6545_s21  ;;  %s6557_s21 = smov %s6550_s4 }
 0xdcf   : > { %s6556_s1 = smov %s6548_s16 }
 0xdd4   :  { %3438 = vsyncpa [#allocation7], 1 }
 0xdd5   :  { %3440 = vsyncpa [#allocation7 + $0x1], 1 }
 0xdd6   :  { %3441 = vsyncpa [#allocation10], 1 }
 0xdd7   :  { %3443 = vsyncpa [#allocation10 + $0x1], 1 }
 0xdd8   :  { %3444 = vsyncpa [#allocation13], 1 }
 0xdd9   :  { %3445 = vsyncpa [#allocation16], 1 }
 0xdda   :  { %3446 = vsyncpa [#allocation19], 1 }
 0xddb   :  { %3447 = vsyncpa [#allocation22], 1 }
 0xddc   :  { %3448 = vsyncpa [#allocation25], 1 }
 0xddd   :  { %3449 = vsyncpa [#allocation28], 1 }
 0xdde   :  { %3450 = vsyncpa [#allocation31], 1 }
 0xddf   :  { %3451 = vsyncpa [#allocation34], 1 }
 0xde0   :  { %3452 = vsyncpa [#allocation8], 1 }
 0xde1   :  { %3454 = vsyncpa [#allocation8 + $0x1], 1 }

</bundles_post_ra>
